<compile_context>
chip_gen: v6e
topology: v6e:2x2x1
jax: 0.10.0
libtpu: 0.0.40
codegen_flags: <defaults>
</compile_context>

<pallas_src>
import jax
import jax.numpy as jnp
from jax.experimental import pallas as pl
from jax.experimental.pallas import tpu as pltpu


def _round_up(x, m):
    return ((x + m - 1) // m) * m


# ----------------------------------------------------------------------------
# Small-vocabulary path: per-block one-hot x raw-table matmul, lane-packed out.
# ----------------------------------------------------------------------------
def _span_embed_matmul_kernel(idx_ref, start_ref, end_ref, out_ref):
    # idx_ref:   (TM_R, 2R) int32 -- row r packs R logical rows [s0,e0,s1,e1,...]
    # start_ref: (V_pad, half)    -- raw start table (zero rows V..V_pad)
    # end_ref:   (V_pad, half)    -- raw end table
    # out_ref:   (TM_R, R*dim)    -- lane-dense output tile
    tm_r, ncols = idx_ref.shape          # ncols == 2R
    v_pad, _half = start_ref.shape

    oh_dtype = jnp.bfloat16 if start_ref.dtype == jnp.bfloat16 else jnp.float32
    prec = jax.lax.Precision.HIGHEST if oh_dtype == jnp.float32 else None

    s_vals = start_ref[...].astype(oh_dtype)     # hoisted out of the block loop
    e_vals = end_ref[...].astype(oh_dtype)
    iota = jax.lax.broadcasted_iota(jnp.int32, (tm_r, v_pad), 1)

    # Per-block one-hot fused with a small dot: the live one-hot is only
    # (TM_R, V_pad); indices outside [0, V_pad) match nothing -> zero embedding
    # (no cross-block false matches by construction).
    parts = []
    for c in range(ncols):               # unrolled; 2R is small (<= 8)
        tab = s_vals if c % 2 == 0 else e_vals
        onehot = (iota == idx_ref[:, c:c + 1]).astype(oh_dtype)
        parts.append(jnp.dot(onehot, tab,
                             preferred_element_type=jnp.float32,
                             precision=prec))
    out_ref[...] = jnp.concatenate(parts, axis=-1).astype(out_ref.dtype)


def _matmul_path(flat_idx, start_tab, end_tab, *, tile_rows):
    rows, _ = flat_idx.shape
    V, half = start_tab.shape
    dim = 2 * half
    out_dtype = start_tab.dtype
    itemsize = jnp.dtype(out_dtype).itemsize

    # Lane-packing factor: pack R logical rows into one 128-lane output row so
    # the writeback is an unmasked, lane-dense vst. (If dim doesn't divide 128
    # the output lane width is < 128 -> masked stores; correct, just slower.)
    R = 128 // dim if (dim < 128 and 128 % dim == 0) else 1
    W = R * dim

    # dtype-aware native sublane count: 8 (f32) / 16 (bf16) / 32 (int8/fp8).
    sublane = max(8, 32 // itemsize)
    row_align = sublane * R

    rows_p = _round_up(rows, row_align)
    tile = _round_up(min(tile_rows, rows_p), row_align)
    # Give the 1-D "parallel" grid >= 2 steps when possible so both v7x
    # TensorCores get work (no effect on single-core v5e/v6e).
    if rows_p // tile < 2 and rows_p >= 2 * row_align:
        tile = _round_up(rows_p // 2, row_align)
    rows_p = _round_up(rows_p, tile)
    grid = rows_p // tile
    tm_r = tile // R

    if rows_p != rows:
        flat_idx = jnp.pad(flat_idx, ((0, rows_p - rows), (0, 0)))  # idx 0 is valid
    idx = flat_idx.reshape(rows_p // R, 2 * R)                      # free, row-major

    # Raw tables, padded to a lane-aligned vocab so the one-hot K dim is clean.
    V_pad = _round_up(V, 128)
    start_p = jnp.pad(start_tab, ((0, V_pad - V), (0, 0)))
    end_p = jnp.pad(end_tab, ((0, V_pad - V), (0, 0)))

    # VMEM budget: double-buffered idx/out tiles + (constant-index-map, so only
    # DMA'd once) tables + live one-hot vregs + margin; cap at 48 MiB so we
    # leave headroom on v7x's 64 MiB physical VMEM.
    need = (2 * tm_r * 2 * R * 4
            + 2 * tm_r * W * itemsize
            + 2 * 2 * V_pad * half * itemsize
            + 2 * tm_r * V_pad * 4
            + (2 << 20))
    vmem_limit = int(min(max(need, 16 << 20), 48 << 20))

    out = pl.pallas_call(
        _span_embed_matmul_kernel,
        out_shape=jax.ShapeDtypeStruct((rows_p // R, W), out_dtype),
        grid_spec=pltpu.PrefetchScalarGridSpec(
            num_scalar_prefetch=0,
            grid=(grid,),
            in_specs=[
                pl.BlockSpec((tm_r, 2 * R), lambda i: (i, 0)),     # packed spans
                pl.BlockSpec((V_pad, half), lambda i: (0, 0)),     # start table
                pl.BlockSpec((V_pad, half), lambda i: (0, 0)),     # end table
            ],
            out_specs=pl.BlockSpec((tm_r, W), lambda i: (i, 0)),
        ),
        compiler_params=pltpu.CompilerParams(
            dimension_semantics=("parallel",),
            vmem_limit_bytes=vmem_limit,
        ),
    )(idx, start_p, end_p)

    return out.reshape(rows_p, dim)[:rows]      # free reshape (same bytes)


# ----------------------------------------------------------------------------
# Large-vocabulary (production) path: scalar-prefetch + pl.Element row-DMA
# gather. HBM traffic is exactly the gathered rows; no O(rows*V) work.
# ----------------------------------------------------------------------------
def _span_gather_kernel(s_ids_ref, e_ids_ref, s_row_ref, e_row_ref, out_ref):
    # s_row_ref / e_row_ref: (1, half) rows fetched by the index_map-driven DMA.
    del s_ids_ref, e_ids_ref        # only consumed by the index_maps
    row = jnp.concatenate([s_row_ref[...], e_row_ref[...]], axis=-1)   # (1, dim)
    out_ref[...] = row.reshape(out_ref.shape).astype(out_ref.dtype)


def _gather_path(flat_idx, start_tab, end_tab):
    rows, _ = flat_idx.shape
    V, half = start_tab.shape
    dim = 2 * half
    out_dtype = start_tab.dtype

    # Clamp so a bad index can never drive the row DMA out of bounds
    # (PyTorch would raise; valid inputs are unaffected).
    s_ids = jnp.clip(flat_idx[:, 0], 0, V - 1).astype(jnp.int32)
    e_ids = jnp.clip(flat_idx[:, 1], 0, V - 1).astype(jnp.int32)

    # TODO(synk): batch several rows per grid step (manual make_async_copy
    # gather) if B*N grows large enough that the ~0.35us/step overhead matters.
    out = pl.pallas_call(
        _span_gather_kernel,
        out_shape=jax.ShapeDtypeStruct((rows, 1, dim), out_dtype),
        grid_spec=pltpu.PrefetchScalarGridSpec(
            num_scalar_prefetch=2,
            grid=(rows,),
            in_specs=[
                pl.BlockSpec((pl.Element(1), half), lambda i, s, e: (s[i], 0)),
                pl.BlockSpec((pl.Element(1), half), lambda i, s, e: (e[i], 0)),
            ],
            out_specs=pl.BlockSpec((1, 1, dim), lambda i, s, e: (i, 0, 0)),
        ),
        compiler_params=pltpu.CompilerParams(
            dimension_semantics=("parallel",),
            vmem_limit_bytes=16 * 1024 * 1024,
        ),
    )(s_ids, e_ids, start_tab, end_tab)

    return out.reshape(rows, dim)


# ----------------------------------------------------------------------------
# Public entry point.
# ----------------------------------------------------------------------------
def chunk_span_embedding(spans, start_tab, end_tab, *, tile_rows=2048,
                         matmul_max_vocab=512):
    """spans: (B, N, 2) int; start_tab/end_tab: (V, half); returns (B, N, 2*half).

    Matches torch.cat([start_emb(spans[...,0]), end_emb(spans[...,1])], dim=-1).
    Small vocabularies use the fused one-hot matmul; production-size
    vocabularies (V > matmul_max_vocab, e.g. max_frames=4000) use the row-DMA
    gather path. Out-of-range indices: zeros (small-V path) / clamped
    (large-V path); PyTorch would raise."""
    B, N, two = spans.shape
    assert two == 2
    V, half = start_tab.shape
    assert end_tab.shape == (V, half)
    dim = 2 * half

    flat = spans.reshape(B * N, 2).astype(jnp.int32)
    if V <= matmul_max_vocab:
        out = _matmul_path(flat, start_tab, end_tab, tile_rows=tile_rows)
    else:
        out = _gather_path(flat, start_tab, end_tab)
    return out.reshape(B, N, dim)


if __name__ == "__main__":
    key = jax.random.PRNGKey(0)
    k_sp1, k_st1, k_en1, k_sp2, k_st2, k_en2 = jax.random.split(key, 6)

    dim = 32
    half = dim // 2
    B, N = 2, 8

    # --- small-vocab path (fused per-block one-hot matmul) ---
    max_frames = 64
    V = max_frames + 1
    start_tab = jax.random.normal(k_st1, (V, half), dtype=jnp.float32)
    end_tab = jax.random.normal(k_en1, (V, half), dtype=jnp.float32)
    spans = jax.random.randint(k_sp1, (B, N, 2), 0, max_frames + 1,
                               dtype=jnp.int32)
    out = jax.block_until_ready(chunk_span_embedding(spans, start_tab, end_tab))
    ref = jnp.concatenate(
        [start_tab[spans[..., 0]], end_tab[spans[..., 1]]], axis=-1)
    assert out.shape == (B, N, dim)
    assert jnp.allclose(out, ref, atol=1e-6), "small-V path mismatch"

    # --- production-vocab path (scalar-prefetch row-DMA gather) ---
    max_frames2 = 4000
    V2 = max_frames2 + 1
    start_tab2 = jax.random.normal(k_st2, (V2, half), dtype=jnp.float32)
    end_tab2 = jax.random.normal(k_en2, (V2, half), dtype=jnp.float32)
    spans2 = jax.random.randint(k_sp2, (B, N, 2), 0, max_frames2 + 1,
                                dtype=jnp.int32)
    out2 = jax.block_until_ready(
        chunk_span_embedding(spans2, start_tab2, end_tab2))
    ref2 = jnp.concatenate(
        [start_tab2[spans2[..., 0]], end_tab2[spans2[..., 1]]], axis=-1)
    assert out2.shape == (B, N, dim)
    assert jnp.allclose(out2, ref2, atol=1e-6), "large-V gather path mismatch"

    print("KERNEL_OK")
</pallas_src>

<mosaic_0001>
module attributes {stable_mosaic.version = 11 : i64} {
  func.func @_span_embed_matmul_kernel(%arg0: i32, %arg1: memref<8x8xi32, #tpu.memory_space<vmem>>, %arg2: memref<128x16xf32, #tpu.memory_space<vmem>>, %arg3: memref<128x16xf32, #tpu.memory_space<vmem>>, %arg4: memref<8x128xf32, #tpu.memory_space<vmem>>) attributes {dimension_semantics = [#tpu.dimension_semantics<parallel>], iteration_bounds = array<i64: 1>, scalar_prefetch = 0 : i64, scratch_operands = 0 : i64, tpu.core_type = #tpu.core_type<tc>, window_params = [{transform_indices = @transform_0, window_bounds = array<i64: 8, 8>}, {pipeline_mode = #tpu.pipeline_mode<synchronous>, transform_indices = @transform_1, window_bounds = array<i64: 128, 16>}, {pipeline_mode = #tpu.pipeline_mode<synchronous>, transform_indices = @transform_2, window_bounds = array<i64: 128, 16>}, {transform_indices = @transform_3, window_bounds = array<i64: 8, 128>}]} {
    %c0 = arith.constant 0 : index
    %c0_0 = arith.constant 0 : index
    %0 = vector.load %arg2[%c0, %c0_0] : memref<128x16xf32, #tpu.memory_space<vmem>>, vector<128x16xf32>
    %c0_1 = arith.constant 0 : index
    %c0_2 = arith.constant 0 : index
    %1 = vector.load %arg3[%c0_1, %c0_2] : memref<128x16xf32, #tpu.memory_space<vmem>>, vector<128x16xf32>
    %2 = tpu.iota {dimensions = array<i32: 1>} : vector<8x128xi32>
    %c0_3 = arith.constant 0 : index
    %c0_4 = arith.constant 0 : index
    %3 = vector.load %arg1[%c0_3, %c0_4] : memref<8x8xi32, #tpu.memory_space<vmem>>, vector<8x1xi32>
    %4 = vector.broadcast %3 : vector<8x1xi32> to vector<8x128xi32>
    %5 = arith.cmpi eq, %2, %4 : vector<8x128xi32>
    %6 = arith.extui %5 : vector<8x128xi1> to vector<8x128xi32>
    %7 = arith.sitofp %6 : vector<8x128xi32> to vector<8x128xf32>
    %cst = arith.constant dense<0.000000e+00> : vector<8x16xf32>
    %8 = tpu.matmul %7, %0, %cst {dimension_numbers = #tpu.dot_dimension_numbers<[1], [0], [0], [1], [0, 0, 1, 1], [], []>, precision = #tpu.contract_precision<fp32>} : vector<8x128xf32>, vector<128x16xf32>, vector<8x16xf32> -> vector<8x16xf32>
    %c0_5 = arith.constant 0 : index
    %c1 = arith.constant 1 : index
    %9 = vector.load %arg1[%c0_5, %c1] : memref<8x8xi32, #tpu.memory_space<vmem>>, vector<8x1xi32>
    %10 = vector.broadcast %9 : vector<8x1xi32> to vector<8x128xi32>
    %11 = arith.cmpi eq, %2, %10 : vector<8x128xi32>
    %12 = arith.extui %11 : vector<8x128xi1> to vector<8x128xi32>
    %13 = arith.sitofp %12 : vector<8x128xi32> to vector<8x128xf32>
    %cst_6 = arith.constant dense<0.000000e+00> : vector<8x16xf32>
    %14 = tpu.matmul %13, %1, %cst_6 {dimension_numbers = #tpu.dot_dimension_numbers<[1], [0], [0], [1], [0, 0, 1, 1], [], []>, precision = #tpu.contract_precision<fp32>} : vector<8x128xf32>, vector<128x16xf32>, vector<8x16xf32> -> vector<8x16xf32>
    %c0_7 = arith.constant 0 : index
    %c2 = arith.constant 2 : index
    %15 = vector.load %arg1[%c0_7, %c2] : memref<8x8xi32, #tpu.memory_space<vmem>>, vector<8x1xi32>
    %16 = vector.broadcast %15 : vector<8x1xi32> to vector<8x128xi32>
    %17 = arith.cmpi eq, %2, %16 : vector<8x128xi32>
    %18 = arith.extui %17 : vector<8x128xi1> to vector<8x128xi32>
    %19 = arith.sitofp %18 : vector<8x128xi32> to vector<8x128xf32>
    %cst_8 = arith.constant dense<0.000000e+00> : vector<8x16xf32>
    %20 = tpu.matmul %19, %0, %cst_8 {dimension_numbers = #tpu.dot_dimension_numbers<[1], [0], [0], [1], [0, 0, 1, 1], [], []>, precision = #tpu.contract_precision<fp32>} : vector<8x128xf32>, vector<128x16xf32>, vector<8x16xf32> -> vector<8x16xf32>
    %c0_9 = arith.constant 0 : index
    %c3 = arith.constant 3 : index
    %21 = vector.load %arg1[%c0_9, %c3] : memref<8x8xi32, #tpu.memory_space<vmem>>, vector<8x1xi32>
    %22 = vector.broadcast %21 : vector<8x1xi32> to vector<8x128xi32>
    %23 = arith.cmpi eq, %2, %22 : vector<8x128xi32>
    %24 = arith.extui %23 : vector<8x128xi1> to vector<8x128xi32>
    %25 = arith.sitofp %24 : vector<8x128xi32> to vector<8x128xf32>
    %cst_10 = arith.constant dense<0.000000e+00> : vector<8x16xf32>
    %26 = tpu.matmul %25, %1, %cst_10 {dimension_numbers = #tpu.dot_dimension_numbers<[1], [0], [0], [1], [0, 0, 1, 1], [], []>, precision = #tpu.contract_precision<fp32>} : vector<8x128xf32>, vector<128x16xf32>, vector<8x16xf32> -> vector<8x16xf32>
    %c0_11 = arith.constant 0 : index
    %c4 = arith.constant 4 : index
    %27 = vector.load %arg1[%c0_11, %c4] : memref<8x8xi32, #tpu.memory_space<vmem>>, vector<8x1xi32>
    %28 = vector.broadcast %27 : vector<8x1xi32> to vector<8x128xi32>
    %29 = arith.cmpi eq, %2, %28 : vector<8x128xi32>
    %30 = arith.extui %29 : vector<8x128xi1> to vector<8x128xi32>
    %31 = arith.sitofp %30 : vector<8x128xi32> to vector<8x128xf32>
    %cst_12 = arith.constant dense<0.000000e+00> : vector<8x16xf32>
    %32 = tpu.matmul %31, %0, %cst_12 {dimension_numbers = #tpu.dot_dimension_numbers<[1], [0], [0], [1], [0, 0, 1, 1], [], []>, precision = #tpu.contract_precision<fp32>} : vector<8x128xf32>, vector<128x16xf32>, vector<8x16xf32> -> vector<8x16xf32>
    %c0_13 = arith.constant 0 : index
    %c5 = arith.constant 5 : index
    %33 = vector.load %arg1[%c0_13, %c5] : memref<8x8xi32, #tpu.memory_space<vmem>>, vector<8x1xi32>
    %34 = vector.broadcast %33 : vector<8x1xi32> to vector<8x128xi32>
    %35 = arith.cmpi eq, %2, %34 : vector<8x128xi32>
    %36 = arith.extui %35 : vector<8x128xi1> to vector<8x128xi32>
    %37 = arith.sitofp %36 : vector<8x128xi32> to vector<8x128xf32>
    %cst_14 = arith.constant dense<0.000000e+00> : vector<8x16xf32>
    %38 = tpu.matmul %37, %1, %cst_14 {dimension_numbers = #tpu.dot_dimension_numbers<[1], [0], [0], [1], [0, 0, 1, 1], [], []>, precision = #tpu.contract_precision<fp32>} : vector<8x128xf32>, vector<128x16xf32>, vector<8x16xf32> -> vector<8x16xf32>
    %c0_15 = arith.constant 0 : index
    %c6 = arith.constant 6 : index
    %39 = vector.load %arg1[%c0_15, %c6] : memref<8x8xi32, #tpu.memory_space<vmem>>, vector<8x1xi32>
    %40 = vector.broadcast %39 : vector<8x1xi32> to vector<8x128xi32>
    %41 = arith.cmpi eq, %2, %40 : vector<8x128xi32>
    %42 = arith.extui %41 : vector<8x128xi1> to vector<8x128xi32>
    %43 = arith.sitofp %42 : vector<8x128xi32> to vector<8x128xf32>
    %cst_16 = arith.constant dense<0.000000e+00> : vector<8x16xf32>
    %44 = tpu.matmul %43, %0, %cst_16 {dimension_numbers = #tpu.dot_dimension_numbers<[1], [0], [0], [1], [0, 0, 1, 1], [], []>, precision = #tpu.contract_precision<fp32>} : vector<8x128xf32>, vector<128x16xf32>, vector<8x16xf32> -> vector<8x16xf32>
    %c0_17 = arith.constant 0 : index
    %c7 = arith.constant 7 : index
    %45 = vector.load %arg1[%c0_17, %c7] : memref<8x8xi32, #tpu.memory_space<vmem>>, vector<8x1xi32>
    %46 = vector.broadcast %45 : vector<8x1xi32> to vector<8x128xi32>
    %47 = arith.cmpi eq, %2, %46 : vector<8x128xi32>
    %48 = arith.extui %47 : vector<8x128xi1> to vector<8x128xi32>
    %49 = arith.sitofp %48 : vector<8x128xi32> to vector<8x128xf32>
    %cst_18 = arith.constant dense<0.000000e+00> : vector<8x16xf32>
    %50 = tpu.matmul %49, %1, %cst_18 {dimension_numbers = #tpu.dot_dimension_numbers<[1], [0], [0], [1], [0, 0, 1, 1], [], []>, precision = #tpu.contract_precision<fp32>} : vector<8x128xf32>, vector<128x16xf32>, vector<8x16xf32> -> vector<8x16xf32>
    %51 = tpu.concatenate %8, %14, %20, %26, %32, %38, %44, %50 in 1 : vector<8x16xf32>, vector<8x16xf32>, vector<8x16xf32>, vector<8x16xf32>, vector<8x16xf32>, vector<8x16xf32>, vector<8x16xf32>, vector<8x16xf32> -> vector<8x128xf32>
    %c0_19 = arith.constant 0 : index
    %c0_20 = arith.constant 0 : index
    %52 = vector.load %arg4[%c0_19, %c0_20] : memref<8x128xf32, #tpu.memory_space<vmem>>, vector<8x128xf32>
    tpu.vector_store %arg4[%c0_19, %c0_20], %51 {strides = array<i32>} : memref<8x128xf32, #tpu.memory_space<vmem>>, vector<8x128xf32>,
    return
  }
  func.func @transform_0(%arg0: i32) -> (i32, i32) {
    %c0_i32 = arith.constant 0 : i32
    %c0_i32_0 = arith.constant 0 : i32
    return %arg0, %c0_i32 : i32, i32
  }
  func.func @transform_1(%arg0: i32) -> (i32, i32) {
    %c0_i32 = arith.constant 0 : i32
    %c0_i32_0 = arith.constant 0 : i32
    %c0_i32_1 = arith.constant 0 : i32
    return %c0_i32, %c0_i32_0 : i32, i32
  }
  func.func @transform_2(%arg0: i32) -> (i32, i32) {
    %c0_i32 = arith.constant 0 : i32
    %c0_i32_0 = arith.constant 0 : i32
    %c0_i32_1 = arith.constant 0 : i32
    return %c0_i32, %c0_i32_0 : i32, i32
  }
  func.func @transform_3(%arg0: i32) -> (i32, i32) {
    %c0_i32 = arith.constant 0 : i32
    %c0_i32_0 = arith.constant 0 : i32
    return %arg0, %c0_i32 : i32, i32
  }
}

</mosaic_0001>

<bundles_post_ra>
// kernel: tpu_custom_call.1
= control target key start
LH: loop header
LB: loop body
LE: loop exit
PB: predicated region body
PF: predicated region fallthrough
CT: control target
= control target key end

     0   :  { %v7863_v3 = vmov 0   ;;  %v10363_v4 = vmov 0.0   ;;  %vm7865_vm0 = vmmov 0   ;;  %s10325_s0 = inlined_call_operand.vmem [shape: s32[8,8], index: 0, kind: input, shape index: {}]   ;;  %s10326_s1 = inlined_call_operand.vmem [shape: f32[128,16], index: 1, kind: input, shape index: {}]   ;;  %s10327_s2 = inlined_call_operand.vmem [shape: f32[128,16], index: 2, kind: input, shape index: {}]   ;;  %s10328_s3 = inlined_call_operand.hbm [shape: f32[8,128], index: 3, kind: output, shape index: {}]  }
   0x1   :  { %v7905_v0 = vld [vmem:[%s10325_s0] sm:$0xff]  ;;  %v30_v1 = vld [vmem:[%s10326_s1 + $0x78] sm:$0xff]  ;;  %v29_v2 = vld [vmem:[%s10326_s1 + $0x70] sm:$0xff]  ;;  %7830 = vset.pattern.permute.xlu0 %v7863_v3  ;;  %6166 = vmatprep.subr.mxu1 %v10363_v4 }
   0x2   :  { %v7914_v5 = vand.u32 4294901760, %v30_v1  ;;  %v7916_v6 = vand.u32 4294901760, %v29_v2  ;;  %v28_v7 = vld [vmem:[%s10326_s1 + $0x68] sm:$0xff]  ;;  %v27_v8 = vld [vmem:[%s10326_s1 + $0x60] sm:$0xff]  ;;  %v26_v9 = vld [vmem:[%s10326_s1 + $0x58] sm:$0xff]  ;;  %51 = vperm.xlu0 %7830, %v7905_v0   ;;  %6131 = vmatprep.subr.mxu0 %v10363_v4 }
   0x3   :  { %v7928_v10 = vand.u32 4294901760, %v28_v7  ;;  %v7930_v11 = vand.u32 4294901760, %v27_v8  ;;  %v7933_v12 = vand.u32 4294901760, %v26_v9  ;;  %v25_v13 = vld [vmem:[%s10326_s1 + $0x50] sm:$0xff]  ;;  %v24_v14 = vld [vmem:[%s10326_s1 + $0x48] sm:$0xff]  ;;  %v23_v15 = vld [vmem:[%s10326_s1 + $0x40] sm:$0xff]  ;;  %6198 = vmatprep.mubr.msk.f32.mxu1 %vm7865_vm0, %v10363_v4  ;;  %6163 = vmatprep.mubr.msk.f32.mxu0 %vm7865_vm0, %v10363_v4 }
   0x4   :  { %10543 = vst [vmem:[#allocation5_spill] sm:$0xff] %v7914_v5  ;;  %10544 = vst [vmem:[#allocation6_spill] sm:$0xff] %v7916_v6  ;;  %v7945_v16 = vsub.f32 %v30_v1, %v7914_v5  ;;  %v7948_v17 = vsub.f32 %v29_v2, %v7916_v6  ;;  %6132 = vmatpush3.msra.mxu0 %v7914_v5  ;;  %v7951_v18 = vand.u32 4294901760, %v25_v13  ;;  %v7953_v19 = vand.u32 4294901760, %v24_v14 }
   0x5   :  { %10545 = vst [vmem:[#allocation7_spill] sm:$0xff] %v7928_v10  ;;  %10546 = vst [vmem:[#allocation8_spill] sm:$0xff] %v7930_v11  ;;  %v7958_v20 = vsub.f32 %v28_v7, %v7928_v10  ;;  %v7961_v21 = vsub.f32 %v27_v8, %v7930_v11  ;;  %v7964_v22 = vsub.f32 %v26_v9, %v7933_v12  ;;  %6133 = vmatprep.subr.mxu0 %v10363_v4 }
   0x6   :  { %10547 = vst [vmem:[#allocation9_spill] sm:$0xff] %v7933_v12  ;;  %10548 = vst [vmem:[#allocation10_spill] sm:$0xff] %v7945_v16  ;;  %v7967_v23 = vand.u32 4294901760, %v23_v15  ;;  %v7972_v24 = vand.u32 4294901760, %v7945_v16  ;;  %v7975_v25 = vand.u32 4294901760, %v7948_v17  ;;  %v7978_v26 = vsub.f32 %v25_v13, %v7951_v18  ;;  %6134 = vmatpush3.msra.mxu0 %v7916_v6 }
   0x7   :  { %10549 = vst [vmem:[#allocation11_spill] sm:$0xff] %v7948_v17  ;;  %10550 = vst [vmem:[#allocation12_spill] sm:$0xff] %v7951_v18 }
   0x8   :  { %10551 = vst [vmem:[#allocation13_spill] sm:$0xff] %v7953_v19  ;;  %10552 = vst [vmem:[#allocation14_spill] sm:$0xff] %v7958_v20 }
   0x9   :  { %10553 = vst [vmem:[#allocation15_spill] sm:$0xff] %v7961_v21  ;;  %10554 = vst [vmem:[#allocation16_spill] sm:$0xff] %v7964_v22 }
   0xa   :  { %10555 = vst [vmem:[#allocation17_spill] sm:$0xff] %v7967_v23  ;;  %10556 = vst [vmem:[#allocation18_spill] sm:$0xff] %v7972_v24 }
   0xb   :  { %10557 = vst [vmem:[#allocation19_spill] sm:$0xff] %v7975_v25  ;;  %10558 = vst [vmem:[#allocation20_spill] sm:$0xff] %v7978_v26 }
   0xc   :  { %8 = vsyncpa [#allocation3], 0  ;;  %v7866_v27 = vmov 1   ;;  %v7982_v28 = vand.u32 4294901760, %v7958_v20  ;;  %v7985_v29 = vand.u32 4294901760, %v7961_v21  ;;  %6135 = vmatprep.subr.mxu0 %v10363_v4  ;;  %v7989_v30 = vsub.f32 %v24_v14, %v7953_v19  ;;  %v22_v37 = vld [vmem:[%s10326_s1 + $0x38] sm:$0xff] }
   0xd   :  { %7831 = vset.pattern.permute.xlu0 %v7866_v27  ;;  %v151_v31 = vsub.f32 %v7945_v16, %v7972_v24  ;;  %v158_v32 = vsub.f32 %v7948_v17, %v7975_v25  ;;  %v7997_v33 = vand.u32 4294901760, %v7964_v22  ;;  %6136 = vmatpush3.msra.mxu0 %v7928_v10  ;;  %v8003_v35 = vand.u32 4294901760, %v7978_v26  ;;  %v21_v38 = vld [vmem:[%s10326_s1 + $0x30] sm:$0xff]  ;;  %v20_v42 = vld [vmem:[%s10326_s1 + $0x28] sm:$0xff]  ;;  %v19_v44 = vld [vmem:[%s10326_s1 + $0x20] sm:$0xff]  ;;  %s7872_s23 = smov 16  }
   0xe   :  { %10559 = vst [vmem:[#allocation21_spill] sm:$0xff] %v7982_v28  ;;  %10560 = vst [vmem:[#allocation22_spill] sm:$0xff] %v7985_v29  ;;  %698 = vperm.xlu0 %7831, %v7905_v0   ;;  %v165_v34 = vsub.f32 %v7958_v20, %v7982_v28  ;;  %6137 = vmatprep.subr.mxu0 %v10363_v4  ;;  %v8007_v36 = vsub.f32 %v23_v15, %v7967_v23  ;;  %v8026_v43 = vand.u32 4294901760, %v7989_v30  ;;  %v18_v52 = vld [vmem:[%s10326_s1 + $0x18] sm:$0xff]  ;;  %v17_v58 = vld [vmem:[%s10326_s1 + $0x10] sm:$0xff]  ;;  %s7876_s26 = smov 48  }
   0xf   :  { %10561 = vst [vmem:[#allocation23_spill] sm:$0xff] %v7989_v30  ;;  %10562 = vst [vmem:[#allocation24_spill] sm:$0xff] %v7997_v33  ;;  %v8015_v39 = vand.u32 4294901760, %v151_v31  ;;  %v8017_v40 = vand.u32 4294901760, %v158_v32  ;;  %v172_v41 = vsub.f32 %v7961_v21, %v7985_v29  ;;  %6138 = vmatpush3.msra.mxu0 %v7930_v11  ;;  %v179_v46 = vsub.f32 %v7964_v22, %v7997_v33  ;;  %v16_v1 = vld [vmem:[%s10326_s1 + $0x8] sm:$0xff]  ;;  %v15_v13 = vld [vmem:[%s10326_s1] sm:$0xff] }
  0x10   :  { %10563 = vst [vmem:[#allocation25_spill] sm:$0xff] %v8003_v35  ;;  %10564 = vst [vmem:[#allocation26_spill] sm:$0xff] %v8007_v36  ;;  %6139 = vmatprep.subr.mxu0 %v10363_v4  ;;  %v8033_v45 = vand.u32 4294901760, %v165_v34  ;;  %v8037_v47 = vand.u32 4294901760, %v22_v37  ;;  %v8040_v48 = vand.u32 4294901760, %v21_v38  ;;  %v186_v49 = vsub.f32 %v7978_v26, %v8003_v35  ;;  %s7877_s27 = smov 64  }
  0x11   :  { %10565 = vst [vmem:[#allocation27_spill] sm:$0xff] %v8015_v39  ;;  %10566 = vst [vmem:[#allocation28_spill] sm:$0xff] %v8017_v40  ;;  %6167 = vmatpush3.msra.mxu1 %v8015_v39  ;;  %6140 = vmatpush3.msra.mxu0 %v7933_v12  ;;  %v8046_v50 = vand.u32 4294901760, %v8007_v36  ;;  %v8049_v51 = vand.u32 4294901760, %v20_v42  ;;  %v8055_v53 = vand.u32 4294901760, %v172_v41  ;;  %v8064_v56 = vand.u32 4294901760, %v19_v44 }
  0x12   :  { %10567 = vst [vmem:[#allocation29_spill] sm:$0xff] %v8026_v43  ;;  %10568 = vst [vmem:[#allocation30_spill] sm:$0xff] %v8033_v45  ;;  %6168 = vmatprep.subr.mxu1 %v10363_v4  ;;  %6141 = vmatprep.subr.mxu0 %v10363_v4  ;;  %v8058_v54 = vsub.f32 %v22_v37, %v8037_v47  ;;  %v8061_v55 = vsub.f32 %v21_v38, %v8040_v48  ;;  %v8074_v59 = vand.u32 4294901760, %v179_v46  ;;  %s7878_s28 = smov 80   ;;  %s7879_s29 = smov 96   ;;  %vm5254_vm9 = vcmask 130048  }
  0x13   :  { %10569 = vst [vmem:[#allocation31_spill] sm:$0xff] %v8037_v47  ;;  %10570 = vst [vmem:[#allocation32_spill] sm:$0xff] %v8040_v48  ;;  %6169 = vmatpush3.msra.mxu1 %v8017_v40  ;;  %6142 = vmatpush3.msra.mxu0 %v7951_v18  ;;  %v193_v57 = vsub.f32 %v7989_v30, %v8026_v43  ;;  %v8080_v61 = vsub.f32 %v20_v42, %v8049_v51  ;;  %v8083_v62 = vand.u32 4294901760, %v18_v52  ;;  %s7880_s30 = smov 112   ;;  %vm5256_vm10 = vcmask 261120   ;;  %s7881_s4 = smov [#allocation2]  }
  0x14   :  { %10571 = vst [vmem:[#allocation33_spill] sm:$0xff] %v8046_v50  ;;  %10572 = vst [vmem:[#allocation34_spill] sm:$0xff] %v8049_v51  ;;  %6170 = vmatprep.subr.mxu1 %v10363_v4  ;;  %6143 = vmatprep.subr.mxu0 %v10363_v4  ;;  %v8077_v60 = vand.u32 4294901760, %v8058_v54  ;;  %v200_v63 = vsub.f32 %v8007_v36, %v8046_v50  ;;  %v8093_v2 = vand.u32 4294901760, %v186_v49  ;;  %v8096_v3 = vand.u32 4294901760, %v8061_v55  ;;  %s5275_s5 = sshll.u32 %s7881_s4, 4  ;;  %s5276_s5 = int_to_ptr.vmem [resolvable:$true] %s5275_s5 }
  0x15   :  { %10573 = vst [vmem:[#allocation35_spill] sm:$0xff] %v8055_v53  ;;  %10574 = vst [vmem:[#allocation36_spill] sm:$0xff] %v8058_v54  ;;  %6171 = vmatpush3.msra.mxu1 %v8033_v45  ;;  %6144 = vmatpush3.msra.mxu0 %v7953_v19  ;;  %v8099_v7 = vsub.f32 %v19_v44, %v8064_v56  ;;  %v8102_v8 = vand.u32 4294901760, %v17_v58  ;;  %v8105_v9 = vand.u32 4294901760, %v193_v57  ;;  %v8115_v15 = vand.u32 4294901760, %v8080_v61  ;;  %s7841_s6 = scalar_lea.vmem %s5276_s5, 128  ;;  %p7846_p1 = scmp.lt.s32.totalorder %s5276_s5, %s5276_s5 }
  0x16   :  { %10575 = vst [vmem:[#allocation37_spill] sm:$0xff] %v8061_v55  ;;  %10576 = vst [vmem:[#allocation38_spill] sm:$0xff] %v8064_v56  ;;  %6172 = vmatprep.subr.mxu1 %v10363_v4  ;;  %6145 = vmatprep.subr.mxu0 %v10363_v4  ;;  %v207_v14 = vsub.f32 %v8058_v54, %v8077_v60  ;;  %v8118_v27 = vsub.f32 %v18_v52, %v8083_v62  ;;  %v8121_v31 = vand.u32 4294901760, %v16_v1  ;;  %vm5258_vm11 = vcmask 392192   ;;  %p7842_p0 = scmp.ne.s32.totalorder %s5276_s5, %s7841_s6  ;;  %p7847_p2 = scmp.lt.s32.totalorder %s7841_s6, %s7841_s6 }
  0x17   :  { %10577 = vst [vmem:[#allocation39_spill] sm:$0xff] %v8074_v59  ;;  %10578 = vst [vmem:[#allocation40_spill] sm:$0xff] %v8077_v60  ;;  %6173 = vmatpush3.msra.mxu1 %v8055_v53  ;;  %6146 = vmatpush3.msra.mxu0 %v7967_v23  ;;  %v8124_v32 = vand.u32 4294901760, %v200_v63  ;;  %v214_v34 = vsub.f32 %v8061_v55, %v8096_v3  ;;  %v8131_v37 = vand.u32 4294901760, %v8099_v7  ;;  %v8137_v41 = vand.u32 4294901760, %v15_v13 }
  0x18   :  { %10579 = vst [vmem:[#allocation41_spill] sm:$0xff] %v8080_v61  ;;  %10580 = vst [vmem:[#allocation42_spill] sm:$0xff] %v8083_v62  ;;  %6174 = vmatprep.subr.mxu1 %v10363_v4  ;;  %6147 = vmatprep.subr.mxu0 %v10363_v4  ;;  %v8134_v38 = vsub.f32 %v17_v58, %v8102_v8  ;;  %v8142_v42 = vand.u32 4294901760, %v207_v14  ;;  %v221_v44 = vsub.f32 %v8080_v61, %v8115_v15  ;;  %vm5260_vm12 = vcmask 523264   ;;  %p7848_p3 = por %p7847_p2, %p7846_p1 }
  0x19   :  { %10581 = vst [vmem:[#allocation43_spill] sm:$0xff] %v8093_v2  ;;  %10582 = vst [vmem:[#allocation44_spill] sm:$0xff] %v8096_v3  ;;  %6175 = vmatpush3.msra.mxu1 %v8074_v59  ;;  %6148 = vmatpush3.msra.mxu0 %v8037_v47  ;;  %v8147_v46 = vand.u32 4294901760, %v8118_v27  ;;  %v8150_v49 = vsub.f32 %v16_v1, %v8121_v31  ;;  %v8156_v52 = vand.u32 4294901760, %v214_v34  ;;  %vm5262_vm13 = vcmask 654336  }
  0x1a   :  { %10583 = vst [vmem:[#allocation45_spill] sm:$0xff] %v8099_v7  ;;  %10584 = vst [vmem:[#allocation46_spill] sm:$0xff] %v8102_v8  ;;  %6176 = vmatprep.subr.mxu1 %v10363_v4  ;;  %6149 = vmatprep.subr.mxu0 %v10363_v4  ;;  %v228_v57 = vsub.f32 %v8099_v7, %v8131_v37  ;;  %v8161_v58 = vand.u32 4294901760, %v8134_v38  ;;  %v8164_v63 = vsub.f32 %v15_v13, %v8137_v41  ;;  %vm5264_vm14 = vcmask 785408   ;;  %p7849_p4 = pnand %p7848_p3, %p7842_p0 }
  0x1b   :  { %10585 = vst [vmem:[#allocation47_spill] sm:$0xff] %v8105_v9  ;;  %10586 = vst [vmem:[#allocation48_spill] sm:$0xff] %v8115_v15  ;;  %6177 = vmatpush3.msra.mxu1 %v8093_v2  ;;  %6150 = vmatpush3.msra.mxu0 %v8040_v48  ;;  %v8170_v1 = vand.u32 4294901760, %v221_v44  ;;  %v235_v14 = vsub.f32 %v8118_v27, %v8147_v46  ;;  %v8175_v34 = vand.u32 4294901760, %v8150_v49  ;;  %vm5266_vm15 = vcmask 916480  }
  0x1c   :  { %10587 = vst [vmem:[#allocation49_spill] sm:$0xff] %v8118_v27  ;;  %10588 = vst [vmem:[#allocation50_spill] sm:$0xff] %v8121_v31  ;;  %6178 = vmatprep.subr.mxu1 %v10363_v4  ;;  %6151 = vmatprep.subr.mxu0 %v10363_v4  ;;  %v8181_v13 = vand.u32 4294901760, %v228_v57  ;;  %v242_v44 = vsub.f32 %v8134_v38, %v8161_v58 }
  0x1d   :  { %10589 = vst [vmem:[#allocation51_spill] sm:$0xff] %v8124_v32  ;;  %10590 = vst [vmem:[#allocation52_spill] sm:$0xff] %v8131_v37  ;;  %6179 = vmatpush3.msra.mxu1 %v8105_v9  ;;  %6152 = vmatpush3.msra.mxu0 %v8049_v51  ;;  %v249_v57 = vsub.f32 %v8150_v49, %v8175_v34 }
  0x1e   :  { %10591 = vst [vmem:[#allocation53_spill] sm:$0xff] %v8134_v38  ;;  %10592 = vst [vmem:[#allocation54_spill] sm:$0xff] %v8137_v41  ;;  %6180 = vmatprep.subr.mxu1 %v10363_v4  ;;  %6153 = vmatprep.subr.mxu0 %v10363_v4 }
  0x1f   :  { %10593 = vst [vmem:[#allocation55_spill] sm:$0xff] %v8142_v42  ;;  %10594 = vst [vmem:[#allocation56_spill] sm:$0xff] %v8147_v46  ;;  %6181 = vmatpush3.msra.mxu1 %v8124_v32  ;;  %6154 = vmatpush3.msra.mxu0 %v8064_v56  ;;  %v8192_v32 = vand.u32 4294901760, %v235_v14  ;;  %v8208_v14 = vand.u32 4294901760, %v249_v57  ;;  %v47_v57 = vlaneseq }
  0x20   :  { %10595 = vst [vmem:[#allocation57_spill] sm:$0xff] %v8150_v49  ;;  %10596 = vst [vmem:[#allocation58_spill] sm:$0xff] %v8156_v52  ;;  %6182 = vmatprep.subr.mxu1 %v10363_v4  ;;  %6155 = vmatprep.subr.mxu0 %v10363_v4 }
  0x21   :  { %10597 = vst [vmem:[#allocation59_spill] sm:$0xff] %v8161_v58  ;;  %10598 = vst [vmem:[#allocation60_spill] sm:$0xff] %v8164_v63  ;;  %6183 = vmatpush3.msra.mxu1 %v8142_v42  ;;  %6156 = vmatpush3.msra.mxu0 %v8083_v62  ;;  %v8186_v42 = vand.u32 4294901760, %v8164_v63 }
  0x22   :  { %10599 = vst [vmem:[#allocation61_spill] sm:$0xff] %v8170_v1  ;;  %10600 = vst [vmem:[#allocation62_spill] sm:$0xff] %v8175_v34  ;;  %6184 = vmatprep.subr.mxu1 %v10363_v4  ;;  %6157 = vmatprep.subr.mxu0 %v10363_v4 }
  0x23   :  { %6185 = vmatpush3.msra.mxu1 %v8156_v52  ;;  %10601 = vst [vmem:[#allocation63_spill] sm:$0xff] %v8181_v13  ;;  %10602 = vst [vmem:[#allocation64_spill] sm:$0xff] %v8186_v42  ;;  %6158 = vmatpush3.msra.mxu0 %v8102_v8  ;;  %v8200_v52 = vand.u32 4294901760, %v242_v44  ;;  %v256_v9 = vsub.f32 %v8164_v63, %v8186_v42  ;;  %v7867_v44 = vmov 2  }
  0x24   :  { %6186 = vmatprep.subr.mxu1 %v10363_v4  ;;  %6159 = vmatprep.subr.mxu0 %v10363_v4  ;;  %10603 = vst [vmem:[#allocation65_spill] sm:$0xff] %v8192_v32  ;;  %10605 = vst [vmem:[#allocation67_spill] sm:$0xff] %v8208_v14 }
  0x25   :  { %6187 = vmatpush3.msra.mxu1 %v8170_v1  ;;  %6160 = vmatpush3.msra.mxu0 %v8121_v31  ;;  %10604 = vst [vmem:[#allocation66_spill] sm:$0xff] %v8200_v52 }
  0x26   :  { %6188 = vmatprep.subr.mxu1 %v10363_v4  ;;  %6161 = vmatprep.subr.mxu0 %v10363_v4 }
  0x27   :  { %6189 = vmatpush3.msra.mxu1 %v8181_v13  ;;  %6162 = vmatpush3.msra.mxu0 %v8137_v41  ;;  %v8212_v13 = vand.u32 4294901760, %v256_v9 }
  0x28   :  { %6190 = vmatprep.subr.mxu1 %v10363_v4  ;;  %6201 = vmatprep.subr.mxu0 %v10363_v4 }
  0x29   :  { %6191 = vmatpush3.msra.mxu1 %v8192_v32  ;;  %10606 = vst [vmem:[#allocation68_spill] sm:$0xff] %v8212_v13  ;;  %7832 = vset.pattern.permute.xlu1 %v7867_v44  ;;  %v8220_v32 = vand.u32 127, %v47_v57 }
  0x2a   :  { %6192 = vmatprep.subr.mxu1 %v10363_v4  ;;  %1345 = vperm.xlu1 %7832, %v7905_v0  }
  0x2b   :  { %6193 = vmatpush3.msra.mxu1 %v8200_v52 }
  0x2c   :  { %6194 = vmatprep.subr.mxu1 %v10363_v4 }
  0x2d   :  { %6195 = vmatpush3.msra.mxu1 %v8208_v14 }
  0x2e   :  { %6196 = vmatprep.subr.mxu1 %v10363_v4 }
  0x2f   :  { %6197 = vmatpush3.msra.mxu1 %v8212_v13  ;;  %v10345_v13 = vmov 1.0  }
  0x30   :  { %6236 = vmatprep.subr.mxu1 %v10363_v4 }
  0x7d   :  { %v8222_v52 = vpop.permute.xlu0 %51 }
  0x7e   :  { %vm53_vm1 = vcmp.eq.s32.totalorder %v8220_v32, %v8222_v52 }
  0x7f   :  { %v5283_v9 = vsel %vm53_vm1, 1.0, %v10363_v4  ;;  %6199 = vmatmul.mubr.msk.f32.vlgmr.msra.gmra.mxu1 %vm53_vm1, %v10345_v13 }
  0x80   :  { %v8234_v0 = vsub.f32 %v5283_v9, %v5283_v9  ;;  %6237 = vmatpush3.msra.mxu1 %v7914_v5  ;;  %6268 = vmatprep.mubr.msk.f32.mxu1 %vm7865_vm0, %v10363_v4 }
  0x81   :  { %6238 = vmatprep.subr.mxu1 %v10363_v4 }
  0x82   :  { %6239 = vmatpush3.msra.mxu1 %v7916_v6  ;;  %v139_v44 = vand.u32 4294901760, %v8234_v0 }
  0x83   :  { %6240 = vmatprep.subr.mxu1 %v10363_v4 }
  0x84   :  { %6241 = vmatpush3.msra.mxu1 %v7928_v10  ;;  %v140_v57 = vsub.f32 %v8234_v0, %v139_v44 }
  0x85   :  { %6242 = vmatprep.subr.mxu1 %v10363_v4 }
  0x86   :  { %6243 = vmatpush3.msra.mxu1 %v7930_v11  ;;  %v141_v9 = vand.u32 4294901760, %v140_v57 }
  0x87   :  { %6244 = vmatprep.subr.mxu1 %v10363_v4 }
  0x88   :  { %6245 = vmatpush3.msra.mxu1 %v7933_v12  ;;  %6164 = vmatmul.mubr.f32.vlgmr.msra.gmra.mxu0 %v141_v9  ;;  %v44_v9 = vld [vmem:[%s10327_s2 + $0x68] sm:$0xff] }
  0x89   :  { %6202 = vmatpush3.msra.mxu0 %v7945_v16  ;;  %6246 = vmatprep.subr.mxu1 %v10363_v4  ;;  %v36_v16 = vld [vmem:[%s10327_s2 + $0x28] sm:$0xff] }
  0x8a   :  { %6203 = vmatprep.subr.mxu0 %v10363_v4  ;;  %6247 = vmatpush3.msra.mxu1 %v7951_v18 }
  0x8b   :  { %6204 = vmatpush3.msra.mxu0 %v7948_v17  ;;  %6248 = vmatprep.subr.mxu1 %v10363_v4 }
  0x8c   :  { %6205 = vmatprep.subr.mxu0 %v10363_v4  ;;  %6249 = vmatpush3.msra.mxu1 %v7953_v19 }
  0x8d   :  { %6206 = vmatpush3.msra.mxu0 %v7958_v20  ;;  %6250 = vmatprep.subr.mxu1 %v10363_v4 }
  0x8e   :  { %6207 = vmatprep.subr.mxu0 %v10363_v4  ;;  %6251 = vmatpush3.msra.mxu1 %v7967_v23 }
  0x8f   :  { %6208 = vmatpush3.msra.mxu0 %v7961_v21  ;;  %6252 = vmatprep.subr.mxu1 %v10363_v4  ;;  %v37_v21 = vld [vmem:[%s10327_s2 + $0x30] sm:$0xff] }
  0x90   :  { %6209 = vmatprep.subr.mxu0 %v10363_v4  ;;  %6253 = vmatpush3.msra.mxu1 %v8037_v47 }
  0x91   :  { %6210 = vmatpush3.msra.mxu0 %v7964_v22  ;;  %6254 = vmatprep.subr.mxu1 %v10363_v4 }
  0x92   :  { %6211 = vmatprep.subr.mxu0 %v10363_v4  ;;  %6255 = vmatpush3.msra.mxu1 %v8040_v48 }
  0x93   :  { %6212 = vmatpush3.msra.mxu0 %v7978_v26  ;;  %6256 = vmatprep.subr.mxu1 %v10363_v4 }
  0x94   :  { %6213 = vmatprep.subr.mxu0 %v10363_v4  ;;  %6257 = vmatpush3.msra.mxu1 %v8049_v51 }
  0x95   :  { %6214 = vmatpush3.msra.mxu0 %v7989_v30  ;;  %6258 = vmatprep.subr.mxu1 %v10363_v4  ;;  %v38_v30 = vld [vmem:[%s10327_s2 + $0x38] sm:$0xff] }
  0x96   :  { %6215 = vmatprep.subr.mxu0 %v10363_v4  ;;  %6259 = vmatpush3.msra.mxu1 %v8064_v56 }
  0x97   :  { %6216 = vmatpush3.msra.mxu0 %v8007_v36  ;;  %6260 = vmatprep.subr.mxu1 %v10363_v4 }
  0x98   :  { %6217 = vmatprep.subr.mxu0 %v10363_v4  ;;  %6261 = vmatpush3.msra.mxu1 %v8083_v62 }
  0x99   :  { %6218 = vmatpush3.msra.mxu0 %v8058_v54  ;;  %6262 = vmatprep.subr.mxu1 %v10363_v4 }
  0x9a   :  { %6219 = vmatprep.subr.mxu0 %v10363_v4  ;;  %6263 = vmatpush3.msra.mxu1 %v8102_v8 }
  0x9b   :  { %6220 = vmatpush3.msra.mxu0 %v8061_v55  ;;  %6264 = vmatprep.subr.mxu1 %v10363_v4 }
  0x9c   :  { %6221 = vmatprep.subr.mxu0 %v10363_v4  ;;  %6265 = vmatpush3.msra.mxu1 %v8121_v31 }
  0x9d   :  { %6222 = vmatpush3.msra.mxu0 %v8080_v61  ;;  %6266 = vmatprep.subr.mxu1 %v10363_v4 }
  0x9e   :  { %6223 = vmatprep.subr.mxu0 %v10363_v4  ;;  %6267 = vmatpush3.msra.mxu1 %v8137_v41 }
  0x9f   :  { %6224 = vmatpush3.msra.mxu0 %v8099_v7  ;;  %6269 = vmatmul.mubr.f32.vlgmr.msra.gmra.mxu1 %v139_v44  ;;  %v46_v44 = vld [vmem:[%s10327_s2 + $0x78] sm:$0xff] }
  0xa0   :  { %6306 = vmatprep.subr.mxu1 %v10363_v4  ;;  %6225 = vmatprep.subr.mxu0 %v10363_v4  ;;  %v8333_v57 = vand.u32 4294901760, %v46_v44 }
  0xa1   :  { %6307 = vmatpush3.msra.mxu1 %v7914_v5  ;;  %6226 = vmatpush3.msra.mxu0 %v8118_v27  ;;  %v39_v27 = vld [vmem:[%s10327_s2 + $0x40] sm:$0xff] }
  0xa2   :  { %6308 = vmatprep.subr.mxu1 %v10363_v4  ;;  %6227 = vmatprep.subr.mxu0 %v10363_v4  ;;  %v8424_v36 = vand.u32 4294901760, %v39_v27 }
  0xa3   :  { %6309 = vmatpush3.msra.mxu1 %v7916_v6  ;;  %6228 = vmatpush3.msra.mxu0 %v8134_v38 }
  0xa4   :  { %6310 = vmatprep.subr.mxu1 %v10363_v4  ;;  %6229 = vmatprep.subr.mxu0 %v10363_v4  ;;  %v8464_v17 = vsub.f32 %v39_v27, %v8424_v36 }
  0xa5   :  { %6311 = vmatpush3.msra.mxu1 %v7928_v10  ;;  %6230 = vmatpush3.msra.mxu0 %v8150_v49 }
  0xa6   :  { %6312 = vmatprep.subr.mxu1 %v10363_v4  ;;  %6231 = vmatprep.subr.mxu0 %v10363_v4  ;;  %10617 = vst [vmem:[#allocation77_spill] sm:$0xff] %v8464_v17 }
  0xa7   :  { %6313 = vmatpush3.msra.mxu1 %v7930_v11  ;;  %6232 = vmatpush3.msra.mxu0 %v8164_v63  ;;  %v41_v63 = vld [vmem:[%s10327_s2 + $0x50] sm:$0xff] }
  0xa8   :  { %6233 = vmatprep.mubr.msk.f32.mxu0 %vm7865_vm0, %v10363_v4  ;;  %6314 = vmatprep.subr.mxu1 %v10363_v4 }
  0xa9   :  { %6234 = vmatmul.mubr.f32.vlgmr.msra.gmra.mxu0 %v8234_v0  ;;  %6271 = vmatprep.subr.mxu0 %v10363_v4  ;;  %v45_v0 = vld [vmem:[%s10327_s2 + $0x70] sm:$0xff] }
  0xaa   :  { %6315 = vmatpush3.msra.mxu1 %v7933_v12  ;;  %6272 = vmatpush3.msra.mxu0 %v7972_v24  ;;  %v8342_v13 = vand.u32 4294901760, %v45_v0 }
  0xab   :  { %6316 = vmatprep.subr.mxu1 %v10363_v4  ;;  %6273 = vmatprep.subr.mxu0 %v10363_v4 }
  0xac   :  { %6317 = vmatpush3.msra.mxu1 %v7951_v18  ;;  %6274 = vmatpush3.msra.mxu0 %v7975_v25  ;;  %v8354_v25 = vand.u32 4294901760, %v44_v9 }
  0xad   :  { %6318 = vmatprep.subr.mxu1 %v10363_v4  ;;  %6275 = vmatprep.subr.mxu0 %v10363_v4 }
  0xae   :  { %6319 = vmatpush3.msra.mxu1 %v7953_v19  ;;  %6276 = vmatpush3.msra.mxu0 %v7982_v28  ;;  %v43_v28 = vld [vmem:[%s10327_s2 + $0x60] sm:$0xff] }
  0xaf   :  { %6320 = vmatprep.subr.mxu1 %v10363_v4  ;;  %6277 = vmatprep.subr.mxu0 %v10363_v4  ;;  %v8363_v24 = vand.u32 4294901760, %v43_v28 }
  0xb0   :  { %6321 = vmatpush3.msra.mxu1 %v7967_v23  ;;  %6278 = vmatpush3.msra.mxu0 %v7985_v29  ;;  %v8352_v29 = vsub.f32 %v46_v44, %v8333_v57  ;;  %v42_v44 = vld [vmem:[%s10327_s2 + $0x58] sm:$0xff] }
  0xb1   :  { %6322 = vmatprep.subr.mxu1 %v10363_v4  ;;  %6279 = vmatprep.subr.mxu0 %v10363_v4  ;;  %v8383_v49 = vand.u32 4294901760, %v42_v44  ;;  %v8394_v38 = vsub.f32 %v43_v28, %v8363_v24 }
  0xb2   :  { %6323 = vmatpush3.msra.mxu1 %v8037_v47  ;;  %6280 = vmatpush3.msra.mxu0 %v7997_v33  ;;  %v8361_v33 = vsub.f32 %v45_v0, %v8342_v13  ;;  %v8376_v0 = vsub.f32 %v44_v9, %v8354_v25 }
  0xb3   :  { %6324 = vmatprep.subr.mxu1 %v10363_v4  ;;  %6281 = vmatprep.subr.mxu0 %v10363_v4  ;;  %v8422_v54 = vand.u32 4294901760, %v8394_v38 }
  0xb4   :  { %6325 = vmatpush3.msra.mxu1 %v8040_v48  ;;  %6282 = vmatpush3.msra.mxu0 %v8003_v35  ;;  %v8373_v35 = vand.u32 4294901760, %v8352_v29  ;;  %v8391_v9 = vand.u32 4294901760, %v8361_v33  ;;  %v8408_v28 = vand.u32 4294901760, %v8376_v0 }
  0xb5   :  { %6326 = vmatprep.subr.mxu1 %v10363_v4  ;;  %6283 = vmatprep.subr.mxu0 %v10363_v4  ;;  %10611 = vst [vmem:[#allocation72_spill] sm:$0xff] %v8422_v54  ;;  %v819_v20 = vsub.f32 %v8394_v38, %v8422_v54 }
  0xb6   :  { %6327 = vmatpush3.msra.mxu1 %v8049_v51  ;;  %6284 = vmatpush3.msra.mxu0 %v8026_v43  ;;  %10607 = vst [vmem:[#allocation69_spill] sm:$0xff] %v8373_v35  ;;  %v10608_v43 = vmov 0.0   ;;  %10609 = vst [vmem:[#allocation70_spill] sm:$0xff] %v8391_v9  ;;  %v798_v7 = vsub.f32 %v8352_v29, %v8373_v35  ;;  %v805_v55 = vsub.f32 %v8361_v33, %v8391_v9  ;;  %v33_v51 = vld [vmem:[%s10327_s2 + $0x10] sm:$0xff] }
  0xb7   :  { %6328 = vmatprep.subr.mxu1 %v10363_v4  ;;  %6285 = vmatprep.subr.mxu0 %v10363_v4  ;;  %v40_v4 = vld [vmem:[%s10327_s2 + $0x48] sm:$0xff]  ;;  %10610 = vst [vmem:[#allocation71_spill] sm:$0xff] %v8408_v28  ;;  %v812_v26 = vsub.f32 %v8376_v0, %v8408_v28 }
  0xb8   :  { %6329 = vmatpush3.msra.mxu1 %v8064_v56  ;;  %6286 = vmatpush3.msra.mxu0 %v8046_v50  ;;  %v8398_v50 = vand.u32 4294901760, %v41_v63  ;;  %v8410_v61 = vand.u32 4294901760, %v40_v4  ;;  %v34_v56 = vld [vmem:[%s10327_s2 + $0x18] sm:$0xff] }
  0xb9   :  { %6330 = vmatprep.subr.mxu1 %v10608_v43  ;;  %6287 = vmatprep.subr.mxu0 %v10608_v43 }
  0xba   :  { %6331 = vmatpush3.msra.mxu1 %v8083_v62  ;;  %6288 = vmatpush3.msra.mxu0 %v8077_v60  ;;  %v8415_v60 = vsub.f32 %v42_v44, %v8383_v49  ;;  %v8432_v44 = vsub.f32 %v41_v63, %v8398_v50  ;;  %v8441_v22 = vsub.f32 %v40_v4, %v8410_v61  ;;  %v8459_v4 = vand.u32 4294901760, %v805_v55 }
  0xbb   :  { %6332 = vmatprep.subr.mxu1 %v10608_v43  ;;  %6289 = vmatprep.subr.mxu0 %v10608_v43  ;;  %v8478_v55 = vand.u32 4294901760, %v812_v26  ;;  %v8497_v26 = vand.u32 4294901760, %v819_v20  ;;  %v8500_v62 = vand.u32 4294901760, %v8464_v17 }
  0xbc   :  { %6333 = vmatpush3.msra.mxu1 %v8102_v8  ;;  %6290 = vmatpush3.msra.mxu0 %v8096_v3  ;;  %v8436_v3 = vand.u32 4294901760, %v798_v7  ;;  %10613 = vst [vmem:[#allocation74_spill] sm:$0xff] %v8441_v22  ;;  %v8450_v63 = vand.u32 4294901760, %v8415_v60  ;;  %v8452_v7 = vand.u32 4294901760, %v38_v30  ;;  %10616 = vst [vmem:[#allocation76_spill] sm:$0xff] %v8459_v4  ;;  %v8481_v27 = vand.u32 4294901760, %v8441_v22 }
  0xbd   :  { %6334 = vmatprep.subr.mxu1 %v10608_v43  ;;  %6291 = vmatprep.subr.mxu0 %v10608_v43  ;;  %10619 = vst [vmem:[#allocation79_spill] sm:$0xff] %v8478_v55  ;;  %10622 = vst [vmem:[#allocation82_spill] sm:$0xff] %v8497_v26  ;;  %v847_v48 = vsub.f32 %v8464_v17, %v8500_v62 }
  0xbe   :  { %6335 = vmatpush3.msra.mxu1 %v8121_v31  ;;  %6292 = vmatpush3.msra.mxu0 %v8115_v15  ;;  %10612 = vst [vmem:[#allocation73_spill] sm:$0xff] %v8436_v3  ;;  %10614 = vst [vmem:[#allocation75_spill] sm:$0xff] %v8450_v63  ;;  %v10615_v15 = vmov 1.0   ;;  %v35_v31 = vld [vmem:[%s10327_s2 + $0x20] sm:$0xff]  ;;  %v826_v8 = vsub.f32 %v8415_v60, %v8450_v63  ;;  %v840_v20 = vsub.f32 %v8441_v22, %v8481_v27 }
  0xbf   :  { %6336 = vmatprep.subr.mxu1 %v10608_v43  ;;  %6293 = vmatprep.subr.mxu0 %v10608_v43  ;;  %10620 = vst [vmem:[#allocation80_spill] sm:$0xff] %v8481_v27  ;;  %10623 = vst [vmem:[#allocation83_spill] sm:$0xff] %v8500_v62 }
  0xc0   :  { %6337 = vmatpush3.msra.mxu1 %v8137_v41  ;;  %6338 = vmatprep.mubr.msk.f32.mxu1 %vm7865_vm0, %v10608_v43  ;;  %v8474_v41 = vand.u32 4294901760, %v37_v21  ;;  %v8523_v14 = vand.u32 4294901760, %v826_v8  ;;  %v32_v8 = vld [vmem:[%s10327_s2 + $0x8] sm:$0xff]  ;;  %v8558_v23 = vand.u32 4294901760, %v840_v20  ;;  %v8577_v20 = vand.u32 4294901760, %v847_v48 }
  0xc1   :  { %6294 = vmatpush3.msra.mxu0 %v8131_v37  ;;  %6339 = vmatmul.mubr.msk.f32.vlgmr.msra.gmra.mxu1 %vm53_vm1, %v10615_v15  ;;  %v8472_v37 = vand.u32 4294901760, %v8432_v44  ;;  %v8573_v1 = vand.u32 4294901760, %v32_v8 }
  0xc2   :  { %6376 = vmatprep.subr.mxu1 %v10608_v43  ;;  %6295 = vmatprep.subr.mxu0 %v10608_v43  ;;  %10625 = vst [vmem:[#allocation85_spill] sm:$0xff] %v8523_v14  ;;  %10631 = vst [vmem:[#allocation91_spill] sm:$0xff] %v8558_v23 }
  0xc3   :  { %10618 = vst [vmem:[#allocation78_spill] sm:$0xff] %v8472_v37  ;;  %6377 = vmatpush3.msra.mxu1 %v8436_v3  ;;  %6296 = vmatpush3.msra.mxu0 %v8147_v46  ;;  %v8491_v3 = vsub.f32 %v38_v30, %v8452_v7  ;;  %v8493_v46 = vand.u32 4294901760, %v36_v16  ;;  %v833_v30 = vsub.f32 %v8432_v44, %v8472_v37  ;;  %10634 = vst [vmem:[#allocation94_spill] sm:$0xff] %v8577_v20 }
  0xc4   :  { %6378 = vmatprep.subr.mxu1 %v10608_v43  ;;  %6297 = vmatprep.subr.mxu0 %v10608_v43 }
  0xc5   :  { %10621 = vst [vmem:[#allocation81_spill] sm:$0xff] %v8491_v3  ;;  %6379 = vmatpush3.msra.mxu1 %v8459_v4  ;;  %6298 = vmatpush3.msra.mxu0 %v8161_v58  ;;  %v8510_v4 = vsub.f32 %v37_v21, %v8474_v41  ;;  %v8512_v58 = vand.u32 4294901760, %v35_v31  ;;  %v8526_v21 = vand.u32 4294901760, %v8491_v3 }
  0xc6   :  { %6380 = vmatprep.subr.mxu1 %v10608_v43  ;;  %6299 = vmatprep.subr.mxu0 %v10608_v43 }
  0xc7   :  { %10624 = vst [vmem:[#allocation84_spill] sm:$0xff] %v8510_v4  ;;  %6381 = vmatpush3.msra.mxu1 %v8478_v55  ;;  %6300 = vmatpush3.msra.mxu0 %v8175_v34  ;;  %10626 = vst [vmem:[#allocation86_spill] sm:$0xff] %v8526_v21  ;;  %v8529_v55 = vsub.f32 %v36_v16, %v8493_v46  ;;  %v8531_v34 = vand.u32 4294901760, %v34_v56  ;;  %v8543_v16 = vand.u32 4294901760, %v833_v30  ;;  %v8546_v47 = vand.u32 4294901760, %v8510_v4  ;;  %v31_v30 = vld [vmem:[%s10327_s2] sm:$0xff] }
  0xc8   :  { %6382 = vmatprep.subr.mxu1 %v10608_v43  ;;  %6301 = vmatprep.subr.mxu0 %v10608_v43  ;;  %v8589_v12 = vand.u32 4294901760, %v31_v30 }
  0xc9   :  { %10627 = vst [vmem:[#allocation87_spill] sm:$0xff] %v8529_v55  ;;  %6383 = vmatpush3.msra.mxu1 %v8497_v26  ;;  %6302 = vmatpush3.msra.mxu0 %v8186_v42  ;;  %10628 = vst [vmem:[#allocation88_spill] sm:$0xff] %v8543_v16  ;;  %v8549_v26 = vsub.f32 %v35_v31, %v8512_v58  ;;  %v8551_v42 = vand.u32 4294901760, %v33_v51  ;;  %v854_v31 = vsub.f32 %v8491_v3, %v8526_v21 }
  0xca   :  { %6303 = vmatprep.mubr.msk.f32.mxu0 %vm7865_vm0, %v10608_v43  ;;  %6384 = vmatprep.subr.mxu1 %v10608_v43  ;;  %10629 = vst [vmem:[#allocation89_spill] sm:$0xff] %v8546_v47  ;;  %v8568_v19 = vand.u32 4294901760, %v8529_v55  ;;  %v8571_v52 = vsub.f32 %v34_v56, %v8531_v34  ;;  %v8617_v6 = vsub.f32 %v31_v30, %v8589_v12 }
  0xcb   :  { %10630 = vst [vmem:[#allocation90_spill] sm:$0xff] %v8549_v26  ;;  %6304 = vmatmul.mubr.msk.f32.vlgmr.msra.gmra.mxu0 %vm53_vm1, %v10615_v15  ;;  %6341 = vmatprep.subr.mxu0 %v10608_v43  ;;  %v8584_v18 = vand.u32 4294901760, %v8549_v26  ;;  %v8587_v56 = vsub.f32 %v33_v51, %v8551_v42  ;;  %v8595_v48 = vand.u32 4294901760, %v854_v31  ;;  %v8603_v51 = vsub.f32 %v32_v8, %v8573_v1 }
  0xcc   :  { %6385 = vmatpush3.msra.mxu1 %v8523_v14  ;;  %6342 = vmatpush3.msra.mxu0 %v8333_v57  ;;  %10632 = vst [vmem:[#allocation92_spill] sm:$0xff] %v8568_v19  ;;  %10633 = vst [vmem:[#allocation93_spill] sm:$0xff] %v8571_v52  ;;  %v861_v14 = vsub.f32 %v8510_v4, %v8546_v47  ;;  %v8600_v11 = vand.u32 4294901760, %v8571_v52 }
  0xcd   :  { %6386 = vmatprep.subr.mxu1 %v10608_v43  ;;  %6343 = vmatprep.subr.mxu0 %v10608_v43  ;;  %10635 = vst [vmem:[#allocation95_spill] sm:$0xff] %v8584_v18  ;;  %10636 = vst [vmem:[#allocation96_spill] sm:$0xff] %v8587_v56  ;;  %v875_v31 = vsub.f32 %v8549_v26, %v8584_v18  ;;  %v8614_v10 = vand.u32 4294901760, %v8587_v56  ;;  %v8630_v2 = vand.u32 4294901760, %v8603_v51 }
  0xce   :  { %6387 = vmatpush3.msra.mxu1 %v8543_v16  ;;  %6344 = vmatpush3.msra.mxu0 %v8342_v13  ;;  %10637 = vst [vmem:[#allocation97_spill] sm:$0xff] %v8595_v48  ;;  %v868_v16 = vsub.f32 %v8529_v55, %v8568_v19  ;;  %10638 = vst [vmem:[#allocation98_spill] sm:$0xff] %v8600_v11 }
  0xcf   :  { %6388 = vmatprep.subr.mxu1 %v10608_v43  ;;  %6345 = vmatprep.subr.mxu0 %v10608_v43  ;;  %10639 = vst [vmem:[#allocation99_spill] sm:$0xff] %v8603_v51  ;;  %10641 = vst [vmem:[#allocation101_spill] sm:$0xff] %v8614_v10  ;;  %v8636_v30 = vand.u32 4294901760, %v875_v31  ;;  %v896_v31 = vsub.f32 %v8603_v51, %v8630_v2 }
  0xd0   :  { %6389 = vmatpush3.msra.mxu1 %v8558_v23  ;;  %6346 = vmatpush3.msra.mxu0 %v8354_v25  ;;  %v8609_v23 = vand.u32 4294901760, %v861_v14  ;;  %10642 = vst [vmem:[#allocation102_spill] sm:$0xff] %v8617_v6  ;;  %v8623_v8 = vand.u32 4294901760, %v868_v16  ;;  %v882_v14 = vsub.f32 %v8571_v52, %v8600_v11  ;;  %10644 = vst [vmem:[#allocation104_spill] sm:$0xff] %v8630_v2 }
  0xd1   :  { %6390 = vmatprep.subr.mxu1 %v10608_v43  ;;  %6347 = vmatprep.subr.mxu0 %v10608_v43  ;;  %10645 = vst [vmem:[#allocation105_spill] sm:$0xff] %v8636_v30  ;;  %v889_v16 = vsub.f32 %v8587_v56, %v8614_v10 }
  0xd2   :  { %6391 = vmatpush3.msra.mxu1 %v8577_v20  ;;  %6348 = vmatpush3.msra.mxu0 %v8363_v24  ;;  %10640 = vst [vmem:[#allocation100_spill] sm:$0xff] %v8609_v23  ;;  %10643 = vst [vmem:[#allocation103_spill] sm:$0xff] %v8623_v8  ;;  %v8627_v20 = vpop.permute.xlu0 %698 }
  0xd3   :  { %6392 = vmatprep.subr.mxu1 %v10608_v43  ;;  %6349 = vmatprep.subr.mxu0 %v10608_v43  ;;  %vm700_vm2 = vcmp.eq.s32.totalorder %v8220_v32, %v8627_v20  ;;  %v8657_v5 = vand.u32 4294901760, %v889_v16  ;;  %v10652_v20 = vld [vmem:[#allocation47_spill] sm:$0xff] }
  0xd4   :  { %6393 = vmatpush3.msra.mxu1 %v8595_v48  ;;  %6350 = vmatpush3.msra.mxu0 %v8383_v49  ;;  %v8641_v48 = vand.u32 4294901760, %v8617_v6 }
  0xd5   :  { %6394 = vmatprep.subr.mxu1 %v10608_v43  ;;  %6351 = vmatprep.subr.mxu0 %v10608_v43 }
  0xd6   :  { %6395 = vmatpush3.msra.mxu1 %v8609_v23  ;;  %6352 = vmatpush3.msra.mxu0 %v8398_v50  ;;  %10646 = vst [vmem:[#allocation106_spill] sm:$0xff] %v8641_v48  ;;  %v8649_v23 = vand.u32 4294901760, %v882_v14  ;;  %v903_v14 = vsub.f32 %v8617_v6, %v8641_v48 }
  0xd7   :  { %6396 = vmatprep.subr.mxu1 %v10608_v43  ;;  %6353 = vmatprep.subr.mxu0 %v10608_v43 }
  0xd8   :  { %6397 = vmatpush3.msra.mxu1 %v8623_v8  ;;  %6354 = vmatpush3.msra.mxu0 %v8410_v61  ;;  %10647 = vst [vmem:[#allocation107_spill] sm:$0xff] %v8649_v23  ;;  %v5287_v8 = vsel %vm700_vm2, 1.0, %v10608_v43  ;;  %v8677_v59 = vand.u32 4294901760, %v903_v14 }
  0xd9   :  { %6398 = vmatprep.subr.mxu1 %v10608_v43  ;;  %6355 = vmatprep.subr.mxu0 %v10608_v43  ;;  %v8673_v16 = vsub.f32 %v5287_v8, %v5287_v8 }
  0xda   :  { %6399 = vmatpush3.msra.mxu1 %v8636_v30  ;;  %6356 = vmatpush3.msra.mxu0 %v8424_v36  ;;  %v8669_v30 = vand.u32 4294901760, %v896_v31 }
  0xdb   :  { %6400 = vmatprep.subr.mxu1 %v10608_v43  ;;  %6357 = vmatprep.subr.mxu0 %v10608_v43  ;;  %v786_v31 = vand.u32 4294901760, %v8673_v16 }
  0xdc   :  { %6401 = vmatpush3.msra.mxu1 %v8649_v23  ;;  %6358 = vmatpush3.msra.mxu0 %v8452_v7 }
  0xdd   :  { %6402 = vmatprep.subr.mxu1 %v10608_v43  ;;  %6359 = vmatprep.subr.mxu0 %v10608_v43  ;;  %v787_v8 = vsub.f32 %v8673_v16, %v786_v31 }
  0xde   :  { %6403 = vmatpush3.msra.mxu1 %v8657_v5  ;;  %6360 = vmatpush3.msra.mxu0 %v8474_v41 }
  0xdf   :  { %6404 = vmatprep.subr.mxu1 %v10608_v43  ;;  %6361 = vmatprep.subr.mxu0 %v10608_v43  ;;  %v788_v14 = vand.u32 4294901760, %v787_v8  ;;  %v10648_v8 = vld [vmem:[#allocation39_spill] sm:$0xff] }
  0xe0   :  { %6405 = vmatpush3.msra.mxu1 %v8669_v30  ;;  %6362 = vmatpush3.msra.mxu0 %v8493_v46 }
  0xe1   :  { %6406 = vmatprep.subr.mxu1 %v10608_v43  ;;  %6363 = vmatprep.subr.mxu0 %v10608_v43 }
  0xe2   :  { %6407 = vmatpush3.msra.mxu1 %v8677_v59  ;;  %6408 = vmatprep.mubr.msk.f32.mxu1 %vm7865_vm0, %v10608_v43 }
  0xe3   :  { %6364 = vmatpush3.msra.mxu0 %v8512_v58  ;;  %6409 = vmatmul.mubr.msk.f32.vlgmr.msra.gmra.mxu1 %vm700_vm2, %v10615_v15 }
  0xe4   :  { %6446 = vmatprep.subr.mxu1 %v10608_v43  ;;  %6365 = vmatprep.subr.mxu0 %v10608_v43 }
  0xe5   :  { %6447 = vmatpush3.msra.mxu1 %v8333_v57  ;;  %6366 = vmatpush3.msra.mxu0 %v8531_v34 }
  0xe6   :  { %6448 = vmatprep.subr.mxu1 %v10608_v43  ;;  %6367 = vmatprep.subr.mxu0 %v10608_v43 }
  0xe7   :  { %6449 = vmatpush3.msra.mxu1 %v8342_v13  ;;  %6368 = vmatpush3.msra.mxu0 %v8551_v42 }
  0xe8   :  { %6450 = vmatprep.subr.mxu1 %v10608_v43  ;;  %6369 = vmatprep.subr.mxu0 %v10608_v43 }
  0xe9   :  { %6451 = vmatpush3.msra.mxu1 %v8354_v25  ;;  %6370 = vmatpush3.msra.mxu0 %v8573_v1 }
  0xea   :  { %6452 = vmatprep.subr.mxu1 %v10608_v43  ;;  %6371 = vmatprep.subr.mxu0 %v10608_v43 }
  0xeb   :  { %6453 = vmatpush3.msra.mxu1 %v8363_v24  ;;  %6372 = vmatpush3.msra.mxu0 %v8589_v12 }
  0xec   :  { %6373 = vmatprep.mubr.msk.f32.mxu0 %vm7865_vm0, %v10608_v43  ;;  %6454 = vmatprep.subr.mxu1 %v10608_v43 }
  0xed   :  { %6374 = vmatmul.mubr.f32.vlgmr.msra.gmra.mxu0 %v788_v14  ;;  %6411 = vmatprep.subr.mxu0 %v10608_v43  ;;  %v10649_v14 = vld [vmem:[#allocation5_spill] sm:$0xff] }
  0xee   :  { %6455 = vmatpush3.msra.mxu1 %v8383_v49  ;;  %6412 = vmatpush3.msra.mxu0 %v8352_v29 }
  0xef   :  { %6456 = vmatprep.subr.mxu1 %v10608_v43  ;;  %6413 = vmatprep.subr.mxu0 %v10608_v43 }
  0xf0   :  { %6457 = vmatpush3.msra.mxu1 %v8398_v50  ;;  %6414 = vmatpush3.msra.mxu0 %v8361_v33 }
  0xf1   :  { %6458 = vmatprep.subr.mxu1 %v10608_v43  ;;  %6415 = vmatprep.subr.mxu0 %v10608_v43 }
  0xf2   :  { %6459 = vmatpush3.msra.mxu1 %v8410_v61  ;;  %6416 = vmatpush3.msra.mxu0 %v8376_v0 }
  0xf3   :  { %6460 = vmatprep.subr.mxu1 %v10608_v43  ;;  %6417 = vmatprep.subr.mxu0 %v10608_v43 }
  0xf4   :  { %6461 = vmatpush3.msra.mxu1 %v8424_v36  ;;  %6418 = vmatpush3.msra.mxu0 %v8394_v38 }
  0xf5   :  { %6462 = vmatprep.subr.mxu1 %v10608_v43  ;;  %6419 = vmatprep.subr.mxu0 %v10608_v43 }
  0xf6   :  { %6463 = vmatpush3.msra.mxu1 %v8452_v7  ;;  %6420 = vmatpush3.msra.mxu0 %v8415_v60 }
  0xf7   :  { %6464 = vmatprep.subr.mxu1 %v10608_v43  ;;  %6421 = vmatprep.subr.mxu0 %v10608_v43 }
  0xf8   :  { %6465 = vmatpush3.msra.mxu1 %v8474_v41  ;;  %6422 = vmatpush3.msra.mxu0 %v8432_v44 }
  0xf9   :  { %6466 = vmatprep.subr.mxu1 %v10608_v43  ;;  %6423 = vmatprep.subr.mxu0 %v10608_v43 }
  0xfa   :  { %6467 = vmatpush3.msra.mxu1 %v8493_v46  ;;  %6424 = vmatpush3.msra.mxu0 %v8441_v22 }
  0xfb   :  { %6468 = vmatprep.subr.mxu1 %v10608_v43  ;;  %6425 = vmatprep.subr.mxu0 %v10608_v43 }
  0xfc   :  { %6469 = vmatpush3.msra.mxu1 %v8512_v58  ;;  %6426 = vmatpush3.msra.mxu0 %v8464_v17 }
  0xfd   :  { %6470 = vmatprep.subr.mxu1 %v10608_v43  ;;  %6427 = vmatprep.subr.mxu0 %v10608_v43 }
  0xfe   :  { %6471 = vmatpush3.msra.mxu1 %v8531_v34  ;;  %6428 = vmatpush3.msra.mxu0 %v8491_v3 }
  0xff   :  { %6472 = vmatprep.subr.mxu1 %v10608_v43  ;;  %6429 = vmatprep.subr.mxu0 %v10608_v43 }
 0x100   :  { %6473 = vmatpush3.msra.mxu1 %v8551_v42  ;;  %6430 = vmatpush3.msra.mxu0 %v8510_v4 }
 0x101   :  { %6474 = vmatprep.subr.mxu1 %v10608_v43  ;;  %6431 = vmatprep.subr.mxu0 %v10608_v43 }
 0x102   :  { %6475 = vmatpush3.msra.mxu1 %v8573_v1  ;;  %6432 = vmatpush3.msra.mxu0 %v8529_v55 }
 0x103   :  { %6476 = vmatprep.subr.mxu1 %v10608_v43  ;;  %6433 = vmatprep.subr.mxu0 %v10608_v43 }
 0x104   :  { %6477 = vmatpush3.msra.mxu1 %v8589_v12  ;;  %6478 = vmatprep.mubr.msk.f32.mxu1 %vm7865_vm0, %v10608_v43 }
 0x105   :  { %6434 = vmatpush3.msra.mxu0 %v8549_v26  ;;  %6479 = vmatmul.mubr.f32.vlgmr.msra.gmra.mxu1 %v786_v31  ;;  %v8846_v31 = vld [vmem:[%s10325_s0] sm:$0xff] }
 0x106   :  { %6516 = vmatprep.subr.mxu1 %v10608_v43  ;;  %6435 = vmatprep.subr.mxu0 %v10608_v43 }
 0x107   :  { %6517 = vmatpush3.msra.mxu1 %v8333_v57  ;;  %6436 = vmatpush3.msra.mxu0 %v8571_v52 }
 0x108   :  { %6518 = vmatprep.subr.mxu1 %v10608_v43  ;;  %6437 = vmatprep.subr.mxu0 %v10608_v43 }
 0x109   :  { %6519 = vmatpush3.msra.mxu1 %v8342_v13  ;;  %6438 = vmatpush3.msra.mxu0 %v8587_v56 }
 0x10a   :  { %6520 = vmatprep.subr.mxu1 %v10608_v43  ;;  %6439 = vmatprep.subr.mxu0 %v10608_v43 }
 0x10b   :  { %6521 = vmatpush3.msra.mxu1 %v8354_v25  ;;  %6440 = vmatpush3.msra.mxu0 %v8603_v51 }
 0x10c   :  { %6522 = vmatprep.subr.mxu1 %v10608_v43  ;;  %6441 = vmatprep.subr.mxu0 %v10608_v43 }
 0x10d   :  { %6523 = vmatpush3.msra.mxu1 %v8363_v24  ;;  %6442 = vmatpush3.msra.mxu0 %v8617_v6  ;;  %v10688_v6 = vld [vmem:[#allocation45_spill] sm:$0xff] }
 0x10e   :  { %6443 = vmatprep.mubr.msk.f32.mxu0 %vm7865_vm0, %v10608_v43  ;;  %6524 = vmatprep.subr.mxu1 %v10608_v43 }
 0x10f   :  { %6444 = vmatmul.mubr.f32.vlgmr.msra.gmra.mxu0 %v8673_v16  ;;  %6481 = vmatprep.subr.mxu0 %v10608_v43  ;;  %v7869_v16 = vmov 3  }
 0x110   :  { %6525 = vmatpush3.msra.mxu1 %v8383_v49  ;;  %6482 = vmatpush3.msra.mxu0 %v8373_v35 }
 0x111   :  { %6526 = vmatprep.subr.mxu1 %v10608_v43  ;;  %6483 = vmatprep.subr.mxu0 %v10608_v43 }
 0x112   :  { %6527 = vmatpush3.msra.mxu1 %v8398_v50  ;;  %6484 = vmatpush3.msra.mxu0 %v8391_v9 }
 0x113   :  { %6528 = vmatprep.subr.mxu1 %v10608_v43  ;;  %6485 = vmatprep.subr.mxu0 %v10608_v43 }
 0x114   :  { %6529 = vmatpush3.msra.mxu1 %v8410_v61  ;;  %6486 = vmatpush3.msra.mxu0 %v8408_v28  ;;  %v10677_v28 = vld [vmem:[#allocation10_spill] sm:$0xff] }
 0x115   :  { %6530 = vmatprep.subr.mxu1 %v10608_v43  ;;  %6487 = vmatprep.subr.mxu0 %v10608_v43 }
 0x116   :  { %6531 = vmatpush3.msra.mxu1 %v8424_v36  ;;  %6488 = vmatpush3.msra.mxu0 %v8422_v54 }
 0x117   :  { %6532 = vmatprep.subr.mxu1 %v10608_v43  ;;  %6489 = vmatprep.subr.mxu0 %v10608_v43 }
 0x118   :  { %6533 = vmatpush3.msra.mxu1 %v8452_v7  ;;  %6490 = vmatpush3.msra.mxu0 %v8450_v63  ;;  %v10671_v63 = vld [vmem:[#allocation38_spill] sm:$0xff] }
 0x119   :  { %6534 = vmatprep.subr.mxu1 %v10608_v43  ;;  %6491 = vmatprep.subr.mxu0 %v10608_v43 }
 0x11a   :  { %6535 = vmatpush3.msra.mxu1 %v8474_v41  ;;  %6492 = vmatpush3.msra.mxu0 %v8472_v37  ;;  %v10670_v37 = vld [vmem:[#allocation68_spill] sm:$0xff] }
 0x11b   :  { %6536 = vmatprep.subr.mxu1 %v10608_v43  ;;  %6493 = vmatprep.subr.mxu0 %v10608_v43 }
 0x11c   :  { %6537 = vmatpush3.msra.mxu1 %v8493_v46  ;;  %6494 = vmatpush3.msra.mxu0 %v8481_v27  ;;  %v10669_v27 = vld [vmem:[#allocation34_spill] sm:$0xff] }
 0x11d   :  { %6538 = vmatprep.subr.mxu1 %v10608_v43  ;;  %6495 = vmatprep.subr.mxu0 %v10608_v43 }
 0x11e   :  { %6539 = vmatpush3.msra.mxu1 %v8512_v58  ;;  %6496 = vmatpush3.msra.mxu0 %v8500_v62  ;;  %v10667_v62 = vld [vmem:[#allocation32_spill] sm:$0xff] }
 0x11f   :  { %6540 = vmatprep.subr.mxu1 %v10608_v43  ;;  %6497 = vmatprep.subr.mxu0 %v10608_v43 }
 0x120   :  { %6541 = vmatpush3.msra.mxu1 %v8531_v34  ;;  %6498 = vmatpush3.msra.mxu0 %v8526_v21  ;;  %v10666_v21 = vld [vmem:[#allocation66_spill] sm:$0xff] }
 0x121   :  { %6542 = vmatprep.subr.mxu1 %v10608_v43  ;;  %6499 = vmatprep.subr.mxu0 %v10608_v43 }
 0x122   :  { %6543 = vmatpush3.msra.mxu1 %v8551_v42  ;;  %6500 = vmatpush3.msra.mxu0 %v8546_v47  ;;  %v10665_v47 = vld [vmem:[#allocation31_spill] sm:$0xff] }
 0x123   :  { %6544 = vmatprep.subr.mxu1 %v10608_v43  ;;  %6501 = vmatprep.subr.mxu0 %v10608_v43 }
 0x124   :  { %6545 = vmatpush3.msra.mxu1 %v8573_v1  ;;  %6502 = vmatpush3.msra.mxu0 %v8568_v19 }
 0x125   :  { %6546 = vmatprep.subr.mxu1 %v10608_v43  ;;  %6503 = vmatprep.subr.mxu0 %v10608_v43 }
 0x126   :  { %6547 = vmatpush3.msra.mxu1 %v8589_v12  ;;  %6548 = vmatprep.mubr.msk.f32.mxu1 %vm7865_vm0, %v10608_v43 }
 0x127   :  { %6504 = vmatpush3.msra.mxu0 %v8584_v18  ;;  %6549 = vmatmul.mubr.msk.f32.vlgmr.msra.gmra.mxu1 %vm700_vm2, %v10615_v15 }
 0x128   :  { %6586 = vmatprep.subr.mxu1 %v10608_v43  ;;  %7833 = vset.pattern.permute.xlu1 %v7869_v16  ;;  %v10650_v16 = vld [vmem:[#allocation43_spill] sm:$0xff] }
 0x129   :  { %6505 = vmatprep.subr.mxu0 %v10608_v43  ;;  %6587 = vmatpush3.msra.mxu1 %v8015_v39  ;;  %v10662_v39 = vld [vmem:[#allocation63_spill] sm:$0xff] }
 0x12a   :  { %1992 = vperm.xlu1 %7833, %v8846_v31   ;;  %6506 = vmatpush3.msra.mxu0 %v8600_v11 }
 0x12b   :  { %6588 = vmatprep.subr.mxu1 %v10608_v43  ;;  %6507 = vmatprep.subr.mxu0 %v10608_v43 }
 0x12c   :  { %6589 = vmatpush3.msra.mxu1 %v8017_v40  ;;  %6508 = vmatpush3.msra.mxu0 %v8614_v10  ;;  %v8888_v10 = vpop.permute.xlu1 %1345  ;;  %v10659_v40 = vld [vmem:[#allocation12_spill] sm:$0xff] }
 0x12d   :  { %6590 = vmatprep.subr.mxu1 %v10608_v43  ;;  %6509 = vmatprep.subr.mxu0 %v10608_v43  ;;  %vm1347_vm3 = vcmp.eq.s32.totalorder %v8220_v32, %v8888_v10  ;;  %v10717_v10 = vld [vmem:[#allocation91_spill] sm:$0xff] }
 0x12e   :  { %6591 = vmatpush3.msra.mxu1 %v8033_v45  ;;  %6510 = vmatpush3.msra.mxu0 %v8630_v2  ;;  %v10655_v2 = vld [vmem:[#allocation8_spill] sm:$0xff]  ;;  %v10657_v45 = vld [vmem:[#allocation9_spill] sm:$0xff]  ;;  %v5291_v18 = vsel %vm1347_vm3, 1.0, %v10608_v43 }
 0x12f   :  { %6592 = vmatprep.subr.mxu1 %v10608_v43  ;;  %6511 = vmatprep.subr.mxu0 %v10608_v43 }
 0x130   :  { %6593 = vmatpush3.msra.mxu1 %v8055_v53  ;;  %6512 = vmatpush3.msra.mxu0 %v8641_v48  ;;  %v10651_v48 = vld [vmem:[#allocation6_spill] sm:$0xff]  ;;  %v10653_v53 = vld [vmem:[#allocation7_spill] sm:$0xff] }
 0x131   :  { %6513 = vmatprep.mubr.msk.f32.mxu0 %vm7865_vm0, %v10608_v43  ;;  %6594 = vmatprep.subr.mxu1 %v10608_v43 }
 0x132   :  { %6514 = vmatmul.mubr.msk.f32.vlgmr.msra.gmra.mxu0 %vm700_vm2, %v10615_v15  ;;  %6551 = vmatprep.subr.mxu0 %v10608_v43 }
 0x133   :  { %6595 = vmatpush3.msra.mxu1 %v10648_v8  ;;  %6552 = vmatpush3.msra.mxu0 %v10649_v14  ;;  %v10654_v8 = vld [vmem:[#allocation51_spill] sm:$0xff] }
 0x134   :  { %6596 = vmatprep.subr.mxu1 %v10608_v43  ;;  %6553 = vmatprep.subr.mxu0 %v10608_v43 }
 0x135   :  { %6597 = vmatpush3.msra.mxu1 %v10650_v16  ;;  %6554 = vmatpush3.msra.mxu0 %v10651_v48  ;;  %v10656_v16 = vld [vmem:[#allocation55_spill] sm:$0xff] }
 0x136   :  { %6598 = vmatprep.subr.mxu1 %v10608_v43  ;;  %6555 = vmatprep.subr.mxu0 %v10608_v43 }
 0x137   :  { %6599 = vmatpush3.msra.mxu1 %v10652_v20  ;;  %6556 = vmatpush3.msra.mxu0 %v10653_v53  ;;  %v10658_v20 = vld [vmem:[#allocation58_spill] sm:$0xff] }
 0x138   :  { %6600 = vmatprep.subr.mxu1 %v10608_v43  ;;  %6557 = vmatprep.subr.mxu0 %v10608_v43 }
 0x139   :  { %6601 = vmatpush3.msra.mxu1 %v10654_v8  ;;  %6558 = vmatpush3.msra.mxu0 %v10655_v2  ;;  %v10661_v8 = vld [vmem:[#allocation13_spill] sm:$0xff] }
 0x13a   :  { %6602 = vmatprep.subr.mxu1 %v10608_v43  ;;  %6559 = vmatprep.subr.mxu0 %v10608_v43 }
 0x13b   :  { %6603 = vmatpush3.msra.mxu1 %v10656_v16  ;;  %6560 = vmatpush3.msra.mxu0 %v10657_v45  ;;  %v10660_v16 = vld [vmem:[#allocation61_spill] sm:$0xff] }
 0x13c   :  { %6604 = vmatprep.subr.mxu1 %v10608_v43  ;;  %6561 = vmatprep.subr.mxu0 %v10608_v43 }
 0x13d   :  { %6605 = vmatpush3.msra.mxu1 %v10658_v20  ;;  %6562 = vmatpush3.msra.mxu0 %v10659_v40  ;;  %v10663_v20 = vld [vmem:[#allocation17_spill] sm:$0xff] }
 0x13e   :  { %6606 = vmatprep.subr.mxu1 %v10608_v43  ;;  %6563 = vmatprep.subr.mxu0 %v10608_v43 }
 0x13f   :  { %6607 = vmatpush3.msra.mxu1 %v10660_v16  ;;  %6564 = vmatpush3.msra.mxu0 %v10661_v8  ;;  %v294_v11 = vpop.f32.mrf.mxu1  ;;  %v10664_v16 = vld [vmem:[#allocation65_spill] sm:$0xff] }
 0x140   :  { %6608 = vmatprep.subr.mxu1 %v10608_v43  ;;  %6565 = vmatprep.subr.mxu0 %v10608_v43 }
 0x141   :  { %6609 = vmatpush3.msra.mxu1 %v10662_v39  ;;  %6566 = vmatpush3.msra.mxu0 %v10663_v20  ;;  %v6200_v19 = vpop.f32.mrf.mxu1  ;;  %v8914_v39 = vsub.f32 %v5291_v18, %v5291_v18 }
 0x142   :  { %6610 = vmatprep.subr.mxu1 %v10608_v43  ;;  %6567 = vmatprep.subr.mxu0 %v10608_v43  ;;  %v10668_v19 = vld [vmem:[#allocation67_spill] sm:$0xff] }
 0x143   :  { %6611 = vmatpush3.msra.mxu1 %v10664_v16  ;;  %6568 = vmatpush3.msra.mxu0 %v10665_v47  ;;  %v10689_v51 = vand.u32 4294901760, %v8914_v39 }
 0x144   :  { %6612 = vmatprep.subr.mxu1 %v10608_v43  ;;  %6569 = vmatprep.subr.mxu0 %v10608_v43 }
 0x145   :  { %6613 = vmatpush3.msra.mxu1 %v10666_v21  ;;  %6570 = vmatpush3.msra.mxu0 %v10667_v62 }
 0x146   :  { %6614 = vmatprep.subr.mxu1 %v10608_v43  ;;  %6571 = vmatprep.subr.mxu0 %v10608_v43 }
 0x147   :  { %6615 = vmatpush3.msra.mxu1 %v10668_v19  ;;  %6572 = vmatpush3.msra.mxu0 %v10669_v27  ;;  %v10673_v19 = vand.u32 4294901760, %v8914_v39 }
 0x148   :  { %6616 = vmatprep.subr.mxu1 %v10608_v43  ;;  %6573 = vmatprep.subr.mxu0 %v10608_v43  ;;  %v143_v18 = vpop.f32.mrf.mxu0 }
 0x149   :  { %6617 = vmatpush3.msra.mxu1 %v10670_v37  ;;  %6618 = vmatprep.mubr.msk.f32.mxu1 %vm7865_vm0, %v10608_v43  ;;  %v8928_v21 = vadd.f32 %v294_v11, %v143_v18  ;;  %v10672_v37 = vld [vmem:[#allocation42_spill] sm:$0xff]  ;;  %v1434_v11 = vsub.f32 %v8914_v39, %v10673_v19 }
 0x14a   :  { %6574 = vmatpush3.msra.mxu0 %v10671_v63  ;;  %6619 = vmatmul.mubr.msk.f32.vlgmr.msra.gmra.mxu1 %vm1347_vm3, %v10615_v15  ;;  %v6165_v16 = vpop.f32.mrf.mxu0  ;;  %v10674_v18 = vld [vmem:[#allocation46_spill] sm:$0xff] }
 0x14b   :  { %6656 = vmatprep.subr.mxu1 %v10608_v43  ;;  %6575 = vmatprep.subr.mxu0 %v10608_v43  ;;  %v10675_v16 = vld [vmem:[#allocation50_spill] sm:$0xff]  ;;  %v1435_v54 = vand.u32 4294901760, %v1434_v11  ;;  %v10678_v11 = vld [vmem:[#allocation11_spill] sm:$0xff] }
 0x14c   :  { %6657 = vmatpush3.msra.mxu1 %v10649_v14  ;;  %6576 = vmatpush3.msra.mxu0 %v10672_v37  ;;  %v10676_v19 = vld [vmem:[#allocation54_spill] sm:$0xff] }
 0x14d   :  { %6658 = vmatprep.subr.mxu1 %v10608_v43  ;;  %6577 = vmatprep.subr.mxu0 %v10608_v43 }
 0x14e   :  { %6659 = vmatpush3.msra.mxu1 %v10651_v48  ;;  %6578 = vmatpush3.msra.mxu0 %v10674_v18 }
 0x14f   :  { %6660 = vmatprep.subr.mxu1 %v10608_v43  ;;  %6579 = vmatprep.subr.mxu0 %v10608_v43 }
 0x150   :  { %6661 = vmatpush3.msra.mxu1 %v10653_v53  ;;  %6580 = vmatpush3.msra.mxu0 %v10675_v16 }
 0x151   :  { %6662 = vmatprep.subr.mxu1 %v10608_v43  ;;  %6581 = vmatprep.subr.mxu0 %v10608_v43 }
 0x152   :  { %6663 = vmatpush3.msra.mxu1 %v10655_v2  ;;  %6582 = vmatpush3.msra.mxu0 %v10676_v19 }
 0x153   :  { %6583 = vmatprep.mubr.msk.f32.mxu0 %vm7865_vm0, %v10608_v43  ;;  %6664 = vmatprep.subr.mxu1 %v10608_v43 }
 0x154   :  { %6584 = vmatmul.mubr.f32.vlgmr.msra.gmra.mxu0 %v1435_v54  ;;  %6621 = vmatprep.subr.mxu0 %v10608_v43  ;;  %v10679_v54 = vld [vmem:[#allocation14_spill] sm:$0xff] }
 0x155   :  { %6665 = vmatpush3.msra.mxu1 %v10657_v45  ;;  %6622 = vmatpush3.msra.mxu0 %v10677_v28  ;;  %v10680_v28 = vld [vmem:[#allocation15_spill] sm:$0xff] }
 0x156   :  { %6666 = vmatprep.subr.mxu1 %v10608_v43  ;;  %6623 = vmatprep.subr.mxu0 %v10608_v43 }
 0x157   :  { %6667 = vmatpush3.msra.mxu1 %v10659_v40  ;;  %6624 = vmatpush3.msra.mxu0 %v10678_v11  ;;  %v10681_v11 = vld [vmem:[#allocation16_spill] sm:$0xff] }
 0x158   :  { %6668 = vmatprep.subr.mxu1 %v10608_v43  ;;  %6625 = vmatprep.subr.mxu0 %v10608_v43 }
 0x159   :  { %6669 = vmatpush3.msra.mxu1 %v10661_v8  ;;  %6626 = vmatpush3.msra.mxu0 %v10679_v54  ;;  %v10682_v54 = vld [vmem:[#allocation20_spill] sm:$0xff] }
 0x15a   :  { %6670 = vmatprep.subr.mxu1 %v10608_v43  ;;  %6627 = vmatprep.subr.mxu0 %v10608_v43 }
 0x15b   :  { %6671 = vmatpush3.msra.mxu1 %v10663_v20  ;;  %6628 = vmatpush3.msra.mxu0 %v10680_v28  ;;  %v10683_v28 = vld [vmem:[#allocation23_spill] sm:$0xff] }
 0x15c   :  { %6672 = vmatprep.subr.mxu1 %v10608_v43  ;;  %6629 = vmatprep.subr.mxu0 %v10608_v43 }
 0x15d   :  { %6673 = vmatpush3.msra.mxu1 %v10665_v47  ;;  %6630 = vmatpush3.msra.mxu0 %v10681_v11  ;;  %v10684_v11 = vld [vmem:[#allocation26_spill] sm:$0xff] }
 0x15e   :  { %6674 = vmatprep.subr.mxu1 %v10608_v43  ;;  %6631 = vmatprep.subr.mxu0 %v10608_v43 }
 0x15f   :  { %6675 = vmatpush3.msra.mxu1 %v10667_v62  ;;  %6632 = vmatpush3.msra.mxu0 %v10682_v54  ;;  %v487_v9 = vpop.f32.mrf.mxu1  ;;  %v10685_v54 = vld [vmem:[#allocation36_spill] sm:$0xff] }
 0x160   :  { %6676 = vmatprep.subr.mxu1 %v10608_v43  ;;  %6633 = vmatprep.subr.mxu0 %v10608_v43 }
 0x161   :  { %6677 = vmatpush3.msra.mxu1 %v10669_v27  ;;  %6634 = vmatpush3.msra.mxu0 %v10683_v28  ;;  %v6270_v35 = vpop.f32.mrf.mxu1 }
 0x162   :  { %6678 = vmatprep.subr.mxu1 %v10608_v43  ;;  %6635 = vmatprep.subr.mxu0 %v10608_v43  ;;  %v10686_v35 = vld [vmem:[#allocation37_spill] sm:$0xff] }
 0x163   :  { %6679 = vmatpush3.msra.mxu1 %v10671_v63  ;;  %6636 = vmatpush3.msra.mxu0 %v10684_v11  ;;  %v10687_v11 = vld [vmem:[#allocation41_spill] sm:$0xff] }
 0x164   :  { %6680 = vmatprep.subr.mxu1 %v10608_v43  ;;  %6637 = vmatprep.subr.mxu0 %v10608_v43 }
 0x165   :  { %6681 = vmatpush3.msra.mxu1 %v10672_v37  ;;  %6638 = vmatpush3.msra.mxu0 %v10685_v54 }
 0x166   :  { %6682 = vmatprep.subr.mxu1 %v10608_v43  ;;  %6639 = vmatprep.subr.mxu0 %v10608_v43 }
 0x167   :  { %6683 = vmatpush3.msra.mxu1 %v10674_v18  ;;  %6640 = vmatpush3.msra.mxu0 %v10686_v35 }
 0x168   :  { %6684 = vmatprep.subr.mxu1 %v10608_v43  ;;  %6641 = vmatprep.subr.mxu0 %v10608_v43 }
 0x169   :  { %6685 = vmatpush3.msra.mxu1 %v10675_v16  ;;  %6642 = vmatpush3.msra.mxu0 %v10687_v11  ;;  %v398_v28 = vpop.f32.mrf.mxu0 }
 0x16a   :  { %6686 = vmatprep.subr.mxu1 %v10608_v43  ;;  %6643 = vmatprep.subr.mxu0 %v10608_v43  ;;  %v399_v54 = vadd.f32 %v398_v28, %v8928_v21  ;;  %v10690_v28 = vld [vmem:[#allocation49_spill] sm:$0xff] }
 0x16b   :  { %6687 = vmatpush3.msra.mxu1 %v10676_v19  ;;  %6688 = vmatprep.mubr.msk.f32.mxu1 %vm7865_vm0, %v10608_v43  ;;  %v6235_v35 = vpop.f32.mrf.mxu0  ;;  %v10691_v21 = vld [vmem:[#allocation53_spill] sm:$0xff] }
 0x16c   :  { %6644 = vmatpush3.msra.mxu0 %v10688_v6  ;;  %6689 = vmatmul.mubr.f32.vlgmr.msra.gmra.mxu1 %v10689_v51  ;;  %v9009_v56 = vadd.f32 %v487_v9, %v399_v54  ;;  %v10692_v9 = vld [vmem:[#allocation57_spill] sm:$0xff]  ;;  %v10693_v51 = vld [vmem:[#allocation60_spill] sm:$0xff]  ;;  %v10694_v54 = vld [vmem:[#allocation18_spill] sm:$0xff] }
 0x16d   :  { %6726 = vmatprep.subr.mxu1 %v10608_v43  ;;  %6645 = vmatprep.subr.mxu0 %v10608_v43  ;;  %v10695_v35 = vld [vmem:[#allocation19_spill] sm:$0xff] }
 0x16e   :  { %6727 = vmatpush3.msra.mxu1 %v10649_v14  ;;  %6646 = vmatpush3.msra.mxu0 %v10690_v28  ;;  %v7870_v28 = vmov 4  }
 0x16f   :  { %6728 = vmatprep.subr.mxu1 %v10608_v43  ;;  %6647 = vmatprep.subr.mxu0 %v10608_v43 }
 0x170   :  { %6729 = vmatpush3.msra.mxu1 %v10651_v48  ;;  %6648 = vmatpush3.msra.mxu0 %v10691_v21  ;;  %v10705_v21 = vld [vmem:[#allocation52_spill] sm:$0xff] }
 0x171   :  { %6730 = vmatprep.subr.mxu1 %v10608_v43  ;;  %6649 = vmatprep.subr.mxu0 %v10608_v43 }
 0x172   :  { %6731 = vmatpush3.msra.mxu1 %v10653_v53  ;;  %6650 = vmatpush3.msra.mxu0 %v10692_v9 }
 0x173   :  { %6732 = vmatprep.subr.mxu1 %v10608_v43  ;;  %6651 = vmatprep.subr.mxu0 %v10608_v43 }
 0x174   :  { %6733 = vmatpush3.msra.mxu1 %v10655_v2  ;;  %6652 = vmatpush3.msra.mxu0 %v10693_v51 }
 0x175   :  { %6653 = vmatprep.mubr.msk.f32.mxu0 %vm7865_vm0, %v10608_v43  ;;  %6734 = vmatprep.subr.mxu1 %v10608_v43 }
 0x176   :  { %6654 = vmatmul.mubr.f32.vlgmr.msra.gmra.mxu0 %v8914_v39  ;;  %6691 = vmatprep.subr.mxu0 %v10608_v43  ;;  %v10696_v39 = vld [vmem:[#allocation21_spill] sm:$0xff] }
 0x177   :  { %6735 = vmatpush3.msra.mxu1 %v10657_v45  ;;  %6692 = vmatpush3.msra.mxu0 %v10694_v54  ;;  %v10697_v54 = vld [vmem:[#allocation22_spill] sm:$0xff] }
 0x178   :  { %6736 = vmatprep.subr.mxu1 %v10608_v43  ;;  %6693 = vmatprep.subr.mxu0 %v10608_v43 }
 0x179   :  { %6737 = vmatpush3.msra.mxu1 %v10659_v40  ;;  %6694 = vmatpush3.msra.mxu0 %v10695_v35  ;;  %v10698_v35 = vld [vmem:[#allocation24_spill] sm:$0xff] }
 0x17a   :  { %6738 = vmatprep.subr.mxu1 %v10608_v43  ;;  %6695 = vmatprep.subr.mxu0 %v10608_v43 }
 0x17b   :  { %6739 = vmatpush3.msra.mxu1 %v10661_v8  ;;  %6696 = vmatpush3.msra.mxu0 %v10696_v39  ;;  %v10699_v39 = vld [vmem:[#allocation25_spill] sm:$0xff] }
 0x17c   :  { %6740 = vmatprep.subr.mxu1 %v10608_v43  ;;  %6697 = vmatprep.subr.mxu0 %v10608_v43 }
 0x17d   :  { %6741 = vmatpush3.msra.mxu1 %v10663_v20  ;;  %6698 = vmatpush3.msra.mxu0 %v10697_v54  ;;  %v10700_v54 = vld [vmem:[#allocation29_spill] sm:$0xff] }
 0x17e   :  { %6742 = vmatprep.subr.mxu1 %v10608_v43  ;;  %6699 = vmatprep.subr.mxu0 %v10608_v43 }
 0x17f   :  { %6743 = vmatpush3.msra.mxu1 %v10665_v47  ;;  %6700 = vmatpush3.msra.mxu0 %v10698_v35  ;;  %v10701_v35 = vld [vmem:[#allocation33_spill] sm:$0xff] }
 0x180   :  { %6744 = vmatprep.subr.mxu1 %v10608_v43  ;;  %6701 = vmatprep.subr.mxu0 %v10608_v43 }
 0x181   :  { %6745 = vmatpush3.msra.mxu1 %v10667_v62  ;;  %6702 = vmatpush3.msra.mxu0 %v10699_v39  ;;  %v693_v51 = vpop.f32.mrf.mxu1  ;;  %v10702_v39 = vld [vmem:[#allocation40_spill] sm:$0xff] }
 0x182   :  { %6746 = vmatprep.subr.mxu1 %v10608_v43  ;;  %6703 = vmatprep.subr.mxu0 %v10608_v43 }
 0x183   :  { %6747 = vmatpush3.msra.mxu1 %v10669_v27  ;;  %6704 = vmatpush3.msra.mxu0 %v10700_v54  ;;  %v6340_v9 = vpop.f32.mrf.mxu1 }
 0x184   :  { %6748 = vmatprep.subr.mxu1 %v10608_v43  ;;  %6705 = vmatprep.subr.mxu0 %v10608_v43  ;;  %v10703_v9 = vld [vmem:[#allocation44_spill] sm:$0xff] }
 0x185   :  { %6749 = vmatpush3.msra.mxu1 %v10671_v63  ;;  %6706 = vmatpush3.msra.mxu0 %v10701_v35  ;;  %v10704_v35 = vld [vmem:[#allocation48_spill] sm:$0xff] }
 0x186   :  { %6750 = vmatprep.subr.mxu1 %v10608_v43  ;;  %6707 = vmatprep.subr.mxu0 %v10608_v43 }
 0x187   :  { %6751 = vmatpush3.msra.mxu1 %v10672_v37  ;;  %6708 = vmatpush3.msra.mxu0 %v10702_v39 }
 0x188   :  { %6752 = vmatprep.subr.mxu1 %v10608_v43  ;;  %6709 = vmatprep.subr.mxu0 %v10608_v43 }
 0x189   :  { %6753 = vmatpush3.msra.mxu1 %v10674_v18  ;;  %6710 = vmatpush3.msra.mxu0 %v10703_v9 }
 0x18a   :  { %6754 = vmatprep.subr.mxu1 %v10608_v43  ;;  %6711 = vmatprep.subr.mxu0 %v10608_v43 }
 0x18b   :  { %6755 = vmatpush3.msra.mxu1 %v10675_v16  ;;  %6712 = vmatpush3.msra.mxu0 %v10704_v35  ;;  %v606_v54 = vpop.f32.mrf.mxu0 }
 0x18c   :  { %6756 = vmatprep.subr.mxu1 %v10608_v43  ;;  %6713 = vmatprep.subr.mxu0 %v10608_v43  ;;  %v607_v39 = vadd.f32 %v606_v54, %v9009_v56  ;;  %v10707_v56 = vld [vmem:[#allocation73_spill] sm:$0xff]  ;;  %v10708_v54 = vld [vmem:[#allocation56_spill] sm:$0xff] }
 0x18d   :  { %6757 = vmatpush3.msra.mxu1 %v10676_v19  ;;  %6758 = vmatprep.mubr.msk.f32.mxu1 %vm7865_vm0, %v10608_v43  ;;  %v6305_v9 = vpop.f32.mrf.mxu0 }
 0x18e   :  { %6714 = vmatpush3.msra.mxu0 %v10705_v21  ;;  %6759 = vmatmul.mubr.msk.f32.vlgmr.msra.gmra.mxu1 %vm1347_vm3, %v10615_v15  ;;  %v9085_v35 = vadd.f32 %v693_v51, %v607_v39  ;;  %v10709_v9 = vld [vmem:[#allocation76_spill] sm:$0xff]  ;;  %v10710_v51 = vld [vmem:[#allocation59_spill] sm:$0xff]  ;;  %v10712_v39 = vld [vmem:[#allocation62_spill] sm:$0xff] }
 0x18f   :  { %6796 = vmatprep.subr.mxu1 %v10608_v43  ;;  %7834 = vset.pattern.permute.xlu1 %v7870_v28  ;;  %v10711_v28 = vld [vmem:[#allocation79_spill] sm:$0xff] }
 0x190   :  { %10706 = vst [vmem:[#allocation5_spill] sm:$0xff] %v9085_v35  ;;  %6715 = vmatprep.subr.mxu0 %v10608_v43  ;;  %6797 = vmatpush3.msra.mxu1 %v10707_v56  ;;  %v10713_v35 = vld [vmem:[#allocation82_spill] sm:$0xff] }
 0x191   :  { %2639 = vperm.xlu1 %7834, %v8846_v31   ;;  %6716 = vmatpush3.msra.mxu0 %v10708_v54  ;;  %v10714_v54 = vld [vmem:[#allocation64_spill] sm:$0xff] }
 0x192   :  { %6798 = vmatprep.subr.mxu1 %v10608_v43  ;;  %6717 = vmatprep.subr.mxu0 %v10608_v43 }
 0x193   :  { %6799 = vmatpush3.msra.mxu1 %v10709_v9  ;;  %6718 = vmatpush3.msra.mxu0 %v10710_v51  ;;  %v10721_v51 = vld [vmem:[#allocation103_spill] sm:$0xff] }
 0x194   :  { %6800 = vmatprep.subr.mxu1 %v10608_v43  ;;  %6719 = vmatprep.subr.mxu0 %v10608_v43 }
 0x195   :  { %6801 = vmatpush3.msra.mxu1 %v10711_v28  ;;  %6720 = vmatpush3.msra.mxu0 %v10712_v39  ;;  %v10715_v39 = vld [vmem:[#allocation85_spill] sm:$0xff] }
 0x196   :  { %6802 = vmatprep.subr.mxu1 %v10608_v43  ;;  %6721 = vmatprep.subr.mxu0 %v10608_v43 }
 0x197   :  { %6803 = vmatpush3.msra.mxu1 %v10713_v35  ;;  %6722 = vmatpush3.msra.mxu0 %v10714_v54  ;;  %v10716_v54 = vld [vmem:[#allocation88_spill] sm:$0xff] }
 0x198   :  { %6723 = vmatprep.mubr.msk.f32.mxu0 %vm7865_vm0, %v10608_v43  ;;  %6804 = vmatprep.subr.mxu1 %v10608_v43  ;;  %v10720_v35 = vld [vmem:[#allocation100_spill] sm:$0xff] }
 0x199   :  { %6724 = vmatmul.mubr.msk.f32.vlgmr.msra.gmra.mxu0 %vm1347_vm3, %v10615_v15  ;;  %6761 = vmatprep.subr.mxu0 %v10608_v43 }
 0x19a   :  { %6805 = vmatpush3.msra.mxu1 %v10715_v39  ;;  %6762 = vmatpush3.msra.mxu0 %v8333_v57  ;;  %v10718_v39 = vld [vmem:[#allocation94_spill] sm:$0xff] }
 0x19b   :  { %6806 = vmatprep.subr.mxu1 %v10608_v43  ;;  %6763 = vmatprep.subr.mxu0 %v10608_v43 }
 0x19c   :  { %6807 = vmatpush3.msra.mxu1 %v10716_v54  ;;  %6764 = vmatpush3.msra.mxu0 %v8342_v13  ;;  %v10719_v54 = vld [vmem:[#allocation97_spill] sm:$0xff] }
 0x19d   :  { %6808 = vmatprep.subr.mxu1 %v10608_v43  ;;  %6765 = vmatprep.subr.mxu0 %v10608_v43 }
 0x19e   :  { %6809 = vmatpush3.msra.mxu1 %v10717_v10  ;;  %6766 = vmatpush3.msra.mxu0 %v8354_v25 }
 0x19f   :  { %6810 = vmatprep.subr.mxu1 %v10608_v43  ;;  %6767 = vmatprep.subr.mxu0 %v10608_v43 }
 0x1a0   :  { %6811 = vmatpush3.msra.mxu1 %v10718_v39  ;;  %6768 = vmatpush3.msra.mxu0 %v8363_v24 }
 0x1a1   :  { %6812 = vmatprep.subr.mxu1 %v10608_v43  ;;  %6769 = vmatprep.subr.mxu0 %v10608_v43 }
 0x1a2   :  { %6813 = vmatpush3.msra.mxu1 %v10719_v54  ;;  %6770 = vmatpush3.msra.mxu0 %v8383_v49 }
 0x1a3   :  { %6814 = vmatprep.subr.mxu1 %v10608_v43  ;;  %6771 = vmatprep.subr.mxu0 %v10608_v43  ;;  %v941_v10 = vpop.f32.mrf.mxu1 }
 0x1a4   :  { %6815 = vmatpush3.msra.mxu1 %v10720_v35  ;;  %6772 = vmatpush3.msra.mxu0 %v8398_v50  ;;  %v10722_v35 = vld [vmem:[#allocation105_spill] sm:$0xff] }
 0x1a5   :  { %6816 = vmatprep.subr.mxu1 %v10608_v43  ;;  %6773 = vmatprep.subr.mxu0 %v10608_v43  ;;  %v9136_v39 = vpop.permute.xlu1 %1992  ;;  %v6410_v28 = vpop.f32.mrf.mxu1 }
 0x1a6   :  { %6817 = vmatpush3.msra.mxu1 %v10721_v51  ;;  %6774 = vmatpush3.msra.mxu0 %v8410_v61  ;;  %vm1994_vm4 = vcmp.eq.s32.totalorder %v8220_v32, %v9136_v39  ;;  %v10748_v39 = vld [vmem:[#allocation47_spill] sm:$0xff] }
 0x1a7   :  { %6818 = vmatprep.subr.mxu1 %v10608_v43  ;;  %6775 = vmatprep.subr.mxu0 %v10608_v43  ;;  %v5295_v28 = vsel %vm1994_vm4, 1.0, %v10608_v43 }
 0x1a8   :  { %6819 = vmatpush3.msra.mxu1 %v10722_v35  ;;  %6776 = vmatpush3.msra.mxu0 %v8424_v36  ;;  %v9156_v35 = vsub.f32 %v5295_v28, %v5295_v28 }
 0x1a9   :  { %6820 = vmatprep.subr.mxu1 %v10608_v43  ;;  %6777 = vmatprep.subr.mxu0 %v10608_v43 }
 0x1aa   :  { %6821 = vmatpush3.msra.mxu1 %v8649_v23  ;;  %6778 = vmatpush3.msra.mxu0 %v8452_v7  ;;  %v2080_v54 = vand.u32 4294901760, %v9156_v35 }
 0x1ab   :  { %6822 = vmatprep.subr.mxu1 %v10608_v43  ;;  %6779 = vmatprep.subr.mxu0 %v10608_v43 }
 0x1ac   :  { %6823 = vmatpush3.msra.mxu1 %v8657_v5  ;;  %6780 = vmatpush3.msra.mxu0 %v8474_v41 }
 0x1ad   :  { %6824 = vmatprep.subr.mxu1 %v10608_v43  ;;  %6781 = vmatprep.subr.mxu0 %v10608_v43  ;;  %v790_v51 = vpop.f32.mrf.mxu0 }
 0x1ae   :  { %6825 = vmatpush3.msra.mxu1 %v8669_v30  ;;  %6782 = vmatpush3.msra.mxu0 %v8493_v46  ;;  %v9164_v23 = vadd.f32 %v941_v10, %v790_v51  ;;  %v2081_v51 = vsub.f32 %v9156_v35, %v2080_v54 }
 0x1af   :  { %6826 = vmatprep.subr.mxu1 %v10608_v43  ;;  %6783 = vmatprep.subr.mxu0 %v10608_v43  ;;  %v6375_v28 = vpop.f32.mrf.mxu0 }
 0x1b0   :  { %6827 = vmatpush3.msra.mxu1 %v8677_v59  ;;  %6828 = vmatprep.mubr.msk.f32.mxu1 %vm7865_vm0, %v10608_v43  ;;  %v2082_v10 = vand.u32 4294901760, %v2081_v51 }
 0x1b1   :  { %6784 = vmatpush3.msra.mxu0 %v8512_v58  ;;  %6829 = vmatmul.mubr.msk.f32.vlgmr.msra.gmra.mxu1 %vm1994_vm4, %v10615_v15 }
 0x1b2   :  { %6866 = vmatprep.subr.mxu1 %v10608_v43  ;;  %6785 = vmatprep.subr.mxu0 %v10608_v43 }
 0x1b3   :  { %6867 = vmatpush3.msra.mxu1 %v8333_v57  ;;  %6786 = vmatpush3.msra.mxu0 %v8531_v34 }
 0x1b4   :  { %6868 = vmatprep.subr.mxu1 %v10608_v43  ;;  %6787 = vmatprep.subr.mxu0 %v10608_v43 }
 0x1b5   :  { %6869 = vmatpush3.msra.mxu1 %v8342_v13  ;;  %6788 = vmatpush3.msra.mxu0 %v8551_v42 }
 0x1b6   :  { %6870 = vmatprep.subr.mxu1 %v10608_v43  ;;  %6789 = vmatprep.subr.mxu0 %v10608_v43 }
 0x1b7   :  { %6871 = vmatpush3.msra.mxu1 %v8354_v25  ;;  %6790 = vmatpush3.msra.mxu0 %v8573_v1 }
 0x1b8   :  { %6872 = vmatprep.subr.mxu1 %v10608_v43  ;;  %6791 = vmatprep.subr.mxu0 %v10608_v43 }
 0x1b9   :  { %6873 = vmatpush3.msra.mxu1 %v8363_v24  ;;  %6792 = vmatpush3.msra.mxu0 %v8589_v12 }
 0x1ba   :  { %6793 = vmatprep.mubr.msk.f32.mxu0 %vm7865_vm0, %v10608_v43  ;;  %6874 = vmatprep.subr.mxu1 %v10608_v43 }
 0x1bb   :  { %6794 = vmatmul.mubr.f32.vlgmr.msra.gmra.mxu0 %v2082_v10  ;;  %6831 = vmatprep.subr.mxu0 %v10608_v43 }
 0x1bc   :  { %6875 = vmatpush3.msra.mxu1 %v8383_v49  ;;  %6832 = vmatpush3.msra.mxu0 %v8352_v29 }
 0x1bd   :  { %6876 = vmatprep.subr.mxu1 %v10608_v43  ;;  %6833 = vmatprep.subr.mxu0 %v10608_v43 }
 0x1be   :  { %6877 = vmatpush3.msra.mxu1 %v8398_v50  ;;  %6834 = vmatpush3.msra.mxu0 %v8361_v33 }
 0x1bf   :  { %6878 = vmatprep.subr.mxu1 %v10608_v43  ;;  %6835 = vmatprep.subr.mxu0 %v10608_v43 }
 0x1c0   :  { %6879 = vmatpush3.msra.mxu1 %v8410_v61  ;;  %6836 = vmatpush3.msra.mxu0 %v8376_v0 }
 0x1c1   :  { %6880 = vmatprep.subr.mxu1 %v10608_v43  ;;  %6837 = vmatprep.subr.mxu0 %v10608_v43 }
 0x1c2   :  { %6881 = vmatpush3.msra.mxu1 %v8424_v36  ;;  %6838 = vmatpush3.msra.mxu0 %v8394_v38 }
 0x1c3   :  { %6882 = vmatprep.subr.mxu1 %v10608_v43  ;;  %6839 = vmatprep.subr.mxu0 %v10608_v43 }
 0x1c4   :  { %6883 = vmatpush3.msra.mxu1 %v8452_v7  ;;  %6840 = vmatpush3.msra.mxu0 %v8415_v60 }
 0x1c5   :  { %6884 = vmatprep.subr.mxu1 %v10608_v43  ;;  %6841 = vmatprep.subr.mxu0 %v10608_v43  ;;  %v9220_v28 = vpop.f32.mrf.mxu1 }
 0x1c6   :  { %6885 = vmatpush3.msra.mxu1 %v8474_v41  ;;  %6842 = vmatpush3.msra.mxu0 %v8432_v44 }
 0x1c7   :  { %6886 = vmatprep.subr.mxu1 %v10608_v43  ;;  %6843 = vmatprep.subr.mxu0 %v10608_v43  ;;  %v6480_v51 = vpop.f32.mrf.mxu1 }
 0x1c8   :  { %6887 = vmatpush3.msra.mxu1 %v8493_v46  ;;  %6844 = vmatpush3.msra.mxu0 %v8441_v22 }
 0x1c9   :  { %6888 = vmatprep.subr.mxu1 %v10608_v43  ;;  %6845 = vmatprep.subr.mxu0 %v10608_v43 }
 0x1ca   :  { %6889 = vmatpush3.msra.mxu1 %v8512_v58  ;;  %6846 = vmatpush3.msra.mxu0 %v8464_v17 }
 0x1cb   :  { %6890 = vmatprep.subr.mxu1 %v10608_v43  ;;  %6847 = vmatprep.subr.mxu0 %v10608_v43 }
 0x1cc   :  { %6891 = vmatpush3.msra.mxu1 %v8531_v34  ;;  %6848 = vmatpush3.msra.mxu0 %v8491_v3  ;;  %v10743_v3 = vld [vmem:[#allocation104_spill] sm:$0xff] }
 0x1cd   :  { %6892 = vmatprep.subr.mxu1 %v10608_v43  ;;  %6849 = vmatprep.subr.mxu0 %v10608_v43 }
 0x1ce   :  { %6893 = vmatpush3.msra.mxu1 %v8551_v42  ;;  %6850 = vmatpush3.msra.mxu0 %v8510_v4  ;;  %v10738_v4 = vld [vmem:[#allocation27_spill] sm:$0xff] }
 0x1cf   :  { %6894 = vmatprep.subr.mxu1 %v10608_v43  ;;  %6851 = vmatprep.subr.mxu0 %v10608_v43  ;;  %v9242_v10 = vpop.f32.mrf.mxu0 }
 0x1d0   :  { %6895 = vmatpush3.msra.mxu1 %v8573_v1  ;;  %6852 = vmatpush3.msra.mxu0 %v8529_v55  ;;  %v10737_v55 = vld [vmem:[#allocation95_spill] sm:$0xff] }
 0x1d1   :  { %6896 = vmatprep.subr.mxu1 %v10608_v43  ;;  %6853 = vmatprep.subr.mxu0 %v10608_v43  ;;  %v6445_v51 = vpop.f32.mrf.mxu0 }
 0x1d2   :  { %6897 = vmatpush3.msra.mxu1 %v8589_v12  ;;  %6898 = vmatprep.mubr.msk.f32.mxu1 %vm7865_vm0, %v10608_v43  ;;  %v10723_v51 = vld [vmem:[#allocation96_spill] sm:$0xff] }
 0x1d3   :  { %6854 = vmatpush3.msra.mxu0 %v8549_v26  ;;  %6899 = vmatmul.mubr.f32.vlgmr.msra.gmra.mxu1 %v2080_v54  ;;  %v10724_v54 = vld [vmem:[#allocation99_spill] sm:$0xff]  ;;  %v10732_v26 = vld [vmem:[#allocation80_spill] sm:$0xff] }
 0x1d4   :  { %6936 = vmatprep.subr.mxu1 %v10608_v43  ;;  %6855 = vmatprep.subr.mxu0 %v10608_v43 }
 0x1d5   :  { %6937 = vmatpush3.msra.mxu1 %v8333_v57  ;;  %6856 = vmatpush3.msra.mxu0 %v8571_v52  ;;  %v10725_v52 = vld [vmem:[#allocation102_spill] sm:$0xff] }
 0x1d6   :  { %6938 = vmatprep.subr.mxu1 %v10608_v43  ;;  %6857 = vmatprep.subr.mxu0 %v10608_v43 }
 0x1d7   :  { %6939 = vmatpush3.msra.mxu1 %v8342_v13  ;;  %6858 = vmatpush3.msra.mxu0 %v10723_v51  ;;  %v10731_v51 = vld [vmem:[#allocation78_spill] sm:$0xff] }
 0x1d8   :  { %6940 = vmatprep.subr.mxu1 %v10608_v43  ;;  %6859 = vmatprep.subr.mxu0 %v10608_v43 }
 0x1d9   :  { %6941 = vmatpush3.msra.mxu1 %v8354_v25  ;;  %6860 = vmatpush3.msra.mxu0 %v10724_v54  ;;  %v10726_v54 = vld [vmem:[#allocation69_spill] sm:$0xff] }
 0x1da   :  { %6942 = vmatprep.subr.mxu1 %v10608_v43  ;;  %6861 = vmatprep.subr.mxu0 %v10608_v43 }
 0x1db   :  { %6943 = vmatpush3.msra.mxu1 %v8363_v24  ;;  %6862 = vmatpush3.msra.mxu0 %v10725_v52  ;;  %v10727_v52 = vld [vmem:[#allocation70_spill] sm:$0xff] }
 0x1dc   :  { %6863 = vmatprep.mubr.msk.f32.mxu0 %vm7865_vm0, %v10608_v43  ;;  %6944 = vmatprep.subr.mxu1 %v10608_v43 }
 0x1dd   :  { %6864 = vmatmul.mubr.f32.vlgmr.msra.gmra.mxu0 %v9156_v35  ;;  %6901 = vmatprep.subr.mxu0 %v10608_v43  ;;  %v10728_v35 = vld [vmem:[#allocation71_spill] sm:$0xff] }
 0x1de   :  { %6945 = vmatpush3.msra.mxu1 %v8383_v49  ;;  %6902 = vmatpush3.msra.mxu0 %v10726_v54  ;;  %v10729_v54 = vld [vmem:[#allocation72_spill] sm:$0xff] }
 0x1df   :  { %6946 = vmatprep.subr.mxu1 %v10608_v43  ;;  %6903 = vmatprep.subr.mxu0 %v10608_v43 }
 0x1e0   :  { %6947 = vmatpush3.msra.mxu1 %v8398_v50  ;;  %6904 = vmatpush3.msra.mxu0 %v10727_v52  ;;  %v10730_v52 = vld [vmem:[#allocation75_spill] sm:$0xff] }
 0x1e1   :  { %6948 = vmatprep.subr.mxu1 %v10608_v43  ;;  %6905 = vmatprep.subr.mxu0 %v10608_v43 }
 0x1e2   :  { %6949 = vmatpush3.msra.mxu1 %v8410_v61  ;;  %6906 = vmatpush3.msra.mxu0 %v10728_v35 }
 0x1e3   :  { %6950 = vmatprep.subr.mxu1 %v10608_v43  ;;  %6907 = vmatprep.subr.mxu0 %v10608_v43 }
 0x1e4   :  { %6951 = vmatpush3.msra.mxu1 %v8424_v36  ;;  %6908 = vmatpush3.msra.mxu0 %v10729_v54 }
 0x1e5   :  { %6952 = vmatprep.subr.mxu1 %v10608_v43  ;;  %6909 = vmatprep.subr.mxu0 %v10608_v43 }
 0x1e6   :  { %6953 = vmatpush3.msra.mxu1 %v8452_v7  ;;  %6910 = vmatpush3.msra.mxu0 %v10730_v52  ;;  %v10733_v52 = vld [vmem:[#allocation83_spill] sm:$0xff] }
 0x1e7   :  { %6954 = vmatprep.subr.mxu1 %v10608_v43  ;;  %6911 = vmatprep.subr.mxu0 %v10608_v43  ;;  %v1340_v35 = vpop.f32.mrf.mxu1 }
 0x1e8   :  { %6955 = vmatpush3.msra.mxu1 %v8474_v41  ;;  %6912 = vmatpush3.msra.mxu0 %v10731_v51  ;;  %v10734_v51 = vld [vmem:[#allocation86_spill] sm:$0xff] }
 0x1e9   :  { %6956 = vmatprep.subr.mxu1 %v10608_v43  ;;  %6913 = vmatprep.subr.mxu0 %v10608_v43  ;;  %v6550_v54 = vpop.f32.mrf.mxu1 }
 0x1ea   :  { %6957 = vmatpush3.msra.mxu1 %v8493_v46  ;;  %6914 = vmatpush3.msra.mxu0 %v10732_v26  ;;  %v10735_v54 = vld [vmem:[#allocation89_spill] sm:$0xff] }
 0x1eb   :  { %6958 = vmatprep.subr.mxu1 %v10608_v43  ;;  %6915 = vmatprep.subr.mxu0 %v10608_v43 }
 0x1ec   :  { %6959 = vmatpush3.msra.mxu1 %v8512_v58  ;;  %6916 = vmatpush3.msra.mxu0 %v10733_v52  ;;  %v10736_v52 = vld [vmem:[#allocation92_spill] sm:$0xff] }
 0x1ed   :  { %6960 = vmatprep.subr.mxu1 %v10608_v43  ;;  %6917 = vmatprep.subr.mxu0 %v10608_v43 }
 0x1ee   :  { %6961 = vmatpush3.msra.mxu1 %v8531_v34  ;;  %6918 = vmatpush3.msra.mxu0 %v10734_v51 }
 0x1ef   :  { %6962 = vmatprep.subr.mxu1 %v10608_v43  ;;  %6919 = vmatprep.subr.mxu0 %v10608_v43 }
 0x1f0   :  { %6963 = vmatpush3.msra.mxu1 %v8551_v42  ;;  %6920 = vmatpush3.msra.mxu0 %v10735_v54  ;;  %v7871_v54 = vmov 5  }
 0x1f1   :  { %6964 = vmatprep.subr.mxu1 %v10608_v43  ;;  %6921 = vmatprep.subr.mxu0 %v10608_v43 }
 0x1f2   :  { %6965 = vmatpush3.msra.mxu1 %v8573_v1  ;;  %6922 = vmatpush3.msra.mxu0 %v10736_v52  ;;  %v1253_v26 = vpop.f32.mrf.mxu0  ;;  %v1046_v52 = vadd.f32 %v9242_v10, %v9164_v23  ;;  %v10744_v10 = vld [vmem:[#allocation35_spill] sm:$0xff] }
 0x1f3   :  { %6966 = vmatprep.subr.mxu1 %v10608_v43  ;;  %6923 = vmatprep.subr.mxu0 %v10608_v43 }
 0x1f4   :  { %6967 = vmatpush3.msra.mxu1 %v8589_v12  ;;  %6968 = vmatprep.mubr.msk.f32.mxu1 %vm7865_vm0, %v10608_v43  ;;  %v6515_v51 = vpop.f32.mrf.mxu0  ;;  %v1135_v23 = vadd.f32 %v9220_v28, %v1046_v52  ;;  %v10746_v52 = vld [vmem:[#allocation39_spill] sm:$0xff] }
 0x1f5   :  { %7835 = vset.pattern.permute.xlu0 %v7871_v54  ;;  %6924 = vmatpush3.msra.mxu0 %v10737_v55  ;;  %v10739_v51 = vld [vmem:[#allocation98_spill] sm:$0xff]  ;;  %v10740_v54 = vld [vmem:[#allocation28_spill] sm:$0xff]  ;;  %v10741_v55 = vld [vmem:[#allocation101_spill] sm:$0xff] }
 0x1f6   :  { %6969 = vmatmul.mubr.msk.f32.vlgmr.msra.gmra.mxu1 %vm1994_vm4, %v10615_v15  ;;  %7006 = vmatprep.subr.mxu1 %v10608_v43 }
 0x1f7   :  { %3286 = vperm.xlu0 %7835, %v8846_v31   ;;  %6925 = vmatprep.subr.mxu0 %v10608_v43  ;;  %v10742_v31 = vld [vmem:[#allocation30_spill] sm:$0xff] }
 0x1f8   :  { %7007 = vmatpush3.msra.mxu1 %v10738_v4  ;;  %6926 = vmatpush3.msra.mxu0 %v10739_v51  ;;  %v10745_v51 = vld [vmem:[#allocation106_spill] sm:$0xff] }
 0x1f9   :  { %7008 = vmatprep.subr.mxu1 %v10608_v43  ;;  %6927 = vmatprep.subr.mxu0 %v10608_v43 }
 0x1fa   :  { %7009 = vmatpush3.msra.mxu1 %v10740_v54  ;;  %6928 = vmatpush3.msra.mxu0 %v10741_v55  ;;  %v1254_v54 = vadd.f32 %v1253_v26, %v1135_v23  ;;  %v10747_v26 = vld [vmem:[#allocation43_spill] sm:$0xff] }
 0x1fb   :  { %7010 = vmatprep.subr.mxu1 %v10608_v43  ;;  %6929 = vmatprep.subr.mxu0 %v10608_v43 }
 0x1fc   :  { %7011 = vmatpush3.msra.mxu1 %v10742_v31  ;;  %6930 = vmatpush3.msra.mxu0 %v10743_v3  ;;  %v1341_v28 = vadd.f32 %v1340_v35, %v1254_v54  ;;  %v10749_v35 = vld [vmem:[#allocation51_spill] sm:$0xff] }
 0x1fd   :  { %7012 = vmatprep.subr.mxu1 %v10608_v43  ;;  %6931 = vmatprep.subr.mxu0 %v10608_v43  ;;  %v10750_v54 = vld [vmem:[#allocation55_spill] sm:$0xff] }
 0x1fe   :  { %7013 = vmatpush3.msra.mxu1 %v10744_v10  ;;  %6932 = vmatpush3.msra.mxu0 %v10745_v51  ;;  %v10756_v51 = vld [vmem:[#allocation67_spill] sm:$0xff] }
 0x1ff   :  { %6933 = vmatprep.mubr.msk.f32.mxu0 %vm7865_vm0, %v10608_v43  ;;  %7014 = vmatprep.subr.mxu1 %v10608_v43 }
 0x200   :  { %6934 = vmatmul.mubr.msk.f32.vlgmr.msra.gmra.mxu0 %vm1994_vm4, %v10615_v15  ;;  %6971 = vmatprep.subr.mxu0 %v10608_v43 }
 0x201   :  { %7015 = vmatpush3.msra.mxu1 %v10746_v52  ;;  %6972 = vmatpush3.msra.mxu0 %v10649_v14 }
 0x202   :  { %7016 = vmatprep.subr.mxu1 %v10608_v43  ;;  %6973 = vmatprep.subr.mxu0 %v10608_v43 }
 0x203   :  { %7017 = vmatpush3.msra.mxu1 %v10747_v26  ;;  %6974 = vmatpush3.msra.mxu0 %v10651_v48  ;;  %v10752_v26 = vld [vmem:[#allocation61_spill] sm:$0xff] }
 0x204   :  { %7018 = vmatprep.subr.mxu1 %v10608_v43  ;;  %6975 = vmatprep.subr.mxu0 %v10608_v43 }
 0x205   :  { %7019 = vmatpush3.msra.mxu1 %v10748_v39  ;;  %6976 = vmatpush3.msra.mxu0 %v10653_v53 }
 0x206   :  { %7020 = vmatprep.subr.mxu1 %v10608_v43  ;;  %5227 = vrot.lane.b32.xlu0 %v1341_v28, %s7872_s23  ;;  %v10751_v28 = vld [vmem:[#allocation58_spill] sm:$0xff] }
 0x207   :  { %6977 = vmatprep.subr.mxu0 %v10608_v43  ;;  %7021 = vmatpush3.msra.mxu1 %v10749_v35 }
 0x208   :  { %6978 = vmatpush3.msra.mxu0 %v10655_v2  ;;  %7022 = vmatprep.subr.mxu1 %v10608_v43 }
 0x209   :  { %6979 = vmatprep.subr.mxu0 %v10608_v43  ;;  %7023 = vmatpush3.msra.mxu1 %v10750_v54 }
 0x20a   :  { %6980 = vmatpush3.msra.mxu0 %v10657_v45  ;;  %7024 = vmatprep.subr.mxu1 %v10608_v43  ;;  %v1588_v23 = vpop.f32.mrf.mxu1 }
 0x20b   :  { %6981 = vmatprep.subr.mxu0 %v10608_v43  ;;  %7025 = vmatpush3.msra.mxu1 %v10751_v28  ;;  %v10753_v28 = vld [vmem:[#allocation63_spill] sm:$0xff] }
 0x20c   :  { %6982 = vmatpush3.msra.mxu0 %v10659_v40  ;;  %7026 = vmatprep.subr.mxu1 %v10608_v43  ;;  %v9378_v35 = vpop.permute.xlu1 %2639  ;;  %v6620_v39 = vpop.f32.mrf.mxu1 }
 0x20d   :  { %6983 = vmatprep.subr.mxu0 %v10608_v43  ;;  %7027 = vmatpush3.msra.mxu1 %v10752_v26  ;;  %vm2641_vm5 = vcmp.eq.s32.totalorder %v8220_v32, %v9378_v35  ;;  %v10754_v26 = vld [vmem:[#allocation65_spill] sm:$0xff]  ;;  %v10792_v35 = vld [vmem:[#allocation91_spill] sm:$0xff] }
 0x20e   :  { %6984 = vmatpush3.msra.mxu0 %v10661_v8  ;;  %7028 = vmatprep.subr.mxu1 %v10608_v43  ;;  %v5299_v39 = vsel %vm2641_vm5, 1.0, %v10608_v43 }
 0x20f   :  { %6985 = vmatprep.subr.mxu0 %v10608_v43  ;;  %7029 = vmatpush3.msra.mxu1 %v10753_v28  ;;  %v9398_v54 = vsub.f32 %v5299_v39, %v5299_v39  ;;  %v10755_v28 = vld [vmem:[#allocation66_spill] sm:$0xff] }
 0x210   :  { %6986 = vmatpush3.msra.mxu0 %v10663_v20  ;;  %7030 = vmatprep.subr.mxu1 %v10608_v43 }
 0x211   :  { %6987 = vmatprep.subr.mxu0 %v10608_v43  ;;  %7031 = vmatpush3.msra.mxu1 %v10754_v26  ;;  %v10535_v10 = vand.u32 4294901760, %v9398_v54 }
 0x212   :  { %6988 = vmatpush3.msra.mxu0 %v10665_v47  ;;  %7032 = vmatprep.subr.mxu1 %v10608_v43 }
 0x213   :  { %6989 = vmatprep.subr.mxu0 %v10608_v43  ;;  %7033 = vmatpush3.msra.mxu1 %v10755_v28  ;;  %v10757_v28 = vld [vmem:[#allocation68_spill] sm:$0xff] }
 0x214   :  { %6990 = vmatpush3.msra.mxu0 %v10667_v62  ;;  %7034 = vmatprep.subr.mxu1 %v10608_v43  ;;  %v1437_v52 = vpop.f32.mrf.mxu0 }
 0x215   :  { %6991 = vmatprep.subr.mxu0 %v10608_v43  ;;  %7035 = vmatpush3.msra.mxu1 %v10756_v51  ;;  %v9406_v26 = vadd.f32 %v1588_v23, %v1437_v52  ;;  %v2728_v52 = vsub.f32 %v9398_v54, %v10535_v10  ;;  %v10761_v10 = vld [vmem:[#allocation15_spill] sm:$0xff] }
 0x216   :  { %6992 = vmatpush3.msra.mxu0 %v10669_v27  ;;  %7036 = vmatprep.subr.mxu1 %v10608_v43  ;;  %v6585_v39 = vpop.f32.mrf.mxu0 }
 0x217   :  { %6993 = vmatprep.subr.mxu0 %v10608_v43  ;;  %7037 = vmatpush3.msra.mxu1 %v10757_v28  ;;  %v2729_v23 = vand.u32 4294901760, %v2728_v52  ;;  %v10758_v39 = vld [vmem:[#allocation10_spill] sm:$0xff]  ;;  %v10759_v52 = vld [vmem:[#allocation11_spill] sm:$0xff] }
 0x218   :  { %7038 = vmatprep.mubr.msk.f32.mxu1 %vm7865_vm0, %v10608_v43  ;;  %6994 = vmatpush3.msra.mxu0 %v10671_v63  ;;  %v10764_v28 = vld [vmem:[#allocation23_spill] sm:$0xff] }
 0x219   :  { %7039 = vmatmul.mubr.msk.f32.vlgmr.msra.gmra.mxu1 %vm2641_vm5, %v10615_v15  ;;  %7076 = vmatprep.subr.mxu1 %v10608_v43 }
 0x21a   :  { %6995 = vmatprep.subr.mxu0 %v10608_v43  ;;  %7077 = vmatpush3.msra.mxu1 %v10649_v14 }
 0x21b   :  { %6996 = vmatpush3.msra.mxu0 %v10672_v37  ;;  %7078 = vmatprep.subr.mxu1 %v10608_v43 }
 0x21c   :  { %6997 = vmatprep.subr.mxu0 %v10608_v43  ;;  %7079 = vmatpush3.msra.mxu1 %v10651_v48 }
 0x21d   :  { %6998 = vmatpush3.msra.mxu0 %v10674_v18  ;;  %7080 = vmatprep.subr.mxu1 %v10608_v43 }
 0x21e   :  { %6999 = vmatprep.subr.mxu0 %v10608_v43  ;;  %7081 = vmatpush3.msra.mxu1 %v10653_v53 }
 0x21f   :  { %7000 = vmatpush3.msra.mxu0 %v10675_v16  ;;  %7082 = vmatprep.subr.mxu1 %v10608_v43 }
 0x220   :  { %7001 = vmatprep.subr.mxu0 %v10608_v43  ;;  %7083 = vmatpush3.msra.mxu1 %v10655_v2 }
 0x221   :  { %7002 = vmatpush3.msra.mxu0 %v10676_v19  ;;  %7003 = vmatprep.mubr.msk.f32.mxu0 %vm7865_vm0, %v10608_v43 }
 0x222   :  { %7084 = vmatprep.subr.mxu1 %v10608_v43  ;;  %7004 = vmatmul.mubr.f32.vlgmr.msra.gmra.mxu0 %v2729_v23  ;;  %v10760_v23 = vld [vmem:[#allocation14_spill] sm:$0xff] }
 0x223   :  { %7041 = vmatprep.subr.mxu0 %v10608_v43  ;;  %7085 = vmatpush3.msra.mxu1 %v10657_v45 }
 0x224   :  { %7042 = vmatpush3.msra.mxu0 %v10758_v39  ;;  %7086 = vmatprep.subr.mxu1 %v10608_v43 }
 0x225   :  { %7043 = vmatprep.subr.mxu0 %v10608_v43  ;;  %7087 = vmatpush3.msra.mxu1 %v10659_v40 }
 0x226   :  { %7044 = vmatpush3.msra.mxu0 %v10759_v52  ;;  %7088 = vmatprep.subr.mxu1 %v10608_v43  ;;  %v10762_v52 = vld [vmem:[#allocation16_spill] sm:$0xff] }
 0x227   :  { %7045 = vmatprep.subr.mxu0 %v10608_v43  ;;  %7089 = vmatpush3.msra.mxu1 %v10661_v8 }
 0x228   :  { %7046 = vmatpush3.msra.mxu0 %v10760_v23  ;;  %7090 = vmatprep.subr.mxu1 %v10608_v43  ;;  %v10763_v23 = vld [vmem:[#allocation20_spill] sm:$0xff] }
 0x229   :  { %7047 = vmatprep.subr.mxu0 %v10608_v43  ;;  %7091 = vmatpush3.msra.mxu1 %v10663_v20 }
 0x22a   :  { %7048 = vmatpush3.msra.mxu0 %v10761_v10  ;;  %7092 = vmatprep.subr.mxu1 %v10608_v43 }
 0x22b   :  { %7049 = vmatprep.subr.mxu0 %v10608_v43  ;;  %7093 = vmatpush3.msra.mxu1 %v10665_v47 }
 0x22c   :  { %7050 = vmatpush3.msra.mxu0 %v10762_v52  ;;  %7094 = vmatprep.subr.mxu1 %v10608_v43  ;;  %v9462_v39 = vpop.f32.mrf.mxu1  ;;  %v10765_v52 = vld [vmem:[#allocation26_spill] sm:$0xff] }
 0x22d   :  { %7051 = vmatprep.subr.mxu0 %v10608_v43  ;;  %7095 = vmatpush3.msra.mxu1 %v10667_v62 }
 0x22e   :  { %7052 = vmatpush3.msra.mxu0 %v10763_v23  ;;  %7096 = vmatprep.subr.mxu1 %v10608_v43  ;;  %v6690_v10 = vpop.f32.mrf.mxu1 }
 0x22f   :  { %7053 = vmatprep.subr.mxu0 %v10608_v43  ;;  %7097 = vmatpush3.msra.mxu1 %v10669_v27  ;;  %v10766_v10 = vld [vmem:[#allocation36_spill] sm:$0xff] }
 0x230   :  { %7054 = vmatpush3.msra.mxu0 %v10764_v28  ;;  %7098 = vmatprep.subr.mxu1 %v10608_v43  ;;  %v10767_v28 = vld [vmem:[#allocation37_spill] sm:$0xff] }
 0x231   :  { %7055 = vmatprep.subr.mxu0 %v10608_v43  ;;  %7099 = vmatpush3.msra.mxu1 %v10671_v63 }
 0x232   :  { %7056 = vmatpush3.msra.mxu0 %v10765_v52  ;;  %7100 = vmatprep.subr.mxu1 %v10608_v43 }
 0x233   :  { %7057 = vmatprep.subr.mxu0 %v10608_v43  ;;  %7101 = vmatpush3.msra.mxu1 %v10672_v37 }
 0x234   :  { %7058 = vmatpush3.msra.mxu0 %v10766_v10  ;;  %7102 = vmatprep.subr.mxu1 %v10608_v43 }
 0x235   :  { %7059 = vmatprep.subr.mxu0 %v10608_v43  ;;  %7103 = vmatpush3.msra.mxu1 %v10674_v18 }
 0x236   :  { %7060 = vmatpush3.msra.mxu0 %v10767_v28  ;;  %7104 = vmatprep.subr.mxu1 %v10608_v43  ;;  %v9484_v23 = vpop.f32.mrf.mxu0  ;;  %v10768_v28 = vand.u32 4294901760, %v9398_v54 }
 0x237   :  { %7061 = vmatprep.subr.mxu0 %v10608_v43  ;;  %7105 = vmatpush3.msra.mxu1 %v10675_v16 }
 0x238   :  { %7062 = vmatpush3.msra.mxu0 %v10687_v11  ;;  %7106 = vmatprep.subr.mxu1 %v10608_v43  ;;  %v6655_v10 = vpop.f32.mrf.mxu0  ;;  %v10769_v11 = vld [vmem:[#allocation49_spill] sm:$0xff] }
 0x239   :  { %7063 = vmatprep.subr.mxu0 %v10608_v43  ;;  %7107 = vmatpush3.msra.mxu1 %v10676_v19  ;;  %v10770_v10 = vld [vmem:[#allocation53_spill] sm:$0xff] }
 0x23a   :  { %7108 = vmatprep.mubr.msk.f32.mxu1 %vm7865_vm0, %v10608_v43  ;;  %7064 = vmatpush3.msra.mxu0 %v10688_v6  ;;  %v10779_v6 = vld [vmem:[#allocation29_spill] sm:$0xff] }
 0x23b   :  { %7109 = vmatmul.mubr.f32.vlgmr.msra.gmra.mxu1 %v10768_v28  ;;  %7146 = vmatprep.subr.mxu1 %v10608_v43  ;;  %v10771_v28 = vld [vmem:[#allocation57_spill] sm:$0xff] }
 0x23c   :  { %7065 = vmatprep.subr.mxu0 %v10608_v43  ;;  %7147 = vmatpush3.msra.mxu1 %v10649_v14 }
 0x23d   :  { %7066 = vmatpush3.msra.mxu0 %v10769_v11  ;;  %7148 = vmatprep.subr.mxu1 %v10608_v43  ;;  %v10772_v11 = vld [vmem:[#allocation60_spill] sm:$0xff] }
 0x23e   :  { %7067 = vmatprep.subr.mxu0 %v10608_v43  ;;  %7149 = vmatpush3.msra.mxu1 %v10651_v48 }
 0x23f   :  { %7068 = vmatpush3.msra.mxu0 %v10770_v10  ;;  %7150 = vmatprep.subr.mxu1 %v10608_v43 }
 0x240   :  { %7069 = vmatprep.subr.mxu0 %v10608_v43  ;;  %7151 = vmatpush3.msra.mxu1 %v10653_v53 }
 0x241   :  { %7070 = vmatpush3.msra.mxu0 %v10771_v28  ;;  %7152 = vmatprep.subr.mxu1 %v10608_v43  ;;  %v10773_v28 = vld [vmem:[#allocation18_spill] sm:$0xff] }
 0x242   :  { %7071 = vmatprep.subr.mxu0 %v10608_v43  ;;  %7153 = vmatpush3.msra.mxu1 %v10655_v2 }
 0x243   :  { %7072 = vmatpush3.msra.mxu0 %v10772_v11  ;;  %7073 = vmatprep.mubr.msk.f32.mxu0 %vm7865_vm0, %v10608_v43  ;;  %v10774_v11 = vld [vmem:[#allocation19_spill] sm:$0xff] }
 0x244   :  { %7154 = vmatprep.subr.mxu1 %v10608_v43  ;;  %7074 = vmatmul.mubr.f32.vlgmr.msra.gmra.mxu0 %v9398_v54  ;;  %v10775_v54 = vld [vmem:[#allocation21_spill] sm:$0xff] }
 0x245   :  { %7111 = vmatprep.subr.mxu0 %v10608_v43  ;;  %7155 = vmatpush3.msra.mxu1 %v10657_v45 }
 0x246   :  { %7112 = vmatpush3.msra.mxu0 %v10773_v28  ;;  %7156 = vmatprep.subr.mxu1 %v10608_v43  ;;  %v10776_v28 = vld [vmem:[#allocation22_spill] sm:$0xff] }
 0x247   :  { %7113 = vmatprep.subr.mxu0 %v10608_v43  ;;  %7157 = vmatpush3.msra.mxu1 %v10659_v40 }
 0x248   :  { %7114 = vmatpush3.msra.mxu0 %v10774_v11  ;;  %7158 = vmatprep.subr.mxu1 %v10608_v43  ;;  %v10777_v11 = vld [vmem:[#allocation24_spill] sm:$0xff] }
 0x249   :  { %7115 = vmatprep.subr.mxu0 %v10608_v43  ;;  %7159 = vmatpush3.msra.mxu1 %v10661_v8 }
 0x24a   :  { %7116 = vmatpush3.msra.mxu0 %v10775_v54  ;;  %7160 = vmatprep.subr.mxu1 %v10608_v43  ;;  %v10778_v54 = vld [vmem:[#allocation25_spill] sm:$0xff] }
 0x24b   :  { %7117 = vmatprep.subr.mxu0 %v10608_v43  ;;  %7161 = vmatpush3.msra.mxu1 %v10663_v20 }
 0x24c   :  { %7118 = vmatpush3.msra.mxu0 %v10776_v28  ;;  %7162 = vmatprep.subr.mxu1 %v10608_v43 }
 0x24d   :  { %7119 = vmatprep.subr.mxu0 %v10608_v43  ;;  %7163 = vmatpush3.msra.mxu1 %v10665_v47 }
 0x24e   :  { %7120 = vmatpush3.msra.mxu0 %v10777_v11  ;;  %7164 = vmatprep.subr.mxu1 %v10608_v43  ;;  %v9537_v10 = vpop.f32.mrf.mxu1  ;;  %v10780_v11 = vld [vmem:[#allocation33_spill] sm:$0xff] }
 0x24f   :  { %7121 = vmatprep.subr.mxu0 %v10608_v43  ;;  %7165 = vmatpush3.msra.mxu1 %v10667_v62 }
 0x250   :  { %7122 = vmatpush3.msra.mxu0 %v10778_v54  ;;  %7166 = vmatprep.subr.mxu1 %v10608_v43  ;;  %v6760_v28 = vpop.f32.mrf.mxu1  ;;  %v7873_v54 = vmov 6  }
 0x251   :  { %7123 = vmatprep.subr.mxu0 %v10608_v43  ;;  %7167 = vmatpush3.msra.mxu1 %v10669_v27  ;;  %v10781_v28 = vld [vmem:[#allocation40_spill] sm:$0xff] }
 0x252   :  { %7124 = vmatpush3.msra.mxu0 %v10779_v6  ;;  %7168 = vmatprep.subr.mxu1 %v10608_v43  ;;  %v10782_v6 = vld [vmem:[#allocation44_spill] sm:$0xff] }
 0x253   :  { %7125 = vmatprep.subr.mxu0 %v10608_v43  ;;  %7169 = vmatpush3.msra.mxu1 %v10671_v63 }
 0x254   :  { %7126 = vmatpush3.msra.mxu0 %v10780_v11  ;;  %7170 = vmatprep.subr.mxu1 %v10608_v43  ;;  %v7840_v11 = vld [vmem:[%s10325_s0] sm:$0xff]  ;;  %s7875_s0 = smov 32  }
 0x255   :  { %7127 = vmatprep.subr.mxu0 %v10608_v43  ;;  %7171 = vmatpush3.msra.mxu1 %v10672_v37 }
 0x256   :  { %7128 = vmatpush3.msra.mxu0 %v10781_v28  ;;  %7172 = vmatprep.subr.mxu1 %v10608_v43  ;;  %v10783_v28 = vld [vmem:[#allocation48_spill] sm:$0xff] }
 0x257   :  { %7836 = vset.pattern.permute.xlu1 %v7873_v54  ;;  %7129 = vmatprep.subr.mxu0 %v10608_v43 }
 0x258   :  { %7173 = vmatpush3.msra.mxu1 %v10674_v18  ;;  %3933 = vperm.xlu1 %7836, %v7840_v11  }
 0x259   :  { %7130 = vmatpush3.msra.mxu0 %v10782_v6  ;;  %7174 = vmatprep.subr.mxu1 %v10608_v43  ;;  %v1900_v52 = vpop.f32.mrf.mxu0  ;;  %v10538_v6 = vmov 7  }
 0x25a   :  { %7131 = vmatprep.subr.mxu0 %v10608_v43  ;;  %7175 = vmatpush3.msra.mxu1 %v10675_v16 }
 0x25b   :  { %7132 = vmatpush3.msra.mxu0 %v10783_v28  ;;  %7176 = vmatprep.subr.mxu1 %v10608_v43  ;;  %v6725_v54 = vpop.f32.mrf.mxu0  ;;  %v10784_v28 = vld [vmem:[#allocation56_spill] sm:$0xff] }
 0x25c   :  { %7133 = vmatprep.subr.mxu0 %v10608_v43  ;;  %7177 = vmatpush3.msra.mxu1 %v10676_v19  ;;  %v1693_v54 = vadd.f32 %v9484_v23, %v9406_v26  ;;  %v10788_v23 = vld [vmem:[#allocation82_spill] sm:$0xff] }
 0x25d   :  { %7178 = vmatprep.mubr.msk.f32.mxu1 %vm7865_vm0, %v10608_v43  ;;  %7837 = vset.pattern.permute.xlu1 %v10538_v6  ;;  %v10785_v6 = vld [vmem:[#allocation59_spill] sm:$0xff] }
 0x25e   :  { %7134 = vmatpush3.msra.mxu0 %v10705_v21  ;;  %7179 = vmatmul.mubr.msk.f32.vlgmr.msra.gmra.mxu1 %vm2641_vm5, %v10615_v15  ;;  %v1782_v26 = vadd.f32 %v9462_v39, %v1693_v54  ;;  %v10790_v39 = vld [vmem:[#allocation85_spill] sm:$0xff] }
 0x25f   :  { %7216 = vmatprep.subr.mxu1 %v10608_v43  ;;  %4580 = vperm.xlu1 %7837, %v7840_v11   ;;  %v10786_v11 = vld [vmem:[#allocation79_spill] sm:$0xff] }
 0x260   :  { %7135 = vmatprep.subr.mxu0 %v10608_v43  ;;  %7217 = vmatpush3.msra.mxu1 %v10707_v56  ;;  %v10787_v56 = vld [vmem:[#allocation62_spill] sm:$0xff] }
 0x261   :  { %7136 = vmatpush3.msra.mxu0 %v10784_v28  ;;  %7218 = vmatprep.subr.mxu1 %v10608_v43  ;;  %v10789_v28 = vld [vmem:[#allocation64_spill] sm:$0xff] }
 0x262   :  { %7137 = vmatprep.subr.mxu0 %v10608_v43  ;;  %7219 = vmatpush3.msra.mxu1 %v10709_v9 }
 0x263   :  { %7138 = vmatpush3.msra.mxu0 %v10785_v6  ;;  %7220 = vmatprep.subr.mxu1 %v10608_v43  ;;  %v1901_v6 = vadd.f32 %v1900_v52, %v1782_v26  ;;  %v10791_v52 = vld [vmem:[#allocation88_spill] sm:$0xff]  ;;  %v10794_v26 = vld [vmem:[#allocation97_spill] sm:$0xff] }
 0x264   :  { %7139 = vmatprep.subr.mxu0 %v10608_v43  ;;  %7221 = vmatpush3.msra.mxu1 %v10786_v11 }
 0x265   :  { %7140 = vmatpush3.msra.mxu0 %v10787_v56  ;;  %7222 = vmatprep.subr.mxu1 %v10608_v43  ;;  %v1988_v54 = vadd.f32 %v9537_v10, %v1901_v6  ;;  %v10793_v6 = vld [vmem:[#allocation94_spill] sm:$0xff] }
 0x266   :  { %7141 = vmatprep.subr.mxu0 %v10608_v43  ;;  %7223 = vmatpush3.msra.mxu1 %v10788_v23 }
 0x267   :  { %7142 = vmatpush3.msra.mxu0 %v10789_v28  ;;  %7143 = vmatprep.mubr.msk.f32.mxu0 %vm7865_vm0, %v10608_v43 }
 0x268   :  { %7224 = vmatprep.subr.mxu1 %v10608_v43  ;;  %7144 = vmatmul.mubr.msk.f32.vlgmr.msra.gmra.mxu0 %vm2641_vm5, %v10615_v15 }
 0x269   :  { %7181 = vmatprep.subr.mxu0 %v10608_v43  ;;  %7225 = vmatpush3.msra.mxu1 %v10790_v39 }
 0x26a   :  { %7182 = vmatpush3.msra.mxu0 %v8333_v57  ;;  %7226 = vmatprep.subr.mxu1 %v10608_v43 }
 0x26b   :  { %7183 = vmatprep.subr.mxu0 %v10608_v43  ;;  %7227 = vmatpush3.msra.mxu1 %v10791_v52  ;;  %v10795_v52 = vld [vmem:[#allocation100_spill] sm:$0xff] }
 0x26c   :  { %7184 = vmatpush3.msra.mxu0 %v8342_v13  ;;  %7228 = vmatprep.subr.mxu1 %v10608_v43 }
 0x26d   :  { %7185 = vmatprep.subr.mxu0 %v10608_v43  ;;  %7229 = vmatpush3.msra.mxu1 %v10792_v35 }
 0x26e   :  { %7186 = vmatpush3.msra.mxu0 %v8354_v25  ;;  %7230 = vmatprep.subr.mxu1 %v10608_v43 }
 0x26f   :  { %5231 = vrot.lane.b32.xlu1 %v1988_v54, %s7875_s0  ;;  %7187 = vmatprep.subr.mxu0 %v10608_v43 }
 0x270   :  { %7231 = vmatpush3.msra.mxu1 %v10793_v6  ;;  %7188 = vmatpush3.msra.mxu0 %v8363_v24 }
 0x271   :  { %7232 = vmatprep.subr.mxu1 %v10608_v43  ;;  %7189 = vmatprep.subr.mxu0 %v10608_v43  ;;  %v2235_v10 = vpop.f32.mrf.mxu1 }
 0x272   :  { %7233 = vmatpush3.msra.mxu1 %v10794_v26  ;;  %7190 = vmatpush3.msra.mxu0 %v8383_v49  ;;  %v9622_v35 = vpop.permute.xlu0 %3286  ;;  %v10796_v26 = vld [vmem:[#allocation103_spill] sm:$0xff] }
 0x273   :  { %7234 = vmatprep.subr.mxu1 %v10608_v43  ;;  %7191 = vmatprep.subr.mxu0 %v10608_v43  ;;  %v6830_v54 = vpop.f32.mrf.mxu1  ;;  %vm3288_vm6 = vcmp.eq.s32.totalorder %v8220_v32, %v9622_v35  ;;  %v10826_v35 = vld [vmem:[#allocation47_spill] sm:$0xff] }
 0x274   :  { %7235 = vmatpush3.msra.mxu1 %v10795_v52  ;;  %7192 = vmatpush3.msra.mxu0 %v8398_v50  ;;  %v10797_v54 = vld [vmem:[#allocation105_spill] sm:$0xff]  ;;  %v5303_v52 = vsel %vm3288_vm6, 1.0, %v10608_v43 }
 0x275   :  { %7236 = vmatprep.subr.mxu1 %v10608_v43  ;;  %7193 = vmatprep.subr.mxu0 %v10608_v43 }
 0x276   :  { %7237 = vmatpush3.msra.mxu1 %v10796_v26  ;;  %7194 = vmatpush3.msra.mxu0 %v8410_v61  ;;  %v10798_v26 = vld [vmem:[#allocation107_spill] sm:$0xff] }
 0x277   :  { %7238 = vmatprep.subr.mxu1 %v10608_v43  ;;  %7195 = vmatprep.subr.mxu0 %v10608_v43 }
 0x278   :  { %7239 = vmatpush3.msra.mxu1 %v10797_v54  ;;  %7196 = vmatpush3.msra.mxu0 %v8424_v36  ;;  %v9648_v54 = vsub.f32 %v5303_v52, %v5303_v52 }
 0x279   :  { %7240 = vmatprep.subr.mxu1 %v10608_v43  ;;  %7197 = vmatprep.subr.mxu0 %v10608_v43 }
 0x27a   :  { %7241 = vmatpush3.msra.mxu1 %v10798_v26  ;;  %7198 = vmatpush3.msra.mxu0 %v8452_v7  ;;  %v10540_v28 = vand.u32 4294901760, %v9648_v54 }
 0x27b   :  { %7242 = vmatprep.subr.mxu1 %v10608_v43  ;;  %7199 = vmatprep.subr.mxu0 %v10608_v43  ;;  %v2084_v6 = vpop.f32.mrf.mxu0 }
 0x27c   :  { %7243 = vmatpush3.msra.mxu1 %v8657_v5  ;;  %7200 = vmatpush3.msra.mxu0 %v8474_v41  ;;  %v9652_v39 = vadd.f32 %v2235_v10, %v2084_v6  ;;  %v3375_v52 = vsub.f32 %v9648_v54, %v10540_v28 }
 0x27d   :  { %7244 = vmatprep.subr.mxu1 %v10608_v43  ;;  %7201 = vmatprep.subr.mxu0 %v10608_v43  ;;  %v6795_v26 = vpop.f32.mrf.mxu0 }
 0x27e   :  { %7245 = vmatpush3.msra.mxu1 %v8669_v30  ;;  %7202 = vmatpush3.msra.mxu0 %v8493_v46  ;;  %v3376_v6 = vand.u32 4294901760, %v3375_v52  ;;  %v10799_v52 = vld [vmem:[#allocation81_spill] sm:$0xff] }
 0x27f   :  { %7246 = vmatprep.subr.mxu1 %v10608_v43  ;;  %7203 = vmatprep.subr.mxu0 %v10608_v43 }
 0x280   :  { %7247 = vmatpush3.msra.mxu1 %v8677_v59  ;;  %7248 = vmatprep.mubr.msk.f32.mxu1 %vm7865_vm0, %v10608_v43 }
 0x281   :  { %7204 = vmatpush3.msra.mxu0 %v8512_v58  ;;  %7249 = vmatmul.mubr.msk.f32.vlgmr.msra.gmra.mxu1 %vm3288_vm6, %v10615_v15 }
 0x282   :  { %7286 = vmatprep.subr.mxu1 %v10608_v43  ;;  %7205 = vmatprep.subr.mxu0 %v10608_v43 }
 0x283   :  { %7287 = vmatpush3.msra.mxu1 %v8333_v57  ;;  %7206 = vmatpush3.msra.mxu0 %v8531_v34 }
 0x284   :  { %7288 = vmatprep.subr.mxu1 %v10608_v43  ;;  %7207 = vmatprep.subr.mxu0 %v10608_v43 }
 0x285   :  { %7289 = vmatpush3.msra.mxu1 %v8342_v13  ;;  %7208 = vmatpush3.msra.mxu0 %v8551_v42 }
 0x286   :  { %7290 = vmatprep.subr.mxu1 %v10608_v43  ;;  %7209 = vmatprep.subr.mxu0 %v10608_v43 }
 0x287   :  { %7291 = vmatpush3.msra.mxu1 %v8354_v25  ;;  %7210 = vmatpush3.msra.mxu0 %v8573_v1 }
 0x288   :  { %7292 = vmatprep.subr.mxu1 %v10608_v43  ;;  %7211 = vmatprep.subr.mxu0 %v10608_v43 }
 0x289   :  { %7293 = vmatpush3.msra.mxu1 %v8363_v24  ;;  %7212 = vmatpush3.msra.mxu0 %v8589_v12 }
 0x28a   :  { %7213 = vmatprep.mubr.msk.f32.mxu0 %vm7865_vm0, %v10608_v43  ;;  %7294 = vmatprep.subr.mxu1 %v10608_v43 }
 0x28b   :  { %7214 = vmatmul.mubr.f32.vlgmr.msra.gmra.mxu0 %v3376_v6  ;;  %7251 = vmatprep.subr.mxu0 %v10608_v43 }
 0x28c   :  { %7295 = vmatpush3.msra.mxu1 %v8383_v49  ;;  %7252 = vmatpush3.msra.mxu0 %v8352_v29 }
 0x28d   :  { %7296 = vmatprep.subr.mxu1 %v10608_v43  ;;  %7253 = vmatprep.subr.mxu0 %v10608_v43 }
 0x28e   :  { %7297 = vmatpush3.msra.mxu1 %v8398_v50  ;;  %7254 = vmatpush3.msra.mxu0 %v8361_v33 }
 0x28f   :  { %7298 = vmatprep.subr.mxu1 %v10608_v43  ;;  %7255 = vmatprep.subr.mxu0 %v10608_v43 }
 0x290   :  { %7299 = vmatpush3.msra.mxu1 %v8410_v61  ;;  %7256 = vmatpush3.msra.mxu0 %v8376_v0 }
 0x291   :  { %7300 = vmatprep.subr.mxu1 %v10608_v43  ;;  %7257 = vmatprep.subr.mxu0 %v10608_v43 }
 0x292   :  { %7301 = vmatpush3.msra.mxu1 %v8424_v36  ;;  %7258 = vmatpush3.msra.mxu0 %v8394_v38 }
 0x293   :  { %7302 = vmatprep.subr.mxu1 %v10608_v43  ;;  %7259 = vmatprep.subr.mxu0 %v10608_v43  ;;  %v9708_v10 = vpop.f32.mrf.mxu1 }
 0x294   :  { %7303 = vmatpush3.msra.mxu1 %v8452_v7  ;;  %7260 = vmatpush3.msra.mxu0 %v8415_v60 }
 0x295   :  { %7304 = vmatprep.subr.mxu1 %v10608_v43  ;;  %7261 = vmatprep.subr.mxu0 %v10608_v43  ;;  %v6900_v26 = vpop.f32.mrf.mxu1 }
 0x296   :  { %7305 = vmatpush3.msra.mxu1 %v8474_v41  ;;  %7262 = vmatpush3.msra.mxu0 %v8432_v44  ;;  %v10800_v26 = vld [vmem:[#allocation84_spill] sm:$0xff] }
 0x297   :  { %7306 = vmatprep.subr.mxu1 %v10608_v43  ;;  %7263 = vmatprep.subr.mxu0 %v10608_v43 }
 0x298   :  { %7307 = vmatpush3.msra.mxu1 %v8493_v46  ;;  %7264 = vmatpush3.msra.mxu0 %v8441_v22 }
 0x299   :  { %7308 = vmatprep.subr.mxu1 %v10608_v43  ;;  %7265 = vmatprep.subr.mxu0 %v10608_v43 }
 0x29a   :  { %7309 = vmatpush3.msra.mxu1 %v8512_v58  ;;  %7266 = vmatpush3.msra.mxu0 %v8464_v17  ;;  %v10801_v17 = vld [vmem:[#allocation87_spill] sm:$0xff] }
 0x29b   :  { %7310 = vmatprep.subr.mxu1 %v10608_v43  ;;  %7267 = vmatprep.subr.mxu0 %v10608_v43 }
 0x29c   :  { %7311 = vmatpush3.msra.mxu1 %v8531_v34  ;;  %7268 = vmatpush3.msra.mxu0 %v10799_v52  ;;  %v10802_v52 = vld [vmem:[#allocation90_spill] sm:$0xff] }
 0x29d   :  { %7312 = vmatprep.subr.mxu1 %v10608_v43  ;;  %7269 = vmatprep.subr.mxu0 %v10608_v43  ;;  %v9730_v6 = vpop.f32.mrf.mxu0 }
 0x29e   :  { %7313 = vmatpush3.msra.mxu1 %v8551_v42  ;;  %7270 = vmatpush3.msra.mxu0 %v10800_v26  ;;  %v10803_v26 = vand.u32 4294901760, %v9648_v54 }
 0x29f   :  { %7314 = vmatprep.subr.mxu1 %v10608_v43  ;;  %7271 = vmatprep.subr.mxu0 %v10608_v43  ;;  %v6865_v28 = vpop.f32.mrf.mxu0 }
 0x2a0   :  { %7315 = vmatpush3.msra.mxu1 %v8573_v1  ;;  %7272 = vmatpush3.msra.mxu0 %v10801_v17  ;;  %v10804_v28 = vld [vmem:[#allocation93_spill] sm:$0xff]  ;;  %v10805_v17 = vld [vmem:[#allocation96_spill] sm:$0xff] }
 0x2a1   :  { %7316 = vmatprep.subr.mxu1 %v10608_v43  ;;  %7273 = vmatprep.subr.mxu0 %v10608_v43 }
 0x2a2   :  { %7317 = vmatpush3.msra.mxu1 %v8589_v12  ;;  %7318 = vmatprep.mubr.msk.f32.mxu1 %vm7865_vm0, %v10608_v43 }
 0x2a3   :  { %7274 = vmatpush3.msra.mxu0 %v10802_v52  ;;  %7319 = vmatmul.mubr.f32.vlgmr.msra.gmra.mxu1 %v10803_v26  ;;  %v10806_v26 = vld [vmem:[#allocation99_spill] sm:$0xff] }
 0x2a4   :  { %7356 = vmatprep.subr.mxu1 %v10608_v43  ;;  %7275 = vmatprep.subr.mxu0 %v10608_v43 }
 0x2a5   :  { %7357 = vmatpush3.msra.mxu1 %v8333_v57  ;;  %7276 = vmatpush3.msra.mxu0 %v10804_v28  ;;  %v10807_v28 = vld [vmem:[#allocation102_spill] sm:$0xff] }
 0x2a6   :  { %7358 = vmatprep.subr.mxu1 %v10608_v43  ;;  %7277 = vmatprep.subr.mxu0 %v10608_v43 }
 0x2a7   :  { %7359 = vmatpush3.msra.mxu1 %v8342_v13  ;;  %7278 = vmatpush3.msra.mxu0 %v10805_v17 }
 0x2a8   :  { %7360 = vmatprep.subr.mxu1 %v10608_v43  ;;  %7279 = vmatprep.subr.mxu0 %v10608_v43 }
 0x2a9   :  { %7361 = vmatpush3.msra.mxu1 %v8354_v25  ;;  %7280 = vmatpush3.msra.mxu0 %v10806_v26  ;;  %v10808_v26 = vld [vmem:[#allocation69_spill] sm:$0xff] }
 0x2aa   :  { %7362 = vmatprep.subr.mxu1 %v10608_v43  ;;  %7281 = vmatprep.subr.mxu0 %v10608_v43 }
 0x2ab   :  { %7363 = vmatpush3.msra.mxu1 %v8363_v24  ;;  %7282 = vmatpush3.msra.mxu0 %v10807_v28  ;;  %v10809_v28 = vld [vmem:[#allocation70_spill] sm:$0xff] }
 0x2ac   :  { %7283 = vmatprep.mubr.msk.f32.mxu0 %vm7865_vm0, %v10608_v43  ;;  %7364 = vmatprep.subr.mxu1 %v10608_v43 }
 0x2ad   :  { %7284 = vmatmul.mubr.f32.vlgmr.msra.gmra.mxu0 %v9648_v54  ;;  %7321 = vmatprep.subr.mxu0 %v10608_v43  ;;  %v10810_v54 = vld [vmem:[#allocation71_spill] sm:$0xff] }
 0x2ae   :  { %7365 = vmatpush3.msra.mxu1 %v8383_v49  ;;  %7322 = vmatpush3.msra.mxu0 %v10808_v26  ;;  %v10811_v26 = vld [vmem:[#allocation72_spill] sm:$0xff] }
 0x2af   :  { %7366 = vmatprep.subr.mxu1 %v10608_v43  ;;  %7323 = vmatprep.subr.mxu0 %v10608_v43 }
 0x2b0   :  { %7367 = vmatpush3.msra.mxu1 %v8398_v50  ;;  %7324 = vmatpush3.msra.mxu0 %v10809_v28  ;;  %v10812_v28 = vld [vmem:[#allocation75_spill] sm:$0xff] }
 0x2b1   :  { %7368 = vmatprep.subr.mxu1 %v10608_v43  ;;  %7325 = vmatprep.subr.mxu0 %v10608_v43 }
 0x2b2   :  { %7369 = vmatpush3.msra.mxu1 %v8410_v61  ;;  %7326 = vmatpush3.msra.mxu0 %v10810_v54  ;;  %v10813_v54 = vld [vmem:[#allocation78_spill] sm:$0xff] }
 0x2b3   :  { %7370 = vmatprep.subr.mxu1 %v10608_v43  ;;  %7327 = vmatprep.subr.mxu0 %v10608_v43 }
 0x2b4   :  { %7371 = vmatpush3.msra.mxu1 %v8424_v36  ;;  %7328 = vmatpush3.msra.mxu0 %v10811_v26  ;;  %v10814_v26 = vld [vmem:[#allocation80_spill] sm:$0xff] }
 0x2b5   :  { %7372 = vmatprep.subr.mxu1 %v10608_v43  ;;  %7329 = vmatprep.subr.mxu0 %v10608_v43 }
 0x2b6   :  { %7373 = vmatpush3.msra.mxu1 %v8452_v7  ;;  %7330 = vmatpush3.msra.mxu0 %v10812_v28  ;;  %v2634_v17 = vpop.f32.mrf.mxu1  ;;  %v10815_v28 = vld [vmem:[#allocation83_spill] sm:$0xff] }
 0x2b7   :  { %7374 = vmatprep.subr.mxu1 %v10608_v43  ;;  %7331 = vmatprep.subr.mxu0 %v10608_v43 }
 0x2b8   :  { %7375 = vmatpush3.msra.mxu1 %v8474_v41  ;;  %7332 = vmatpush3.msra.mxu0 %v10813_v54  ;;  %v6970_v52 = vpop.f32.mrf.mxu1 }
 0x2b9   :  { %7376 = vmatprep.subr.mxu1 %v10608_v43  ;;  %7333 = vmatprep.subr.mxu0 %v10608_v43  ;;  %v10816_v52 = vld [vmem:[#allocation86_spill] sm:$0xff] }
 0x2ba   :  { %7377 = vmatpush3.msra.mxu1 %v8493_v46  ;;  %7334 = vmatpush3.msra.mxu0 %v10814_v26  ;;  %v10817_v26 = vld [vmem:[#allocation89_spill] sm:$0xff] }
 0x2bb   :  { %7378 = vmatprep.subr.mxu1 %v10608_v43  ;;  %7335 = vmatprep.subr.mxu0 %v10608_v43 }
 0x2bc   :  { %7379 = vmatpush3.msra.mxu1 %v8512_v58  ;;  %7336 = vmatpush3.msra.mxu0 %v10815_v28  ;;  %v10818_v28 = vld [vmem:[#allocation92_spill] sm:$0xff] }
 0x2bd   :  { %7380 = vmatprep.subr.mxu1 %v10608_v43  ;;  %7337 = vmatprep.subr.mxu0 %v10608_v43 }
 0x2be   :  { %7381 = vmatpush3.msra.mxu1 %v8531_v34  ;;  %7338 = vmatpush3.msra.mxu0 %v10816_v52 }
 0x2bf   :  { %7382 = vmatprep.subr.mxu1 %v10608_v43  ;;  %7339 = vmatprep.subr.mxu0 %v10608_v43 }
 0x2c0   :  { %7383 = vmatpush3.msra.mxu1 %v8551_v42  ;;  %7340 = vmatpush3.msra.mxu0 %v10817_v26  ;;  %v2547_v54 = vpop.f32.mrf.mxu0  ;;  %v10819_v26 = vld [vmem:[#allocation95_spill] sm:$0xff] }
 0x2c1   :  { %7384 = vmatprep.subr.mxu1 %v10608_v43  ;;  %7341 = vmatprep.subr.mxu0 %v10608_v43 }
 0x2c2   :  { %7385 = vmatpush3.msra.mxu1 %v8573_v1  ;;  %7342 = vmatpush3.msra.mxu0 %v10818_v28  ;;  %v6935_v22 = vpop.f32.mrf.mxu0  ;;  %v10820_v28 = vld [vmem:[#allocation98_spill] sm:$0xff] }
 0x2c3   :  { %7386 = vmatprep.subr.mxu1 %v10608_v43  ;;  %7343 = vmatprep.subr.mxu0 %v10608_v43  ;;  %v2340_v22 = vadd.f32 %v9730_v6, %v9652_v39  ;;  %v10822_v39 = vld [vmem:[#allocation35_spill] sm:$0xff]  ;;  %v10823_v6 = vld [vmem:[#allocation106_spill] sm:$0xff] }
 0x2c4   :  { %7387 = vmatpush3.msra.mxu1 %v8589_v12  ;;  %7388 = vmatprep.mubr.msk.f32.mxu1 %vm7865_vm0, %v10608_v43 }
 0x2c5   :  { %7344 = vmatpush3.msra.mxu0 %v10819_v26  ;;  %7389 = vmatmul.mubr.msk.f32.vlgmr.msra.gmra.mxu1 %vm3288_vm6, %v10615_v15  ;;  %v10821_v26 = vld [vmem:[#allocation28_spill] sm:$0xff] }
 0x2c6   :  { %7426 = vmatprep.subr.mxu1 %v10608_v43  ;;  %7345 = vmatprep.subr.mxu0 %v10608_v43 }
 0x2c7   :  { %7427 = vmatpush3.msra.mxu1 %v10738_v4  ;;  %7346 = vmatpush3.msra.mxu0 %v10820_v28  ;;  %v2429_v4 = vadd.f32 %v9708_v10, %v2340_v22  ;;  %v10828_v22 = vld [vmem:[#allocation55_spill] sm:$0xff] }
 0x2c8   :  { %7428 = vmatprep.subr.mxu1 %v10608_v43  ;;  %7347 = vmatprep.subr.mxu0 %v10608_v43 }
 0x2c9   :  { %7429 = vmatpush3.msra.mxu1 %v10821_v26  ;;  %7348 = vmatpush3.msra.mxu0 %v10741_v55  ;;  %v2548_v26 = vadd.f32 %v2547_v54, %v2429_v4  ;;  %v10825_v54 = vld [vmem:[#allocation43_spill] sm:$0xff] }
 0x2ca   :  { %7430 = vmatprep.subr.mxu1 %v10608_v43  ;;  %7349 = vmatprep.subr.mxu0 %v10608_v43 }
 0x2cb   :  { %7431 = vmatpush3.msra.mxu1 %v10742_v31  ;;  %7350 = vmatpush3.msra.mxu0 %v10743_v3  ;;  %v10824_v31 = vld [vmem:[#allocation39_spill] sm:$0xff]  ;;  %v2635_v10 = vadd.f32 %v2634_v17, %v2548_v26 }
 0x2cc   :  { %7432 = vmatprep.subr.mxu1 %v10608_v43  ;;  %7351 = vmatprep.subr.mxu0 %v10608_v43  ;;  %v10827_v17 = vld [vmem:[#allocation51_spill] sm:$0xff] }
 0x2cd   :  { %7433 = vmatpush3.msra.mxu1 %v10822_v39  ;;  %7352 = vmatpush3.msra.mxu0 %v10823_v6  ;;  %v10829_v39 = vld [vmem:[#allocation58_spill] sm:$0xff] }
 0x2ce   :  { %7353 = vmatprep.mubr.msk.f32.mxu0 %vm7865_vm0, %v10608_v43  ;;  %7434 = vmatprep.subr.mxu1 %v10608_v43 }
 0x2cf   :  { %7354 = vmatmul.mubr.msk.f32.vlgmr.msra.gmra.mxu0 %vm3288_vm6, %v10615_v15  ;;  %7391 = vmatprep.subr.mxu0 %v10608_v43 }
 0x2d0   :  { %7435 = vmatpush3.msra.mxu1 %v10824_v31  ;;  %7392 = vmatpush3.msra.mxu0 %v10649_v14 }
 0x2d1   :  { %7436 = vmatprep.subr.mxu1 %v10608_v43  ;;  %7393 = vmatprep.subr.mxu0 %v10608_v43 }
 0x2d2   :  { %7437 = vmatpush3.msra.mxu1 %v10825_v54  ;;  %7394 = vmatpush3.msra.mxu0 %v10651_v48  ;;  %v10831_v54 = vld [vmem:[#allocation63_spill] sm:$0xff] }
 0x2d3   :  { %7438 = vmatprep.subr.mxu1 %v10608_v43  ;;  %7395 = vmatprep.subr.mxu0 %v10608_v43  ;;  %v9867_v26 = vpop.permute.xlu1 %3933 }
 0x2d4   :  { %7439 = vmatpush3.msra.mxu1 %v10826_v35  ;;  %7396 = vmatpush3.msra.mxu0 %v10653_v53  ;;  %vm3935_vm7 = vcmp.eq.s32.totalorder %v8220_v32, %v9867_v26  ;;  %v10868_v26 = vld [vmem:[#allocation91_spill] sm:$0xff] }
 0x2d5   :  { %7440 = vmatprep.subr.mxu1 %v10608_v43  ;;  %5235 = vrot.lane.b32.xlu0 %v2635_v10, %s7876_s26  ;;  %v10830_v10 = vld [vmem:[#allocation61_spill] sm:$0xff]  ;;  %v5307_v35 = vsel %vm3935_vm7, 1.0, %v10608_v43 }
 0x2d6   :  { %7397 = vmatprep.subr.mxu0 %v10608_v43  ;;  %7441 = vmatpush3.msra.mxu1 %v10827_v17  ;;  %v10832_v17 = vld [vmem:[#allocation65_spill] sm:$0xff] }
 0x2d7   :  { %7398 = vmatpush3.msra.mxu0 %v10655_v2  ;;  %7442 = vmatprep.subr.mxu1 %v10608_v43 }
 0x2d8   :  { %7399 = vmatprep.subr.mxu0 %v10608_v43  ;;  %7443 = vmatpush3.msra.mxu1 %v10828_v22  ;;  %v9887_v22 = vsub.f32 %v5307_v35, %v5307_v35 }
 0x2d9   :  { %7400 = vmatpush3.msra.mxu0 %v10657_v45  ;;  %7444 = vmatprep.subr.mxu1 %v10608_v43  ;;  %v2882_v4 = vpop.f32.mrf.mxu1 }
 0x2da   :  { %7401 = vmatprep.subr.mxu0 %v10608_v43  ;;  %7445 = vmatpush3.msra.mxu1 %v10829_v39  ;;  %v10833_v39 = vld [vmem:[#allocation66_spill] sm:$0xff]  ;;  %v4021_v35 = vand.u32 4294901760, %v9887_v22 }
 0x2db   :  { %7402 = vmatpush3.msra.mxu0 %v10659_v40  ;;  %7446 = vmatprep.subr.mxu1 %v10608_v43  ;;  %v7040_v31 = vpop.f32.mrf.mxu1 }
 0x2dc   :  { %7403 = vmatprep.subr.mxu0 %v10608_v43  ;;  %7447 = vmatpush3.msra.mxu1 %v10830_v10 }
 0x2dd   :  { %7404 = vmatpush3.msra.mxu0 %v10661_v8  ;;  %7448 = vmatprep.subr.mxu1 %v10608_v43 }
 0x2de   :  { %7405 = vmatprep.subr.mxu0 %v10608_v43  ;;  %7449 = vmatpush3.msra.mxu1 %v10831_v54 }
 0x2df   :  { %7406 = vmatpush3.msra.mxu0 %v10663_v20  ;;  %7450 = vmatprep.subr.mxu1 %v10608_v43 }
 0x2e0   :  { %7407 = vmatprep.subr.mxu0 %v10608_v43  ;;  %7451 = vmatpush3.msra.mxu1 %v10832_v17  ;;  %v10834_v17 = vld [vmem:[#allocation68_spill] sm:$0xff] }
 0x2e1   :  { %7408 = vmatpush3.msra.mxu0 %v10665_v47  ;;  %7452 = vmatprep.subr.mxu1 %v10608_v43 }
 0x2e2   :  { %7409 = vmatprep.subr.mxu0 %v10608_v43  ;;  %7453 = vmatpush3.msra.mxu1 %v10833_v39  ;;  %v2731_v31 = vpop.f32.mrf.mxu0  ;;  %v10835_v39 = vld [vmem:[#allocation10_spill] sm:$0xff] }
 0x2e3   :  { %7410 = vmatpush3.msra.mxu0 %v10667_v62  ;;  %7454 = vmatprep.subr.mxu1 %v10608_v43  ;;  %v9895_v10 = vadd.f32 %v2882_v4, %v2731_v31  ;;  %v10836_v31 = vld [vmem:[#allocation11_spill] sm:$0xff] }
 0x2e4   :  { %7411 = vmatprep.subr.mxu0 %v10608_v43  ;;  %7455 = vmatpush3.msra.mxu1 %v10756_v51  ;;  %v7005_v54 = vpop.f32.mrf.mxu0  ;;  %v4022_v51 = vsub.f32 %v9887_v22, %v4021_v35 }
 0x2e5   :  { %7412 = vmatpush3.msra.mxu0 %v10669_v27  ;;  %7456 = vmatprep.subr.mxu1 %v10608_v43  ;;  %v10837_v54 = vld [vmem:[#allocation14_spill] sm:$0xff] }
 0x2e6   :  { %7413 = vmatprep.subr.mxu0 %v10608_v43  ;;  %7457 = vmatpush3.msra.mxu1 %v10834_v17  ;;  %v4023_v4 = vand.u32 4294901760, %v4022_v51  ;;  %v10838_v17 = vld [vmem:[#allocation15_spill] sm:$0xff]  ;;  %v10839_v51 = vld [vmem:[#allocation16_spill] sm:$0xff] }
 0x2e7   :  { %7458 = vmatprep.mubr.msk.f32.mxu1 %vm7865_vm0, %v10608_v43  ;;  %7414 = vmatpush3.msra.mxu0 %v10671_v63 }
 0x2e8   :  { %7459 = vmatmul.mubr.msk.f32.vlgmr.msra.gmra.mxu1 %vm3935_vm7, %v10615_v15  ;;  %7496 = vmatprep.subr.mxu1 %v10608_v43 }
 0x2e9   :  { %7415 = vmatprep.subr.mxu0 %v10608_v43  ;;  %7497 = vmatpush3.msra.mxu1 %v10649_v14 }
 0x2ea   :  { %7416 = vmatpush3.msra.mxu0 %v10672_v37  ;;  %7498 = vmatprep.subr.mxu1 %v10608_v43 }
 0x2eb   :  { %7417 = vmatprep.subr.mxu0 %v10608_v43  ;;  %7499 = vmatpush3.msra.mxu1 %v10651_v48 }
 0x2ec   :  { %7418 = vmatpush3.msra.mxu0 %v10674_v18  ;;  %7500 = vmatprep.subr.mxu1 %v10608_v43 }
 0x2ed   :  { %7419 = vmatprep.subr.mxu0 %v10608_v43  ;;  %7501 = vmatpush3.msra.mxu1 %v10653_v53 }
 0x2ee   :  { %7420 = vmatpush3.msra.mxu0 %v10675_v16  ;;  %7502 = vmatprep.subr.mxu1 %v10608_v43 }
 0x2ef   :  { %7421 = vmatprep.subr.mxu0 %v10608_v43  ;;  %7503 = vmatpush3.msra.mxu1 %v10655_v2 }
 0x2f0   :  { %7422 = vmatpush3.msra.mxu0 %v10676_v19  ;;  %7423 = vmatprep.mubr.msk.f32.mxu0 %vm7865_vm0, %v10608_v43 }
 0x2f1   :  { %7504 = vmatprep.subr.mxu1 %v10608_v43  ;;  %7424 = vmatmul.mubr.f32.vlgmr.msra.gmra.mxu0 %v4023_v4 }
 0x2f2   :  { %7461 = vmatprep.subr.mxu0 %v10608_v43  ;;  %7505 = vmatpush3.msra.mxu1 %v10657_v45 }
 0x2f3   :  { %7462 = vmatpush3.msra.mxu0 %v10835_v39  ;;  %7506 = vmatprep.subr.mxu1 %v10608_v43  ;;  %v10840_v39 = vld [vmem:[#allocation20_spill] sm:$0xff] }
 0x2f4   :  { %7463 = vmatprep.subr.mxu0 %v10608_v43  ;;  %7507 = vmatpush3.msra.mxu1 %v10659_v40 }
 0x2f5   :  { %7464 = vmatpush3.msra.mxu0 %v10836_v31  ;;  %7508 = vmatprep.subr.mxu1 %v10608_v43 }
 0x2f6   :  { %7465 = vmatprep.subr.mxu0 %v10608_v43  ;;  %7509 = vmatpush3.msra.mxu1 %v10661_v8 }
 0x2f7   :  { %7466 = vmatpush3.msra.mxu0 %v10837_v54  ;;  %7510 = vmatprep.subr.mxu1 %v10608_v43  ;;  %v10841_v54 = vld [vmem:[#allocation23_spill] sm:$0xff] }
 0x2f8   :  { %7467 = vmatprep.subr.mxu0 %v10608_v43  ;;  %7511 = vmatpush3.msra.mxu1 %v10663_v20 }
 0x2f9   :  { %7468 = vmatpush3.msra.mxu0 %v10838_v17  ;;  %7512 = vmatprep.subr.mxu1 %v10608_v43  ;;  %v10842_v17 = vld [vmem:[#allocation26_spill] sm:$0xff] }
 0x2fa   :  { %7469 = vmatprep.subr.mxu0 %v10608_v43  ;;  %7513 = vmatpush3.msra.mxu1 %v10665_v47 }
 0x2fb   :  { %7470 = vmatpush3.msra.mxu0 %v10839_v51  ;;  %7514 = vmatprep.subr.mxu1 %v10608_v43  ;;  %v9953_v4 = vpop.f32.mrf.mxu1  ;;  %v10843_v51 = vld [vmem:[#allocation36_spill] sm:$0xff] }
 0x2fc   :  { %7471 = vmatprep.subr.mxu0 %v10608_v43  ;;  %7515 = vmatpush3.msra.mxu1 %v10667_v62 }
 0x2fd   :  { %7472 = vmatpush3.msra.mxu0 %v10840_v39  ;;  %7516 = vmatprep.subr.mxu1 %v10608_v43  ;;  %v7110_v31 = vpop.f32.mrf.mxu1 }
 0x2fe   :  { %7473 = vmatprep.subr.mxu0 %v10608_v43  ;;  %7517 = vmatpush3.msra.mxu1 %v10669_v27  ;;  %v10844_v31 = vld [vmem:[#allocation37_spill] sm:$0xff] }
 0x2ff   :  { %7474 = vmatpush3.msra.mxu0 %v10841_v54  ;;  %7518 = vmatprep.subr.mxu1 %v10608_v43 }
 0x300   :  { %7475 = vmatprep.subr.mxu0 %v10608_v43  ;;  %7519 = vmatpush3.msra.mxu1 %v10671_v63 }
 0x301   :  { %7476 = vmatpush3.msra.mxu0 %v10842_v17  ;;  %7520 = vmatprep.subr.mxu1 %v10608_v43  ;;  %v10845_v17 = vld [vmem:[#allocation41_spill] sm:$0xff] }
 0x302   :  { %7477 = vmatprep.subr.mxu0 %v10608_v43  ;;  %7521 = vmatpush3.msra.mxu1 %v10672_v37 }
 0x303   :  { %7478 = vmatpush3.msra.mxu0 %v10843_v51  ;;  %7522 = vmatprep.subr.mxu1 %v10608_v43  ;;  %v10846_v51 = vld [vmem:[#allocation45_spill] sm:$0xff] }
 0x304   :  { %7479 = vmatprep.subr.mxu0 %v10608_v43  ;;  %7523 = vmatpush3.msra.mxu1 %v10674_v18  ;;  %v9973_v39 = vpop.f32.mrf.mxu0 }
 0x305   :  { %7480 = vmatpush3.msra.mxu0 %v10844_v31  ;;  %7524 = vmatprep.subr.mxu1 %v10608_v43  ;;  %v10847_v31 = vld [vmem:[#allocation49_spill] sm:$0xff] }
 0x306   :  { %7481 = vmatprep.subr.mxu0 %v10608_v43  ;;  %7525 = vmatpush3.msra.mxu1 %v10675_v16  ;;  %v7075_v54 = vpop.f32.mrf.mxu0 }
 0x307   :  { %7482 = vmatpush3.msra.mxu0 %v10845_v17  ;;  %7526 = vmatprep.subr.mxu1 %v10608_v43  ;;  %v10848_v54 = vld [vmem:[#allocation53_spill] sm:$0xff] }
 0x308   :  { %7483 = vmatprep.subr.mxu0 %v10608_v43  ;;  %7527 = vmatpush3.msra.mxu1 %v10676_v19  ;;  %v10857_v17 = vld [vmem:[#allocation29_spill] sm:$0xff] }
 0x309   :  { %7528 = vmatprep.mubr.msk.f32.mxu1 %vm7865_vm0, %v10608_v43  ;;  %7484 = vmatpush3.msra.mxu0 %v10846_v51  ;;  %v10861_v51 = vld [vmem:[#allocation48_spill] sm:$0xff] }
 0x30a   :  { %7529 = vmatmul.mubr.f32.vlgmr.msra.gmra.mxu1 %v4021_v35  ;;  %7566 = vmatprep.subr.mxu1 %v10608_v43  ;;  %v10849_v35 = vld [vmem:[#allocation57_spill] sm:$0xff] }
 0x30b   :  { %7485 = vmatprep.subr.mxu0 %v10608_v43  ;;  %7567 = vmatpush3.msra.mxu1 %v10649_v14  ;;  %v10850_v14 = vld [vmem:[#allocation60_spill] sm:$0xff] }
 0x30c   :  { %7486 = vmatpush3.msra.mxu0 %v10847_v31  ;;  %7568 = vmatprep.subr.mxu1 %v10608_v43  ;;  %v10870_v31 = vld [vmem:[#allocation97_spill] sm:$0xff] }
 0x30d   :  { %7487 = vmatprep.subr.mxu0 %v10608_v43  ;;  %7569 = vmatpush3.msra.mxu1 %v10651_v48  ;;  %v10853_v48 = vld [vmem:[#allocation21_spill] sm:$0xff] }
 0x30e   :  { %7488 = vmatpush3.msra.mxu0 %v10848_v54  ;;  %7570 = vmatprep.subr.mxu1 %v10608_v43  ;;  %v10108_v54 = vpop.permute.xlu1 %4580 }
 0x30f   :  { %7489 = vmatprep.subr.mxu0 %v10608_v43  ;;  %7571 = vmatpush3.msra.mxu1 %v10653_v53  ;;  %v10851_v53 = vld [vmem:[#allocation18_spill] sm:$0xff]  ;;  %vm4582_vm8 = vcmp.eq.s32.totalorder %v8220_v32, %v10108_v54 }
 0x310   :  { %7490 = vmatpush3.msra.mxu0 %v10849_v35  ;;  %7572 = vmatprep.subr.mxu1 %v10608_v43  ;;  %v10871_v35 = vld [vmem:[#allocation100_spill] sm:$0xff] }
 0x311   :  { %7491 = vmatprep.subr.mxu0 %v10608_v43  ;;  %7573 = vmatpush3.msra.mxu1 %v10655_v2  ;;  %v10852_v2 = vld [vmem:[#allocation19_spill] sm:$0xff] }
 0x312   :  { %7492 = vmatpush3.msra.mxu0 %v10850_v14  ;;  %7493 = vmatprep.mubr.msk.f32.mxu0 %vm7865_vm0, %v10608_v43 }
 0x313   :  { %7574 = vmatprep.subr.mxu1 %v10608_v43  ;;  %7494 = vmatmul.mubr.f32.vlgmr.msra.gmra.mxu0 %v9887_v22  ;;  %v10856_v22 = vld [vmem:[#allocation25_spill] sm:$0xff] }
 0x314   :  { %7531 = vmatprep.subr.mxu0 %v10608_v43  ;;  %7575 = vmatpush3.msra.mxu1 %v10657_v45  ;;  %v10854_v45 = vld [vmem:[#allocation22_spill] sm:$0xff] }
 0x315   :  { %7532 = vmatpush3.msra.mxu0 %v10851_v53  ;;  %7576 = vmatprep.subr.mxu1 %v10608_v43  ;;  %v10872_v53 = vld [vmem:[#allocation103_spill] sm:$0xff] }
 0x316   :  { %7533 = vmatprep.subr.mxu0 %v10608_v43  ;;  %7577 = vmatpush3.msra.mxu1 %v10659_v40  ;;  %v10855_v40 = vld [vmem:[#allocation24_spill] sm:$0xff] }
 0x317   :  { %7534 = vmatpush3.msra.mxu0 %v10852_v2  ;;  %7578 = vmatprep.subr.mxu1 %v10608_v43 }
 0x318   :  { %7535 = vmatprep.subr.mxu0 %v10608_v43  ;;  %7579 = vmatpush3.msra.mxu1 %v10661_v8 }
 0x319   :  { %7536 = vmatpush3.msra.mxu0 %v10853_v48  ;;  %7580 = vmatprep.subr.mxu1 %v10608_v43  ;;  %v5311_v48 = vsel %vm4582_vm8, 1.0, %v10608_v43 }
 0x31a   :  { %7537 = vmatprep.subr.mxu0 %v10608_v43  ;;  %7581 = vmatpush3.msra.mxu1 %v10663_v20 }
 0x31b   :  { %7538 = vmatpush3.msra.mxu0 %v10854_v45  ;;  %7582 = vmatprep.subr.mxu1 %v10608_v43  ;;  %v10873_v45 = vld [vmem:[#allocation105_spill] sm:$0xff] }
 0x31c   :  { %7539 = vmatprep.subr.mxu0 %v10608_v43  ;;  %7583 = vmatpush3.msra.mxu1 %v10665_v47  ;;  %v10858_v47 = vld [vmem:[#allocation33_spill] sm:$0xff] }
 0x31d   :  { %7540 = vmatpush3.msra.mxu0 %v10855_v40  ;;  %7584 = vmatprep.subr.mxu1 %v10608_v43  ;;  %v10874_v40 = vld [vmem:[#allocation107_spill] sm:$0xff] }
 0x31e   :  { %7541 = vmatprep.subr.mxu0 %v10608_v43  ;;  %7585 = vmatpush3.msra.mxu1 %v10667_v62  ;;  %v3281_v8 = vpop.f32.mrf.mxu1  ;;  %v10859_v62 = vld [vmem:[#allocation40_spill] sm:$0xff] }
 0x31f   :  { %7542 = vmatpush3.msra.mxu0 %v10856_v22  ;;  %7586 = vmatprep.subr.mxu1 %v10608_v43 }
 0x320   :  { %7543 = vmatprep.subr.mxu0 %v10608_v43  ;;  %7587 = vmatpush3.msra.mxu1 %v10669_v27  ;;  %v7180_v20 = vpop.f32.mrf.mxu1  ;;  %v10860_v27 = vld [vmem:[#allocation44_spill] sm:$0xff] }
 0x321   :  { %7544 = vmatpush3.msra.mxu0 %v10857_v17  ;;  %7588 = vmatprep.subr.mxu1 %v10608_v43  ;;  %v10879_v17 = vld [vmem:[#allocation87_spill] sm:$0xff] }
 0x322   :  { %7545 = vmatprep.subr.mxu0 %v10608_v43  ;;  %7589 = vmatpush3.msra.mxu1 %v10671_v63 }
 0x323   :  { %7546 = vmatpush3.msra.mxu0 %v10858_v47  ;;  %7590 = vmatprep.subr.mxu1 %v10608_v43 }
 0x324   :  { %7547 = vmatprep.subr.mxu0 %v10608_v43  ;;  %7591 = vmatpush3.msra.mxu1 %v10672_v37 }
 0x325   :  { %7548 = vmatpush3.msra.mxu0 %v10859_v62  ;;  %7592 = vmatprep.subr.mxu1 %v10608_v43 }
 0x326   :  { %7549 = vmatprep.subr.mxu0 %v10608_v43  ;;  %7593 = vmatpush3.msra.mxu1 %v10674_v18  ;;  %v10862_v18 = vld [vmem:[#allocation73_spill] sm:$0xff] }
 0x327   :  { %7550 = vmatpush3.msra.mxu0 %v10860_v27  ;;  %7594 = vmatprep.subr.mxu1 %v10608_v43  ;;  %v10880_v27 = vld [vmem:[#allocation90_spill] sm:$0xff] }
 0x328   :  { %7551 = vmatprep.subr.mxu0 %v10608_v43  ;;  %7595 = vmatpush3.msra.mxu1 %v10675_v16  ;;  %v3194_v63 = vpop.f32.mrf.mxu0  ;;  %v2987_v16 = vadd.f32 %v9973_v39, %v9895_v10  ;;  %v10865_v39 = vld [vmem:[#allocation64_spill] sm:$0xff] }
 0x329   :  { %7552 = vmatpush3.msra.mxu0 %v10861_v51  ;;  %7596 = vmatprep.subr.mxu1 %v10608_v43  ;;  %v10882_v51 = vld [vmem:[#allocation96_spill] sm:$0xff] }
 0x32a   :  { %7553 = vmatprep.subr.mxu0 %v10608_v43  ;;  %7597 = vmatpush3.msra.mxu1 %v10676_v19  ;;  %v7145_v37 = vpop.f32.mrf.mxu0  ;;  %v10863_v19 = vld [vmem:[#allocation56_spill] sm:$0xff]  ;;  %v3076_v10 = vadd.f32 %v9953_v4, %v2987_v16  ;;  %v10869_v4 = vld [vmem:[#allocation94_spill] sm:$0xff] }
 0x32b   :  { %7598 = vmatprep.mubr.msk.f32.mxu1 %vm7865_vm0, %v10608_v43  ;;  %7554 = vmatpush3.msra.mxu0 %v10705_v21  ;;  %v10864_v21 = vld [vmem:[#allocation59_spill] sm:$0xff] }
 0x32c   :  { %7599 = vmatmul.mubr.msk.f32.vlgmr.msra.gmra.mxu1 %vm3935_vm7, %v10615_v15  ;;  %7636 = vmatprep.subr.mxu1 %v10608_v43  ;;  %v10883_v37 = vld [vmem:[#allocation99_spill] sm:$0xff] }
 0x32d   :  { %7555 = vmatprep.subr.mxu0 %v10608_v43  ;;  %7637 = vmatpush3.msra.mxu1 %v10862_v18 }
 0x32e   :  { %7556 = vmatpush3.msra.mxu0 %v10863_v19  ;;  %7638 = vmatprep.subr.mxu1 %v10608_v43 }
 0x32f   :  { %7557 = vmatprep.subr.mxu0 %v10608_v43  ;;  %7639 = vmatpush3.msra.mxu1 %v10709_v9  ;;  %v3195_v9 = vadd.f32 %v3194_v63, %v3076_v10  ;;  %v10881_v63 = vld [vmem:[#allocation93_spill] sm:$0xff]  ;;  %v10895_v10 = vld [vmem:[#allocation95_spill] sm:$0xff] }
 0x330   :  { %7558 = vmatpush3.msra.mxu0 %v10864_v21  ;;  %7640 = vmatprep.subr.mxu1 %v10608_v43  ;;  %v10894_v21 = vld [vmem:[#allocation92_spill] sm:$0xff] }
 0x331   :  { %7559 = vmatprep.subr.mxu0 %v10608_v43  ;;  %7641 = vmatpush3.msra.mxu1 %v10786_v11  ;;  %v3282_v11 = vadd.f32 %v3281_v8, %v3195_v9  ;;  %v10132_v8 = vsub.f32 %v5311_v48, %v5311_v48 }
 0x332   :  { %7560 = vmatpush3.msra.mxu0 %v10787_v56  ;;  %7642 = vmatprep.subr.mxu1 %v10608_v43  ;;  %v10866_v56 = vld [vmem:[#allocation85_spill] sm:$0xff] }
 0x333   :  { %7561 = vmatprep.subr.mxu0 %v10608_v43  ;;  %7643 = vmatpush3.msra.mxu1 %v10788_v23  ;;  %v10867_v23 = vld [vmem:[#allocation88_spill] sm:$0xff]  ;;  %v4668_v20 = vand.u32 4294901760, %v10132_v8 }
 0x334   :  { %7562 = vmatpush3.msra.mxu0 %v10865_v39  ;;  %7563 = vmatprep.mubr.msk.f32.mxu0 %vm7865_vm0, %v10608_v43 }
 0x335   :  { %7644 = vmatprep.subr.mxu1 %v10608_v43  ;;  %7564 = vmatmul.mubr.msk.f32.vlgmr.msra.gmra.mxu0 %vm3935_vm7, %v10615_v15 }
 0x336   :  { %7601 = vmatprep.subr.mxu0 %v10608_v43  ;;  %7645 = vmatpush3.msra.mxu1 %v10866_v56 }
 0x337   :  { %7602 = vmatpush3.msra.mxu0 %v8333_v57  ;;  %7646 = vmatprep.subr.mxu1 %v10608_v43 }
 0x338   :  { %7603 = vmatprep.subr.mxu0 %v10608_v43  ;;  %7647 = vmatpush3.msra.mxu1 %v10867_v23 }
 0x339   :  { %7604 = vmatpush3.msra.mxu0 %v8342_v13  ;;  %7648 = vmatprep.subr.mxu1 %v10608_v43 }
 0x33a   :  { %7605 = vmatprep.subr.mxu0 %v10608_v43  ;;  %7649 = vmatpush3.msra.mxu1 %v10868_v26 }
 0x33b   :  { %7606 = vmatpush3.msra.mxu0 %v8354_v25  ;;  %7650 = vmatprep.subr.mxu1 %v10608_v43 }
 0x33c   :  { %5239 = vrot.lane.b32.xlu1 %v3282_v11, %s7877_s27  ;;  %7607 = vmatprep.subr.mxu0 %v10608_v43 }
 0x33d   :  { %7651 = vmatpush3.msra.mxu1 %v10869_v4  ;;  %7608 = vmatpush3.msra.mxu0 %v8363_v24 }
 0x33e   :  { %7652 = vmatprep.subr.mxu1 %v10608_v43  ;;  %7609 = vmatprep.subr.mxu0 %v10608_v43 }
 0x33f   :  { %7653 = vmatpush3.msra.mxu1 %v10870_v31  ;;  %7610 = vmatpush3.msra.mxu0 %v8383_v49 }
 0x340   :  { %7654 = vmatprep.subr.mxu1 %v10608_v43  ;;  %7611 = vmatprep.subr.mxu0 %v10608_v43 }
 0x341   :  { %7655 = vmatpush3.msra.mxu1 %v10871_v35  ;;  %7612 = vmatpush3.msra.mxu0 %v8398_v50  ;;  %v10112_v14 = vpop.f32.mrf.mxu1 }
 0x342   :  { %7656 = vmatprep.subr.mxu1 %v10608_v43  ;;  %7613 = vmatprep.subr.mxu0 %v10608_v43 }
 0x343   :  { %7657 = vmatpush3.msra.mxu1 %v10872_v53  ;;  %7614 = vmatpush3.msra.mxu0 %v8410_v61  ;;  %v7250_v2 = vpop.f32.mrf.mxu1 }
 0x344   :  { %7658 = vmatprep.subr.mxu1 %v10608_v43  ;;  %7615 = vmatprep.subr.mxu0 %v10608_v43 }
 0x345   :  { %7659 = vmatpush3.msra.mxu1 %v10873_v45  ;;  %7616 = vmatpush3.msra.mxu0 %v8424_v36 }
 0x346   :  { %7660 = vmatprep.subr.mxu1 %v10608_v43  ;;  %7617 = vmatprep.subr.mxu0 %v10608_v43 }
 0x347   :  { %7661 = vmatpush3.msra.mxu1 %v10874_v40  ;;  %7618 = vmatpush3.msra.mxu0 %v8452_v7 }
 0x348   :  { %7662 = vmatprep.subr.mxu1 %v10608_v43  ;;  %7619 = vmatprep.subr.mxu0 %v10608_v43 }
 0x349   :  { %7663 = vmatpush3.msra.mxu1 %v8657_v5  ;;  %7620 = vmatpush3.msra.mxu0 %v8474_v41 }
 0x34a   :  { %7664 = vmatprep.subr.mxu1 %v10608_v43  ;;  %7621 = vmatprep.subr.mxu0 %v10608_v43 }
 0x34b   :  { %7665 = vmatpush3.msra.mxu1 %v8669_v30  ;;  %7622 = vmatpush3.msra.mxu0 %v8493_v46  ;;  %v10142_v22 = vpop.f32.mrf.mxu0 }
 0x34c   :  { %7666 = vmatprep.subr.mxu1 %v10608_v43  ;;  %7623 = vmatprep.subr.mxu0 %v10608_v43  ;;  %v3530_v16 = vadd.f32 %v10112_v14, %v10142_v22 }
 0x34d   :  { %7667 = vmatpush3.msra.mxu1 %v8677_v59  ;;  %7668 = vmatprep.mubr.msk.f32.mxu1 %vm7865_vm0, %v10608_v43  ;;  %v7215_v5 = vpop.f32.mrf.mxu0  ;;  %v4669_v59 = vsub.f32 %v10132_v8, %v4668_v20 }
 0x34e   :  { %7624 = vmatpush3.msra.mxu0 %v8512_v58  ;;  %7669 = vmatmul.mubr.msk.f32.vlgmr.msra.gmra.mxu1 %vm4582_vm8, %v10615_v15 }
 0x34f   :  { %7706 = vmatprep.subr.mxu1 %v10608_v43  ;;  %7625 = vmatprep.subr.mxu0 %v10608_v43  ;;  %v4670_v30 = vand.u32 4294901760, %v4669_v59 }
 0x350   :  { %7707 = vmatpush3.msra.mxu1 %v8333_v57  ;;  %7626 = vmatpush3.msra.mxu0 %v8531_v34 }
 0x351   :  { %7708 = vmatprep.subr.mxu1 %v10608_v43  ;;  %7627 = vmatprep.subr.mxu0 %v10608_v43 }
 0x352   :  { %7709 = vmatpush3.msra.mxu1 %v8342_v13  ;;  %7628 = vmatpush3.msra.mxu0 %v8551_v42 }
 0x353   :  { %7710 = vmatprep.subr.mxu1 %v10608_v43  ;;  %7629 = vmatprep.subr.mxu0 %v10608_v43 }
 0x354   :  { %7711 = vmatpush3.msra.mxu1 %v8354_v25  ;;  %7630 = vmatpush3.msra.mxu0 %v8573_v1 }
 0x355   :  { %7712 = vmatprep.subr.mxu1 %v10608_v43  ;;  %7631 = vmatprep.subr.mxu0 %v10608_v43 }
 0x356   :  { %7713 = vmatpush3.msra.mxu1 %v8363_v24  ;;  %7632 = vmatpush3.msra.mxu0 %v8589_v12 }
 0x357   :  { %7633 = vmatprep.mubr.msk.f32.mxu0 %vm7865_vm0, %v10608_v43  ;;  %7714 = vmatprep.subr.mxu1 %v10608_v43 }
 0x358   :  { %7634 = vmatmul.mubr.f32.vlgmr.msra.gmra.mxu0 %v4670_v30  ;;  %7671 = vmatprep.subr.mxu0 %v10608_v43 }
 0x359   :  { %7715 = vmatpush3.msra.mxu1 %v8383_v49  ;;  %7672 = vmatpush3.msra.mxu0 %v8352_v29 }
 0x35a   :  { %7716 = vmatprep.subr.mxu1 %v10608_v43  ;;  %7673 = vmatprep.subr.mxu0 %v10608_v43 }
 0x35b   :  { %7717 = vmatpush3.msra.mxu1 %v8398_v50  ;;  %7674 = vmatpush3.msra.mxu0 %v8361_v33  ;;  %v10875_v33 = vld [vmem:[#allocation74_spill] sm:$0xff] }
 0x35c   :  { %7718 = vmatprep.subr.mxu1 %v10608_v43  ;;  %7675 = vmatprep.subr.mxu0 %v10608_v43 }
 0x35d   :  { %7719 = vmatpush3.msra.mxu1 %v8410_v61  ;;  %7676 = vmatpush3.msra.mxu0 %v8376_v0  ;;  %v10877_v0 = vld [vmem:[#allocation81_spill] sm:$0xff] }
 0x35e   :  { %7720 = vmatprep.subr.mxu1 %v10608_v43  ;;  %7677 = vmatprep.subr.mxu0 %v10608_v43 }
 0x35f   :  { %7721 = vmatpush3.msra.mxu1 %v8424_v36  ;;  %7678 = vmatpush3.msra.mxu0 %v8394_v38 }
 0x360   :  { %7722 = vmatprep.subr.mxu1 %v10608_v43  ;;  %7679 = vmatprep.subr.mxu0 %v10608_v43 }
 0x361   :  { %7723 = vmatpush3.msra.mxu1 %v8452_v7  ;;  %7680 = vmatpush3.msra.mxu0 %v8415_v60  ;;  %v10876_v60 = vld [vmem:[#allocation77_spill] sm:$0xff] }
 0x362   :  { %7724 = vmatprep.subr.mxu1 %v10608_v43  ;;  %7681 = vmatprep.subr.mxu0 %v10608_v43 }
 0x363   :  { %7725 = vmatpush3.msra.mxu1 %v8474_v41  ;;  %7682 = vmatpush3.msra.mxu0 %v8432_v44  ;;  %v10200_v29 = vpop.f32.mrf.mxu1  ;;  %v10878_v44 = vld [vmem:[#allocation84_spill] sm:$0xff] }
 0x364   :  { %7726 = vmatprep.subr.mxu1 %v10608_v43  ;;  %7683 = vmatprep.subr.mxu0 %v10608_v43 }
 0x365   :  { %7727 = vmatpush3.msra.mxu1 %v8493_v46  ;;  %7684 = vmatpush3.msra.mxu0 %v10875_v33  ;;  %v7320_v38 = vpop.f32.mrf.mxu1 }
 0x366   :  { %7728 = vmatprep.subr.mxu1 %v10608_v43  ;;  %7685 = vmatprep.subr.mxu0 %v10608_v43 }
 0x367   :  { %7729 = vmatpush3.msra.mxu1 %v8512_v58  ;;  %7686 = vmatpush3.msra.mxu0 %v10876_v60 }
 0x368   :  { %7730 = vmatprep.subr.mxu1 %v10608_v43  ;;  %7687 = vmatprep.subr.mxu0 %v10608_v43 }
 0x369   :  { %7731 = vmatpush3.msra.mxu1 %v8531_v34  ;;  %7688 = vmatpush3.msra.mxu0 %v10877_v0 }
 0x36a   :  { %7732 = vmatprep.subr.mxu1 %v10608_v43  ;;  %7689 = vmatprep.subr.mxu0 %v10608_v43 }
 0x36b   :  { %7733 = vmatpush3.msra.mxu1 %v8551_v42  ;;  %7690 = vmatpush3.msra.mxu0 %v10878_v44  ;;  %v5228_v44 = vpop.permute.xlu0 %5227 }
 0x36c   :  { %7734 = vmatprep.subr.mxu1 %v10608_v43  ;;  %7691 = vmatprep.subr.mxu0 %v10608_v43 }
 0x36d   :  { %7735 = vmatpush3.msra.mxu1 %v8573_v1  ;;  %7692 = vmatpush3.msra.mxu0 %v10879_v17  ;;  %v3633_v47 = vpop.f32.mrf.mxu0  ;;  %v5232_v17 = vpop.permute.xlu1 %5231 }
 0x36e   :  { %7736 = vmatprep.subr.mxu1 %v10608_v43  ;;  %7693 = vmatprep.subr.mxu0 %v10608_v43  ;;  %v3634_v19 = vadd.f32 %v3633_v47, %v3530_v16 }
 0x36f   :  { %7737 = vmatpush3.msra.mxu1 %v8589_v12  ;;  %7738 = vmatprep.mubr.msk.f32.mxu1 %vm7865_vm0, %v10608_v43  ;;  %v7285_v62 = vpop.f32.mrf.mxu0  ;;  %v5236_v47 = vpop.permute.xlu0 %5235 }
 0x370   :  { %7694 = vmatpush3.msra.mxu0 %v10880_v27  ;;  %7739 = vmatmul.mubr.f32.vlgmr.msra.gmra.mxu1 %v4668_v20  ;;  %v10897_v27 = vld [vmem:[#allocation5_spill] sm:$0xff] }
 0x371   :  { %7776 = vmatprep.subr.mxu1 %v10608_v43  ;;  %7695 = vmatprep.subr.mxu0 %v10608_v43 }
 0x372   :  { %7777 = vmatpush3.msra.mxu1 %v8333_v57  ;;  %7696 = vmatpush3.msra.mxu0 %v10881_v63  ;;  %v10884_v57 = vld [vmem:[#allocation102_spill] sm:$0xff]  ;;  %v5255_v63 = vsel %vm5254_vm9, %v10897_v27, %v5228_v44 }
 0x373   :  { %7778 = vmatprep.subr.mxu1 %v10608_v43  ;;  %7697 = vmatprep.subr.mxu0 %v10608_v43 }
 0x374   :  { %7779 = vmatpush3.msra.mxu1 %v8342_v13  ;;  %7698 = vmatpush3.msra.mxu0 %v10882_v51  ;;  %v10887_v13 = vld [vmem:[#allocation71_spill] sm:$0xff]  ;;  %v5257_v51 = vsel %vm5256_vm10, %v5255_v63, %v5232_v17 }
 0x375   :  { %7780 = vmatprep.subr.mxu1 %v10608_v43  ;;  %7699 = vmatprep.subr.mxu0 %v10608_v43 }
 0x376   :  { %7781 = vmatpush3.msra.mxu1 %v8354_v25  ;;  %7700 = vmatpush3.msra.mxu0 %v10883_v37  ;;  %v10885_v25 = vld [vmem:[#allocation69_spill] sm:$0xff] }
 0x377   :  { %7782 = vmatprep.subr.mxu1 %v10608_v43  ;;  %7701 = vmatprep.subr.mxu0 %v10608_v43 }
 0x378   :  { %7783 = vmatpush3.msra.mxu1 %v8363_v24  ;;  %7702 = vmatpush3.msra.mxu0 %v10884_v57  ;;  %v10886_v24 = vld [vmem:[#allocation70_spill] sm:$0xff]  ;;  %v5259_v57 = vsel %vm5258_vm11, %v5257_v51, %v5236_v47 }
 0x379   :  { %7703 = vmatprep.mubr.msk.f32.mxu0 %vm7865_vm0, %v10608_v43  ;;  %7784 = vmatprep.subr.mxu1 %v10608_v43 }
 0x37a   :  { %7704 = vmatmul.mubr.f32.vlgmr.msra.gmra.mxu0 %v10132_v8  ;;  %7741 = vmatprep.subr.mxu0 %v10608_v43 }
 0x37b   :  { %7785 = vmatpush3.msra.mxu1 %v8383_v49  ;;  %7742 = vmatpush3.msra.mxu0 %v10885_v25  ;;  %v10888_v49 = vld [vmem:[#allocation72_spill] sm:$0xff] }
 0x37c   :  { %7786 = vmatprep.subr.mxu1 %v10608_v43  ;;  %7743 = vmatprep.subr.mxu0 %v10608_v43 }
 0x37d   :  { %7787 = vmatpush3.msra.mxu1 %v8398_v50  ;;  %7744 = vmatpush3.msra.mxu0 %v10886_v24  ;;  %v10889_v50 = vld [vmem:[#allocation75_spill] sm:$0xff] }
 0x37e   :  { %7788 = vmatprep.subr.mxu1 %v10608_v43  ;;  %7745 = vmatprep.subr.mxu0 %v10608_v43 }
 0x37f   :  { %7789 = vmatpush3.msra.mxu1 %v8410_v61  ;;  %7746 = vmatpush3.msra.mxu0 %v10887_v13  ;;  %v10890_v61 = vld [vmem:[#allocation78_spill] sm:$0xff] }
 0x380   :  { %7790 = vmatprep.subr.mxu1 %v10608_v43  ;;  %7747 = vmatprep.subr.mxu0 %v10608_v43 }
 0x381   :  { %7791 = vmatpush3.msra.mxu1 %v8424_v36  ;;  %7748 = vmatpush3.msra.mxu0 %v10888_v49  ;;  %v10891_v36 = vld [vmem:[#allocation80_spill] sm:$0xff] }
 0x382   :  { %7792 = vmatprep.subr.mxu1 %v10608_v43  ;;  %7749 = vmatprep.subr.mxu0 %v10608_v43 }
 0x383   :  { %7793 = vmatpush3.msra.mxu1 %v8452_v7  ;;  %7750 = vmatpush3.msra.mxu0 %v10889_v50 }
 0x384   :  { %7794 = vmatprep.subr.mxu1 %v10608_v43  ;;  %7751 = vmatprep.subr.mxu0 %v10608_v43 }
 0x385   :  { %7795 = vmatpush3.msra.mxu1 %v8474_v41  ;;  %7752 = vmatpush3.msra.mxu0 %v10890_v61  ;;  %v3928_v18 = vpop.f32.mrf.mxu1  ;;  %v10892_v41 = vld [vmem:[#allocation83_spill] sm:$0xff] }
 0x386   :  { %7796 = vmatprep.subr.mxu1 %v10608_v43  ;;  %7753 = vmatprep.subr.mxu0 %v10608_v43 }
 0x387   :  { %7797 = vmatpush3.msra.mxu1 %v8493_v46  ;;  %7754 = vmatpush3.msra.mxu0 %v10891_v36  ;;  %v7390_v7 = vpop.f32.mrf.mxu1  ;;  %v10893_v46 = vld [vmem:[#allocation89_spill] sm:$0xff] }
 0x388   :  { %7798 = vmatprep.subr.mxu1 %v10608_v43  ;;  %7755 = vmatprep.subr.mxu0 %v10608_v43 }
 0x389   :  { %7799 = vmatpush3.msra.mxu1 %v8512_v58  ;;  %7756 = vmatpush3.msra.mxu0 %v10892_v41  ;;  %v3723_v58 = vadd.f32 %v10200_v29, %v3634_v19 }
 0x38a   :  { %7800 = vmatprep.subr.mxu1 %v10608_v43  ;;  %7757 = vmatprep.subr.mxu0 %v10608_v43 }
 0x38b   :  { %7801 = vmatpush3.msra.mxu1 %v8531_v34  ;;  %7758 = vmatpush3.msra.mxu0 %v10816_v52 }
 0x38c   :  { %7802 = vmatprep.subr.mxu1 %v10608_v43  ;;  %7759 = vmatprep.subr.mxu0 %v10608_v43 }
 0x38d   :  { %7803 = vmatpush3.msra.mxu1 %v8551_v42  ;;  %7760 = vmatpush3.msra.mxu0 %v10893_v46 }
 0x38e   :  { %7804 = vmatprep.subr.mxu1 %v10608_v43  ;;  %7761 = vmatprep.subr.mxu0 %v10608_v43 }
 0x38f   :  { %7805 = vmatpush3.msra.mxu1 %v8573_v1  ;;  %7762 = vmatpush3.msra.mxu0 %v10894_v21  ;;  %v3841_v34 = vpop.f32.mrf.mxu0 }
 0x390   :  { %7806 = vmatprep.subr.mxu1 %v10608_v43  ;;  %7763 = vmatprep.subr.mxu0 %v10608_v43  ;;  %v3842_v52 = vadd.f32 %v3841_v34, %v3723_v58 }
 0x391   :  { %7807 = vmatpush3.msra.mxu1 %v8589_v12  ;;  %7808 = vmatprep.mubr.msk.f32.mxu1 %vm7865_vm0, %v10608_v43  ;;  %v7355_v42 = vpop.f32.mrf.mxu0  ;;  %v10896_v12 = vmov 7  }
 0x392   :  { %7764 = vmatpush3.msra.mxu0 %v10895_v10  ;;  %7809 = vmatmul.mubr.msk.f32.vlgmr.msra.gmra.mxu1 %vm4582_vm8, %v10615_v15  ;;  %v3929_v1 = vadd.f32 %v3928_v18, %v3842_v52 }
 0x393   :  { %7765 = vmatprep.subr.mxu0 %v10608_v43  ;;  %7773 = vmatprep.mubr.msk.f32.mxu0 %vm7865_vm0, %v10608_v43 }
 0x394   :  { %7766 = vmatpush3.msra.mxu0 %v10820_v28  ;;  %5243 = vrot.lane.b32.xlu0 %v3929_v1, %s7878_s28 }
 0x395   :  { %7767 = vmatprep.subr.mxu0 %v10608_v43  ;;  %7838 = vset.pattern.permute.xlu0 %v10896_v12 }
 0x396   :  { %7768 = vmatpush3.msra.mxu0 %v10741_v55 }
 0x397   :  { %7769 = vmatprep.subr.mxu0 %v10608_v43 }
 0x398   :  { %7770 = vmatpush3.msra.mxu0 %v10743_v3 }
 0x399   :  { %7771 = vmatprep.subr.mxu0 %v10608_v43 }
 0x39a   :  { %7772 = vmatpush3.msra.mxu0 %v10823_v6 }
 0x39b   :  { %7774 = vmatmul.mubr.msk.f32.vlgmr.msra.gmra.mxu0 %vm4582_vm8, %v10615_v15 }
 0x3a8   :  { %v4176_v28 = vpop.f32.mrf.mxu1 }
 0x3aa   :  { %v7460_v39 = vpop.f32.mrf.mxu1 }
 0x3ae   :  { %v5240_v62 = vpop.permute.xlu1 %5239 }
 0x3af   :  { %v5261_v24 = vsel %vm5260_vm12, %v5259_v57, %v5240_v62 }
 0x3b1   :  { %v4025_v9 = vpop.f32.mrf.mxu0 }
 0x3b2   :  { %v4177_v31 = vadd.f32 %v4176_v28, %v4025_v9 }
 0x3b3   :  { %v7425_v56 = vpop.f32.mrf.mxu0 }
 0x3ca   :  { %v4369_v11 = vpop.f32.mrf.mxu1 }
 0x3cc   :  { %v7530_v23 = vpop.f32.mrf.mxu1 }
 0x3d3   :  { %v4280_v55 = vpop.f32.mrf.mxu0 }
 0x3d4   :  { %v4281_v35 = vadd.f32 %v4280_v55, %v4177_v31 }
 0x3d5   :  { %v7495_v26 = vpop.f32.mrf.mxu0 }
 0x3d6   :  { %v4370_v43 = vadd.f32 %v4369_v11, %v4281_v35 }
 0x3ec   :  { %v4575_v4 = vpop.f32.mrf.mxu1 }
 0x3ee   :  { %v7600_v3 = vpop.f32.mrf.mxu1 }
 0x3f5   :  { %v4488_v14 = vpop.f32.mrf.mxu0 }
 0x3f6   :  { %v4489_v6 = vadd.f32 %v4488_v14, %v4370_v43 }
 0x3f7   :  { %v7565_v53 = vpop.f32.mrf.mxu0 }
 0x3f8   :  { %v4576_v2 = vadd.f32 %v4575_v4, %v4489_v6 }
 0x3fa   :  { %5247 = vrot.lane.b32.xlu1 %v4576_v2, %s7879_s29 }
 0x406   :  { %v5244_v37 = vpop.permute.xlu0 %5243 }
 0x407   :  { %v5263_v13 = vsel %vm5262_vm13, %v5261_v24, %v5244_v37 }
 0x40e   :  { %v4823_v15 = vpop.f32.mrf.mxu1 }
 0x410   :  { %v7670_v32 = vpop.f32.mrf.mxu1 }
 0x418   :  { %v4672_v54 = vpop.f32.mrf.mxu0 }
 0x419   :  { %v4824_v5 = vadd.f32 %v4823_v15, %v4672_v54 }
 0x41a   :  { %v7635_v48 = vpop.f32.mrf.mxu0 }
 0x430   :  { %v5016_v45 = vpop.f32.mrf.mxu1 }
 0x432   :  { %v7740_v40 = vpop.f32.mrf.mxu1 }
 0x43a   :  { %v4927_v8 = vpop.f32.mrf.mxu0 }
 0x43b   :  { %v4928_v30 = vadd.f32 %v4927_v8, %v4824_v5 }
 0x43c   :  { %v7705_v22 = vpop.f32.mrf.mxu0 }
 0x43d   :  { %v5017_v29 = vadd.f32 %v5016_v45, %v4928_v30 }
 0x452   :  { %v5222_v20 = vpop.f32.mrf.mxu1 }
 0x454   :  { %v7810_v59 = vpop.f32.mrf.mxu1 }
 0x45b   :  { %v5135_v33 = vpop.f32.mrf.mxu0 }
 0x45c   :  { %v5136_v38 = vadd.f32 %v5135_v33, %v5017_v29 }
 0x45d   :  { %v7775_v60 = vpop.f32.mrf.mxu0 }
 0x45e   :  { %v5223_v0 = vadd.f32 %v5222_v20, %v5136_v38 }
 0x460   :  { %5251 = vrot.lane.b32.xlu0 %v5223_v0, %s7880_s30 }
 0x46c   :  { %v5248_v25 = vpop.permute.xlu1 %5247 }
 0x46d   :  { %v5265_v49 = vsel %vm5264_vm14, %v5263_v13, %v5248_v25 }
 0x4d2   :  { %v5252_v50 = vpop.permute.xlu0 %5251 }
 0x4d3   :  { %v5267_v61 = vsel %vm5266_vm15, %v5265_v49, %v5252_v50 }
 0x4d4   :  { %5268 = vst [vmem:[#allocation2] sm:$0xff] %v5267_v61 }
 0x4d5   :  { %7852 = shalt.err (!%p7849_p4)
}
 0x4d6   :  { %5278 = dma.vmem_to_hbm [thread:$0]  %s5276_s5, 128, %s10328_s3, [#allocation3]  }
 0x4d7   :  { %7861 = dma.done.wait [#allocation3], 128  }
 0x4d8   :  { %7862 = vsyncadd [#allocation3], 4294967168 }
 0x4d9   :  { %5282 = vsyncpa [#allocation3], 1 }

</bundles_post_ra>
